<compile_context>
chip_gen: v5e
topology: v5e:2x2
jax: 0.10.0
libtpu: 0.0.40
codegen_flags: <defaults>
</compile_context>

<pallas_src>
import functools

import jax
import jax.numpy as jnp
import numpy as np
from jax.experimental import pallas as pl
from jax.experimental.pallas import tpu as pltpu


def _make_kernel(xf, a_x, x_0, a_t, t_0):
    """Kernel closes over the static affine constants and space_features."""

    def kernel(x_ref, wx_ref, bx_ref, e_ref, wt_ref, bt_ref, o_ref):
        x = x_ref[...]                                  # (TB, xf+1) f32
        xs = (x[:, :xf] - x_0) * a_x                    # (TB, xf)
        yt = (x[:, xf:] - t_0) * a_t                    # (TB, 1)

        # --- space branch: Linear(xf -> Mx) + sin -------------------------
        wx = wx_ref[...]                                # (xf, Mx)
        if xf >= 8:
            hx = jnp.dot(xs, wx, preferred_element_type=jnp.float32)
        else:
            # space_features is tiny: unrolled broadcast-MACs on the VPU
            hx = xs[:, 0:1] * wx[0:1, :]
            for d in range(1, xf):
                hx = hx + xs[:, d:d + 1] * wx[d:d + 1, :]
        y_x = jnp.sin(hx + bx_ref[...])                 # (TB, Mx)

        # replicate y_x[:, i] across columns [i*Mt, (i+1)*Mt) with a constant
        # 0/1 matrix on the MXU (exact copy, no reshape/gather in the kernel)
        y_x_rep = jnp.dot(y_x, e_ref[...],
                          preferred_element_type=jnp.float32)   # (TB, Mx*Mt)

        # --- time branch: Linear(1 -> Mx*Mt) + sin, masked by the PoU -----
        y_t = jnp.sin(yt * wt_ref[...] + bt_ref[...])   # (TB, Mx*Mt)
        pou = jnp.logical_and(yt >= -1.0, yt <= 1.0).astype(jnp.float32)

        o_ref[...] = (y_x_rep * (y_t * pou)).astype(o_ref.dtype)

    return kernel


@functools.partial(
    jax.jit,
    static_argnames=("space_features", "Mx", "Mt",
                     "x_max", "x_min", "t_max", "t_min"))
def local_mul_rep_forward(x, Wx, bx, Wt, bt, *, space_features, Mx, Mt,
                          x_max, x_min, t_max, t_min):
    xf = space_features
    d_out = Mx * Mt
    part = x.shape[:-1]
    d_in = x.shape[-1]
    if d_in != xf + 1:
        raise ValueError("last dim of x must be space_features + 1")

    a_x = 2.0 / (x_max - x_min)
    a_t = 2.0 / (t_max - t_min)
    x_0 = (x_max + x_min) / 2.0
    t_0 = (t_max + t_min) / 2.0

    N = int(np.prod(part)) if part else 1
    x2d = x.reshape(N, d_in).astype(jnp.float32)        # free (contiguous)

    # --- small parameter tensors (loaded into VMEM once, revisited) --------
    wxT = Wx.astype(jnp.float32).T                      # (xf, Mx)
    bx2 = bx.astype(jnp.float32).reshape(1, Mx)
    wt2 = Wt.astype(jnp.float32).reshape(1, d_out)      # Wt is (Mx*Mt, 1)
    bt2 = bt.astype(jnp.float32).reshape(1, d_out)
    # 0/1 expansion matrix: E[i, k] = 1 iff k // Mt == i
    E = (jnp.arange(d_out, dtype=jnp.int32)[None, :] // Mt
         == jnp.arange(Mx, dtype=jnp.int32)[:, None]).astype(jnp.float32)

    # --- batch tiling -------------------------------------------------------
    # as many rows per tile as possible while double-buffered in+out blocks
    # stay under ~8 MiB (safe for v7x's 64 MiB VMEM, great for v5e/v6e too)
    row_bytes = 4 * (d_in + d_out)
    tb = 1024
    while tb > 8 and 2 * tb * row_bytes > 8 * 2**20:
        tb //= 2
    n8 = ((N + 7) // 8) * 8
    tb = min(tb, n8)
    if tb >= n8 and n8 >= 16 and (n8 // 2) % 8 == 0:
        tb = n8 // 2        # keep >= 2 grid steps so v7x can use both TCs
    n_pad = ((N + tb - 1) // tb) * tb
    if n_pad != N:          # pad only for a ragged tail
        x2d = jnp.pad(x2d, ((0, n_pad - N), (0, 0)))

    kernel = _make_kernel(xf, a_x, x_0, a_t, t_0)

    out = pl.pallas_call(
        kernel,
        out_shape=jax.ShapeDtypeStruct((n_pad, d_out), jnp.float32),
        grid=(n_pad // tb,),
        in_specs=[
            pl.BlockSpec((tb, d_in), lambda i: (i, 0)),
            pl.BlockSpec((xf, Mx), lambda i: (0, 0)),
            pl.BlockSpec((1, Mx), lambda i: (0, 0)),
            pl.BlockSpec((Mx, d_out), lambda i: (0, 0)),
            pl.BlockSpec((1, d_out), lambda i: (0, 0)),
            pl.BlockSpec((1, d_out), lambda i: (0, 0)),
        ],
        out_specs=pl.BlockSpec((tb, d_out), lambda i: (i, 0)),
        compiler_params=pltpu.CompilerParams(
            dimension_semantics=("parallel",),
            vmem_limit_bytes=32 * 1024 * 1024),
    )(x2d, wxT, bx2, E, wt2, bt2)

    if n_pad != N:
        out = out[:N]
    return out.reshape(part + (d_out,))                 # free reshape


def local_mul_rep_ref(x, Wx, bx, Wt, bt, *, space_features, Mx, Mt,
                      x_max, x_min, t_max, t_min):
    """Pure-JAX reference mirroring the PyTorch forward exactly."""
    xf = space_features
    a_x = 2.0 / (x_max - x_min)
    a_t = 2.0 / (t_max - t_min)
    x_0 = (x_max + x_min) / 2.0
    t_0 = (t_max + t_min) / 2.0
    part = x.shape[:-1]
    y = a_x * (x[..., :xf] - x_0)
    y_x = jnp.sin(y @ Wx.T + bx)                         # (*part, Mx)
    y = a_t * (x[..., xf:] - t_0)                        # (*part, 1)
    y_t_rfm = jnp.sin(y @ Wt.T + bt)                     # (*part, Mx*Mt)
    c0 = jnp.logical_and(y >= -1, y <= 1).astype(y_t_rfm.dtype)
    y_t = c0 * y_t_rfm
    out = y_x.reshape(part + (Mx, 1)) * y_t.reshape(part + (Mx, Mt))
    return out.reshape(part + (Mx * Mt,))


if __name__ == "__main__":
    key = jax.random.PRNGKey(0)
    k1, k2, k3, k4, k5 = jax.random.split(key, 5)

    space_features, Mx, Mt = 3, 32, 4        # Mx*Mt = 128 -> lane-dense output
    x_max, x_min, t_max, t_min = 1.0, -1.0, 2.0, 0.0

    part = (2, 64)                           # 128 collocation points
    # sample beyond [t_min, t_max] so the partition-of-unity mask is exercised
    x = jax.random.uniform(k1, part + (space_features + 1,),
                           dtype=jnp.float32, minval=-1.5, maxval=2.5)
    Wx = 0.5 * jax.random.normal(k2, (Mx, space_features), dtype=jnp.float32)
    bx = 0.5 * jax.random.normal(k3, (Mx,), dtype=jnp.float32)
    Wt = 0.5 * jax.random.normal(k4, (Mx * Mt, 1), dtype=jnp.float32)
    bt = 0.5 * jax.random.normal(k5, (Mx * Mt,), dtype=jnp.float32)

    cfg = dict(space_features=space_features, Mx=Mx, Mt=Mt,
               x_max=x_max, x_min=x_min, t_max=t_max, t_min=t_min)

    out = local_mul_rep_forward(x, Wx, bx, Wt, bt, **cfg)
    out = jax.block_until_ready(out)

    ref = local_mul_rep_ref(x, Wx, bx, Wt, bt, **cfg)
    assert out.shape == part + (Mx * Mt,), out.shape
    np.testing.assert_allclose(np.asarray(out), np.asarray(ref),
                               rtol=1e-5, atol=1e-5)
    print("KERNEL_OK")
</pallas_src>

<mosaic_0001>
module attributes {stable_mosaic.version = 11 : i64} {
  func.func @kernel(%arg0: i32, %arg1: memref<64x4xf32, #tpu.memory_space<vmem>>, %arg2: memref<3x32xf32, #tpu.memory_space<vmem>>, %arg3: memref<1x32xf32, #tpu.memory_space<vmem>>, %arg4: memref<32x128xf32, #tpu.memory_space<vmem>>, %arg5: memref<1x128xf32, #tpu.memory_space<vmem>>, %arg6: memref<1x128xf32, #tpu.memory_space<vmem>>, %arg7: memref<64x128xf32, #tpu.memory_space<vmem>>) attributes {dimension_semantics = [#tpu.dimension_semantics<parallel>], iteration_bounds = array<i64: 2>, scalar_prefetch = 0 : i64, scratch_operands = 0 : i64, tpu.core_type = #tpu.core_type<tc>, window_params = [{transform_indices = @transform_0, window_bounds = array<i64: 64, 4>}, {pipeline_mode = #tpu.pipeline_mode<synchronous>, transform_indices = @transform_1, window_bounds = array<i64: 3, 32>}, {pipeline_mode = #tpu.pipeline_mode<synchronous>, transform_indices = @transform_2, window_bounds = array<i64: 1, 32>}, {pipeline_mode = #tpu.pipeline_mode<synchronous>, transform_indices = @transform_3, window_bounds = array<i64: 32, 128>}, {pipeline_mode = #tpu.pipeline_mode<synchronous>, transform_indices = @transform_4, window_bounds = array<i64: 1, 128>}, {pipeline_mode = #tpu.pipeline_mode<synchronous>, transform_indices = @transform_5, window_bounds = array<i64: 1, 128>}, {transform_indices = @transform_6, window_bounds = array<i64: 64, 128>}]} {
    %c0 = arith.constant 0 : index
    %c0_0 = arith.constant 0 : index
    %0 = vector.load %arg1[%c0, %c0_0] : memref<64x4xf32, #tpu.memory_space<vmem>>, vector<64x4xf32>
    %1 = vector.extract_strided_slice %0 {offsets = [0, 0], sizes = [64, 3], strides = [1, 1]} : vector<64x4xf32> to vector<64x3xf32>
    %cst = arith.constant 0.000000e+00 : f32
    %2 = vector.broadcast %cst : f32 to vector<64x3xf32>
    %3 = arith.subf %1, %2 : vector<64x3xf32>
    %cst_1 = arith.constant 1.000000e+00 : f32
    %4 = vector.broadcast %cst_1 : f32 to vector<64x3xf32>
    %5 = arith.mulf %3, %4 : vector<64x3xf32>
    %6 = vector.extract_strided_slice %0 {offsets = [0, 3], sizes = [64, 1], strides = [1, 1]} : vector<64x4xf32> to vector<64x1xf32>
    %cst_2 = arith.constant 1.000000e+00 : f32
    %7 = vector.broadcast %cst_2 : f32 to vector<64x1xf32>
    %8 = arith.subf %6, %7 : vector<64x1xf32>
    %cst_3 = arith.constant 1.000000e+00 : f32
    %9 = vector.broadcast %cst_3 : f32 to vector<64x1xf32>
    %10 = arith.mulf %8, %9 : vector<64x1xf32>
    %c0_4 = arith.constant 0 : index
    %c0_5 = arith.constant 0 : index
    %11 = vector.load %arg2[%c0_4, %c0_5] : memref<3x32xf32, #tpu.memory_space<vmem>>, vector<3x32xf32>
    %12 = vector.extract_strided_slice %5 {offsets = [0, 0], sizes = [64, 1], strides = [1, 1]} : vector<64x3xf32> to vector<64x1xf32>
    %13 = vector.extract_strided_slice %11 {offsets = [0, 0], sizes = [1, 32], strides = [1, 1]} : vector<3x32xf32> to vector<1x32xf32>
    %14 = vector.broadcast %12 : vector<64x1xf32> to vector<64x32xf32>
    %15 = vector.broadcast %13 : vector<1x32xf32> to vector<64x32xf32>
    %16 = arith.mulf %14, %15 : vector<64x32xf32>
    %17 = vector.extract_strided_slice %5 {offsets = [0, 1], sizes = [64, 1], strides = [1, 1]} : vector<64x3xf32> to vector<64x1xf32>
    %18 = vector.extract_strided_slice %11 {offsets = [1, 0], sizes = [1, 32], strides = [1, 1]} : vector<3x32xf32> to vector<1x32xf32>
    %19 = vector.broadcast %17 : vector<64x1xf32> to vector<64x32xf32>
    %20 = vector.broadcast %18 : vector<1x32xf32> to vector<64x32xf32>
    %21 = arith.mulf %19, %20 : vector<64x32xf32>
    %22 = arith.addf %16, %21 : vector<64x32xf32>
    %23 = vector.extract_strided_slice %5 {offsets = [0, 2], sizes = [64, 1], strides = [1, 1]} : vector<64x3xf32> to vector<64x1xf32>
    %24 = vector.extract_strided_slice %11 {offsets = [2, 0], sizes = [1, 32], strides = [1, 1]} : vector<3x32xf32> to vector<1x32xf32>
    %25 = vector.broadcast %23 : vector<64x1xf32> to vector<64x32xf32>
    %26 = vector.broadcast %24 : vector<1x32xf32> to vector<64x32xf32>
    %27 = arith.mulf %25, %26 : vector<64x32xf32>
    %28 = arith.addf %22, %27 : vector<64x32xf32>
    %c0_6 = arith.constant 0 : index
    %c0_7 = arith.constant 0 : index
    %29 = vector.load %arg3[%c0_6, %c0_7] : memref<1x32xf32, #tpu.memory_space<vmem>>, vector<1x32xf32>
    %30 = vector.broadcast %29 : vector<1x32xf32> to vector<64x32xf32>
    %31 = arith.addf %28, %30 : vector<64x32xf32>
    %32 = math.sin %31 : vector<64x32xf32>
    %c0_8 = arith.constant 0 : index
    %c0_9 = arith.constant 0 : index
    %33 = vector.load %arg4[%c0_8, %c0_9] : memref<32x128xf32, #tpu.memory_space<vmem>>, vector<32x128xf32>
    %cst_10 = arith.constant dense<0.000000e+00> : vector<64x128xf32>
    %34 = tpu.matmul %32, %33, %cst_10 {dimension_numbers = #tpu.dot_dimension_numbers<[1], [0], [0], [1], [0, 0, 1, 1], [], []>} : vector<64x32xf32>, vector<32x128xf32>, vector<64x128xf32> -> vector<64x128xf32>
    %c0_11 = arith.constant 0 : index
    %c0_12 = arith.constant 0 : index
    %35 = vector.load %arg5[%c0_11, %c0_12] : memref<1x128xf32, #tpu.memory_space<vmem>>, vector<1x128xf32>
    %36 = vector.broadcast %10 : vector<64x1xf32> to vector<64x128xf32>
    %37 = vector.broadcast %35 : vector<1x128xf32> to vector<64x128xf32>
    %38 = arith.mulf %36, %37 : vector<64x128xf32>
    %c0_13 = arith.constant 0 : index
    %c0_14 = arith.constant 0 : index
    %39 = vector.load %arg6[%c0_13, %c0_14] : memref<1x128xf32, #tpu.memory_space<vmem>>, vector<1x128xf32>
    %40 = vector.broadcast %39 : vector<1x128xf32> to vector<64x128xf32>
    %41 = arith.addf %38, %40 : vector<64x128xf32>
    %42 = math.sin %41 : vector<64x128xf32>
    %cst_15 = arith.constant -1.000000e+00 : f32
    %43 = vector.broadcast %cst_15 : f32 to vector<64x1xf32>
    %44 = arith.cmpf oge, %10, %43 : vector<64x1xf32>
    %cst_16 = arith.constant 1.000000e+00 : f32
    %45 = vector.broadcast %cst_16 : f32 to vector<64x1xf32>
    %46 = arith.cmpf ole, %10, %45 : vector<64x1xf32>
    %47 = arith.andi %44, %46 : vector<64x1xi1>
    %48 = arith.extui %47 : vector<64x1xi1> to vector<64x1xi32>
    %49 = arith.sitofp %48 : vector<64x1xi32> to vector<64x1xf32>
    %50 = vector.broadcast %49 : vector<64x1xf32> to vector<64x128xf32>
    %51 = arith.mulf %42, %50 : vector<64x128xf32>
    %52 = arith.mulf %34, %51 : vector<64x128xf32>
    %c0_17 = arith.constant 0 : index
    %c0_18 = arith.constant 0 : index
    %53 = vector.load %arg7[%c0_17, %c0_18] : memref<64x128xf32, #tpu.memory_space<vmem>>, vector<64x128xf32>
    tpu.vector_store %arg7[%c0_17, %c0_18], %52 {strides = array<i32>} : memref<64x128xf32, #tpu.memory_space<vmem>>, vector<64x128xf32>,
    return
  }
  func.func @transform_0(%arg0: i32) -> (i32, i32) {
    %c0_i32 = arith.constant 0 : i32
    %c0_i32_0 = arith.constant 0 : i32
    return %arg0, %c0_i32 : i32, i32
  }
  func.func @transform_1(%arg0: i32) -> (i32, i32) {
    %c0_i32 = arith.constant 0 : i32
    %c0_i32_0 = arith.constant 0 : i32
    %c0_i32_1 = arith.constant 0 : i32
    return %c0_i32, %c0_i32_0 : i32, i32
  }
  func.func @transform_2(%arg0: i32) -> (i32, i32) {
    %c0_i32 = arith.constant 0 : i32
    %c0_i32_0 = arith.constant 0 : i32
    %c0_i32_1 = arith.constant 0 : i32
    return %c0_i32, %c0_i32_0 : i32, i32
  }
  func.func @transform_3(%arg0: i32) -> (i32, i32) {
    %c0_i32 = arith.constant 0 : i32
    %c0_i32_0 = arith.constant 0 : i32
    %c0_i32_1 = arith.constant 0 : i32
    return %c0_i32, %c0_i32_0 : i32, i32
  }
  func.func @transform_4(%arg0: i32) -> (i32, i32) {
    %c0_i32 = arith.constant 0 : i32
    %c0_i32_0 = arith.constant 0 : i32
    %c0_i32_1 = arith.constant 0 : i32
    return %c0_i32, %c0_i32_0 : i32, i32
  }
  func.func @transform_5(%arg0: i32) -> (i32, i32) {
    %c0_i32 = arith.constant 0 : i32
    %c0_i32_0 = arith.constant 0 : i32
    %c0_i32_1 = arith.constant 0 : i32
    return %c0_i32, %c0_i32_0 : i32, i32
  }
  func.func @transform_6(%arg0: i32) -> (i32, i32) {
    %c0_i32 = arith.constant 0 : i32
    %c0_i32_0 = arith.constant 0 : i32
    return %arg0, %c0_i32 : i32, i32
  }
}

</mosaic_0001>

<bundles_post_ra>
// kernel: local_mul_rep_forward.1
= control target key start
LH: loop header
LB: loop body
LE: loop exit
PB: predicated region body
PF: predicated region fallthrough
CT: control target
= control target key end

     0   :  { %11 = vsyncpa [#allocation3], 0  ;;  %s6226_s0 = inlined_call_operand.vmem [shape: f32[128,4], index: 0, kind: input, shape index: {}]   ;;  %s6227_s1 = inlined_call_operand.vmem [shape: f32[3,32], index: 1, kind: input, shape index: {}]   ;;  %s6228_s2 = inlined_call_operand.vmem [shape: f32[1,32], index: 2, kind: input, shape index: {}]   ;;  %s6229_s3 = inlined_call_operand.vmem [shape: f32[32,128], index: 3, kind: input, shape index: {}]   ;;  %s6230_s4 = inlined_call_operand.vmem [shape: f32[1,128], index: 4, kind: input, shape index: {}]   ;;  %s6231_s5 = inlined_call_operand.vmem [shape: f32[1,128], index: 5, kind: input, shape index: {}]   ;;  %s6232_s6 = inlined_call_operand.hbm [shape: f32[128,128], index: 6, kind: output, shape index: {}]  }
   0x1   :  { %13 = vsyncpa [#allocation3 + $0x1], 0  ;;  %s3531_s21 = smov 0   ;;  %s3533_s22 = smov 0  }
   0x2   :  { %s3535_s23 = smov 0   ;;  %s3537_s24 = smov 0  }
   0x3 LB: > { %s3552_s25 = sadd.s32 4294967295, %s3481_s24   ;;  %s3225_s26 = sadd.s32 4294967294, %s3481_s24   ;;  %s3481_s24 = sphi %s3537_s24, %s6460_s24   ;;  %s3477_s23 = sphi %s3535_s23, %s6459_s23   ;;  %s3473_s22 = sphi %s3533_s22, %s6458_s22   ;;  %s3469_s21 = sphi %s3531_s21, %s6457_s21  }
   0x4   : > { %s3556_s27 = sadd.s32 1, %s3481_s24   ;;  %s157_s28 = sadd.s32 1, %s3477_s23 }
   0x5   : > { %s154_s29 = ssub.s32 %s3481_s24, %s3556_s27  ;;  %p167_p0 = scmp.ne.s32.totalorder %s3477_s23, %s3473_s22 }
   0x6   : > { %p155_p1 = scmp.eq.s32.totalorder %s154_s29, 0  ;;  %p168_p2 = scmp.eq.s32.totalorder %s3552_s25, 1 }
   0x7   : > { %p173_p3 = scmp.ne.s32.totalorder %s3473_s22, %s3469_s21  ;;  %p174_p4 = scmp.eq.s32.totalorder %s3225_s26, 1 }
   0x8   : > { %s3567_s30 = scalar_select %p155_p1, %s3477_s23, %s157_s28  }
   0x9   : > { %p3569_p5 = por %p168_p2, %p167_p0  ;;  %p3573_p6 = por %p174_p4, %p173_p3 }
   0xa   : > { %p3228_p7 = scmp.ge.s32.totalorder %s3481_s24, 1  ;;  %p216_p8 = scmp.lt.s32.totalorder %s3481_s24, 3 }
   0xc   : > { %p217_p9 = pnand %p3228_p7, %p216_p8 }
   0xe   : > { %220 = sbr.rel (%p217_p9) target bundleno = 847 (0x34f), region = 44 }
  0x13   : > { %s3230_s9 = sshll.u32 %s3552_s25, 3  ;;  %v3483_v0 = vmov 2   ;;  %v3484_v1 = vmov 1   ;;  %v6240_v6 = vmov 0   ;;  %v3486_v12 = vmov 3   ;;  %s243_s19 = sand.u32 1, %s3473_s22  }
  0x14   : > { %3375 = vset.pattern.permute.xlu2 %v3483_v0  ;;  %3378 = vset.pattern.permute.xlu0 %v3484_v1  ;;  %p247_p10 = scmp.lt.s32.totalorder %s3230_s9, 15  ;;  %v269_v23 = vld [vmem:[%s6227_s1] sm:$0x7]  ;;  %v3487_v43 = vmov 0.0   ;;  %s3229_s20 = sshll.u32 %s243_s19, 6 }
  0x15   : > { %3374 = vset.pattern.permute.xlu1 %v3484_v1  ;;  %v3610_v26 = vperm.slane %v269_v23, 0  ;;  %v3615_v30 = vperm.slane %v269_v23, 1  ;;  %v3630_v50 = vperm.slane %v269_v23, 2  ;;  %s5498_s26 = scalar_lea.vmem [#allocation2], %s3229_s20  ;;  %s3309_s28 = sshll.u32 %s3552_s25, 6 }
  0x16   : > { %s6462_s9 = smov (!%p247_p10, %s3230_s9), 15  ;;  %s3160_s11 = sshll.u32 %s5498_s26, 4  ;;  %s3161_s11 = int_to_ptr.vmem [resolvable:$true] %s3160_s11 }
  0x17   : > { %s3231_s10 = sshll.u32 %s6462_s9, 3  ;;  %s3148_s12 = scalar_lea.sflag [#allocation3], %s243_s19 }
  0x18   : > { %s3583_s13 = scalar_lea.vmem %s6226_s0, %s3231_s10  ;;  %s3159_s10 = scalar_lea.hbm %s6232_s6, %s3309_s28 }
  0x19   : > { %v257_v2 = vld [vmem:[%s3583_s13 + $0x20] sm:$0xff]  ;;  %v255_v3 = vld [vmem:[%s3583_s13 + $0x10] sm:$0xff]  ;;  %v258_v7 = vld [vmem:[%s3583_s13 + $0x28] sm:$0xff]  ;;  %s3162_s25 = sshll.u32 %s3159_s10, 4  ;;  %s3439_s17 = scalar_lea.hbm %s6232_s6, 128  ;;  %s3163_s25 = int_to_ptr.hbm [resolvable:$true] %s3162_s25 }
  0x1a   : > { %385 = vperm.xlu2 %3375, %v257_v2   ;;  %336 = vperm.xlu1 %3374, %v257_v2   ;;  %v259_v4 = vld [vmem:[%s3583_s13 + $0x30] sm:$0xff]  ;;  %v253_v5 = vld [vmem:[%s3583_s13] sm:$0xff]  ;;  %v260_v8 = vld [vmem:[%s3583_s13 + $0x38] sm:$0xff]  ;;  %v3597_v13 = vadd.f32 -1.0, %v258_v7  ;;  %v3234_v15 = vadd.f32 -1.0, %v255_v3  ;;  %v3600_v17 = vadd.f32 -1.0, %v257_v2 }
  0x1b   : > { %328 = vperm.xlu0 %3378, %v255_v3   ;;  %v256_v9 = vld [vmem:[%s3583_s13 + $0x18] sm:$0xff]  ;;  %v3232_v10 = vadd.f32 -1.0, %v253_v5  ;;  %v254_v11 = vld [vmem:[%s3583_s13 + $0x8] sm:$0xff]  ;;  %v3238_v18 = vadd.f32 -1.0, %v259_v4  ;;  %v3239_v20 = vadd.f32 -1.0, %v260_v8  ;;  %s3433_s13 = sshra.s32 %s3163_s25, 4  ;;  %s3434_s13 = int_to_ptr.hbm [resolvable:$true] %s3433_s13 }
  0x1c   : > { %v3233_v14 = vadd.f32 -1.0, %v254_v11  ;;  %v3235_v16 = vadd.f32 -1.0, %v256_v9  ;;  %vm3045_vm6 = vcmp.ge.f32.partialorder %v3234_v15, -1.0  ;;  %vm3053_vm8 = vcmp.le.f32.partialorder %v3234_v15, 1.0  ;;  %s3435_s14 = scalar_lea.hbm %s3434_s13, 64  ;;  %p3440_p0 = scmp.lt.s32.totalorder %s3434_s13, %s6232_s6 }
  0x1d   : > { %vm3043_vm0 = vcmp.ge.f32.partialorder %v3232_v10, -1.0  ;;  %vm3051_vm2 = vcmp.le.f32.partialorder %v3232_v10, 1.0  ;;  %vm3061_vm10 = vmand %vm3045_vm6, %vm3053_vm8  ;;  %vm3049_vm12 = vcmp.ge.f32.partialorder %v3238_v18, -1.0  ;;  %vm3050_vm13 = vcmp.ge.f32.partialorder %v3239_v20, -1.0  ;;  %p3436_p11 = scmp.ne.s32.totalorder %s3434_s13, %s3435_s14  ;;  %p3441_p1 = scmp.lt.s32.totalorder %s3439_s17, %s3435_s14 }
  0x1e   : > { %vm3044_vm1 = vcmp.ge.f32.partialorder %v3233_v14, -1.0  ;;  %vm3052_vm3 = vcmp.le.f32.partialorder %v3233_v14, 1.0  ;;  %vm3059_vm4 = vmand %vm3043_vm0, %vm3051_vm2  ;;  %vm3046_vm7 = vcmp.ge.f32.partialorder %v3235_v16, -1.0  ;;  %vm3054_vm9 = vcmp.le.f32.partialorder %v3235_v16, 1.0 }
  0x1f   : > { %vm3060_vm5 = vmand %vm3044_vm1, %vm3052_vm3  ;;  %v3296_v44 = vsel %vm3059_vm4, 1.0, %v3487_v43  ;;  %v3298_v49 = vsel %vm3061_vm10, 1.0, %v3487_v43  ;;  %vm3057_vm14 = vcmp.le.f32.partialorder %v3238_v18, 1.0  ;;  %vm3058_vm15 = vcmp.le.f32.partialorder %v3239_v20, 1.0  ;;  %p3437_p12 = pnand %p3436_p11, %p3569_p5  ;;  %p3442_p2 = por %p3441_p1, %p3440_p0 }
  0x20   : > { %v3297_v45 = vsel %vm3060_vm5, 1.0, %v3487_v43  ;;  %vm3062_vm11 = vmand %vm3046_vm7, %vm3054_vm9  ;;  %vm3047_vm2 = vcmp.ge.f32.partialorder %v3600_v17, -1.0  ;;  %vm3055_vm3 = vcmp.le.f32.partialorder %v3600_v17, 1.0  ;;  %vm3048_vm4 = vcmp.ge.f32.partialorder %v3597_v13, -1.0 }
  0x21   : > { %v3394_v46 = vpack.i.bf16 %v3297_v45, %v3296_v44  ;;  %v3299_v51 = vsel %vm3062_vm11, 1.0, %v3487_v43  ;;  %vm3065_vm0 = vmand %vm3049_vm12, %vm3057_vm14  ;;  %v3684_v44 = vld [vmem:[%s6230_s4] ss:$0 sm:$0xff]  ;;  %vm3056_vm5 = vcmp.le.f32.partialorder %v3597_v13, 1.0  ;;  %p3438_p13 = pneg %p3437_p12 }
  0x22   : > { %393 = vperm.xlu2 %3375, %v259_v4   ;;  %344 = vperm.xlu1 %3374, %v259_v4   ;;  %v3399_v52 = vpack.i.bf16 %v3299_v51, %v3298_v49  ;;  %vm3066_vm1 = vmand %vm3050_vm13, %vm3058_vm15  ;;  %v3302_v59 = vsel %vm3065_vm0, 1.0, %v3487_v43 }
  0x23   : > { %3382 = vset.pattern.permute.xlu0 %v3483_v0  ;;  %v3303_v63 = vsel %vm3066_vm1, 1.0, %v3487_v43  ;;  %vm3063_vm6 = vmand %vm3047_vm2, %vm3055_vm3  ;;  %p3443_p3 = pnand %p3442_p2, %p3438_p13 }
  0x24   : > { %369 = vperm.xlu0 %3382, %v253_v5   ;;  %vm3064_vm7 = vmand %vm3048_vm4, %vm3056_vm5 }
  0x2a   : > { %3377 = vset.pattern.permute.xlu2 %v3484_v1  ;;  %3376 = vset.pattern.permute.xlu1 %v6240_v6 }
  0x2b   : > { %282 = vperm.xlu1 %3376, %v255_v3   ;;  %320 = vperm.xlu2 %3377, %v253_v5  }
  0x2c   : > { %3383 = vset.pattern.permute.xlu0 %v6240_v6 }
  0x2d   : > { %292 = vperm.xlu0 %3383, %v257_v2  }
  0x33   : > { %297 = vperm.xlu1 %3376, %v258_v7   ;;  %3379 = vset.pattern.permute.xlu2 %v6240_v6 }
  0x34   : > { %307 = vperm.xlu2 %3379, %v260_v8  }
  0x35   : > { %302 = vperm.xlu0 %3383, %v259_v4  }
  0x3b   : > { %3380 = vset.pattern.permute.xlu1 %v3484_v1 }
  0x3c   : > { %340 = vperm.xlu1 %3380, %v258_v7   ;;  %3381 = vset.pattern.permute.xlu2 %v3484_v1 }
  0x3d   : > { %272 = vperm.xlu0 %3383, %v253_v5   ;;  %348 = vperm.xlu2 %3381, %v260_v8   ;;  %v3646_v5 = vld [vmem:[%s6228_s2] ss:$0 sm:$0xff] }
  0x44   : > { %3384 = vset.pattern.permute.xlu1 %v3483_v0 }
  0x45   : > { %377 = vperm.xlu1 %3384, %v255_v3   ;;  %287 = vperm.xlu0 %3383, %v256_v9  }
  0x46   : > { %3385 = vset.pattern.permute.xlu2 %v3483_v0 }
  0x47   : > { %389 = vperm.xlu2 %3385, %v258_v7  }
  0x4d   : > { %397 = vperm.xlu1 %3384, %v260_v8   ;;  %3391 = vset.pattern.permute.xlu0 %v3486_v12 }
  0x4e   : > { %1742 = vperm.xlu0 %3391, %v3232_v10  }
  0x4f   : > { %3386 = vset.pattern.permute.xlu2 %v6240_v6 }
  0x50   : > { %277 = vperm.xlu2 %3386, %v254_v11  }
  0x55   : > { %3387 = vset.pattern.permute.xlu1 %v3484_v1 }
  0x56   : > { %324 = vperm.xlu1 %3387, %v254_v11   ;;  %1767 = vperm.xlu0 %3391, %v3597_v13  }
  0x58   : > { %3388 = vset.pattern.permute.xlu2 %v3484_v1  ;;  %v3409_v1 = vpack.i.bf16 %v3303_v63, %v3302_v59  ;;  %v3300_v59 = vsel %vm3063_vm6, 1.0, %v3487_v43 }
  0x59   : > { %332 = vperm.xlu2 %3388, %v256_v9  }
  0x5e   : > { %3389 = vset.pattern.permute.xlu1 %v3483_v0  ;;  %3395 = vperm.xlu0 %3391, %v3394_v46   ;;  %v3692_v46 = vld [vmem:[%s6231_s5] ss:$0 sm:$0xff] }
  0x5f   : > { %373 = vperm.xlu1 %3389, %v254_v11  }
  0x61   : > { %3390 = vset.pattern.permute.xlu2 %v3483_v0 }
  0x62   : > { %381 = vperm.xlu2 %3390, %v256_v9  }
  0x66   : > { %3410 = vperm.xlu0 %3391, %v3409_v1  }
  0x67   : > { %3392 = vset.pattern.permute.xlu1 %v3486_v12 }
  0x68   : > { %1747 = vperm.xlu1 %3392, %v3233_v14  }
  0x6a   : > { %3393 = vset.pattern.permute.xlu2 %v3486_v12 }
  0x6b   : > { %1752 = vperm.xlu2 %3393, %v3234_v15  }
  0x70   : > { %1757 = vperm.xlu1 %3392, %v3235_v16  }
  0x73   : > { %1762 = vperm.xlu2 %3393, %v3600_v17  }
  0x74   : > { %v3603_v19 = vpop.permute.xlu2 %385 }
  0x75   : > { %v405_v9 = vmul.f32 %v3630_v50, %v3603_v19 }
  0x78   : > { %1772 = vperm.xlu1 %3392, %v3238_v18  }
  0x7b   : > { %1777 = vperm.xlu2 %3393, %v3239_v20  }
  0x7c   : > { %v3605_v21 = vpop.permute.xlu2 %393 }
  0x80   : > { %3400 = vperm.xlu1 %3392, %v3399_v52  }
  0x85   : > { %v321_v22 = vpop.permute.xlu2 %320 }
  0x86   : > { %v352_v60 = vmul.f32 %v3615_v30, %v321_v22 }
  0x8c   : > { %v337_v24 = vpop.permute.xlu1 %336 }
  0x8d   : > { %v329_v25 = vpop.permute.xlu0 %328  ;;  %v356_v61 = vmul.f32 %v3615_v30, %v337_v24 }
  0x8e   : > { %v308_v27 = vpop.permute.xlu2 %307  ;;  %v354_v35 = vmul.f32 %v3615_v30, %v329_v25 }
  0x8f   : > { %v318_v28 = vmul.f32 %v3610_v26, %v308_v27 }
  0x94   : > { %v3613_v29 = vpop.permute.xlu1 %344 }
  0x95   : > { %v358_v16 = vmul.f32 %v3615_v30, %v3613_v29 }
  0x96   : > { %v370_v31 = vpop.permute.xlu0 %369 }
  0x97   : > { %v349_v32 = vpop.permute.xlu2 %348  ;;  %v401_v2 = vmul.f32 %v3630_v50, %v370_v31 }
  0x98   : > { %v359_v33 = vmul.f32 %v3615_v30, %v349_v32 }
  0x9a   : > { %v3618_v34 = vadd.f32 %v359_v33, %v318_v28  ;;  %v407_v28 = vmul.f32 %v3630_v50, %v3605_v21 }
  0x9d   : > { %v283_v36 = vpop.permute.xlu1 %282 }
  0x9e   : > { %v313_v37 = vmul.f32 %v3610_v26, %v283_v36 }
  0x9f   : > { %v293_v38 = vpop.permute.xlu0 %292 }
  0xa0   : > { %v3622_v39 = vadd.f32 %v354_v35, %v313_v37  ;;  %v315_v53 = vmul.f32 %v3610_v26, %v293_v38 }
  0xa1   : > { %v390_v40 = vpop.permute.xlu2 %389 }
  0xa2   : > { %v406_v55 = vmul.f32 %v3630_v50, %v390_v40  ;;  %v364_v3 = vadd.f32 %v356_v61, %v315_v53 }
  0xa4   : > { %v413_v14 = vadd.f32 %v405_v9, %v364_v3 }
  0xa5   : > { %v298_v41 = vpop.permute.xlu1 %297 }
  0xa6   : > { %v316_v56 = vmul.f32 %v3610_v26, %v298_v41  ;;  %v3663_v25 = vadd.f32 %v3646_v5, %v413_v14 }
  0xa7   : > { %v303_v42 = vpop.permute.xlu0 %302 }
  0xa8   : > { %v317_v11 = vmul.f32 %v3610_v26, %v303_v42  ;;  %v1052_v36 = vand.u32 2139095040, %v3663_v25  ;;  %v6233_v3 = vand.u32 2147483647, %v3663_v25 }
  0xaa   : > { %v278_v47 = vpop.permute.xlu2 %277  ;;  %v366_v23 = vadd.f32 %v358_v16, %v317_v11  ;;  %v1053_v41 = vshrl.u32 %v1052_v36, 23 }
  0xab   : > { %v3627_v48 = vmul.f32 %v3610_v26, %v278_v47 }
  0xac   : > { %v415_v32 = vadd.f32 %v407_v28, %v366_v23 }
  0xae   : > { %v341_v54 = vpop.permute.xlu1 %340 }
  0xaf   : > { %v357_v57 = vmul.f32 %v3615_v30, %v341_v54  ;;  %v273_v58 = vpop.permute.xlu0 %272 }
  0xb0   : > { %v311_v62 = vmul.f32 %v3610_v26, %v273_v58 }
  0xb1   : > { %v365_v0 = vadd.f32 %v357_v57, %v316_v56 }
  0xb2   : > { %v360_v4 = vadd.f32 %v352_v60, %v311_v62  ;;  %v3301_v60 = vsel %vm3064_vm7, 1.0, %v3487_v43 }
  0xb3   : > { %v414_v7 = vadd.f32 %v406_v55, %v365_v0  ;;  %v333_v8 = vpop.permute.xlu2 %332 }
  0xb4   : > { %v409_v10 = vadd.f32 %v401_v2, %v360_v4  ;;  %v355_v19 = vmul.f32 %v3615_v30, %v333_v8  ;;  %v3404_v2 = vpack.i.bf16 %v3301_v60, %v3300_v59 }
  0xb5   : > { %v3652_v12 = vadd.f32 %v3646_v5, %v414_v7 }
  0xb6   : > { %v3655_v15 = vadd.f32 %v3646_v5, %v409_v10  ;;  %3405 = vperm.xlu2 %3393, %v3404_v2  }
  0xb7   : > { %v378_v18 = vpop.permute.xlu1 %377  ;;  %v288_v20 = vpop.permute.xlu0 %287  ;;  %v1207_v13 = vand.u32 2139095040, %v3652_v12 }
  0xb8   : > { %v403_v22 = vmul.f32 %v3630_v50, %v378_v18  ;;  %v314_v24 = vmul.f32 %v3610_v26, %v288_v20  ;;  %v432_v4 = vand.u32 2139095040, %v3655_v15  ;;  %v3725_v20 = vand.u32 8388607, %v6233_v3 }
  0xb9   : > { %v1208_v8 = vshrl.u32 %v1207_v13, 23 }
  0xba   : > { %v411_v27 = vadd.f32 %v403_v22, %v3622_v39  ;;  %v363_v33 = vadd.f32 %v355_v19, %v314_v24  ;;  %v3675_v39 = vadd.f32 %v3646_v5, %v415_v32  ;;  %v433_v23 = vshrl.u32 %v432_v4, 23 }
  0xbc   : > { %v3669_v31 = vadd.f32 %v3646_v5, %v411_v27  ;;  %v382_v29 = vpop.permute.xlu2 %381  ;;  %v1362_v47 = vand.u32 2139095040, %v3675_v39  ;;  %v3255_v27 = vadd.s32 4294967169, %v1208_v8 }
  0xbd   : > { %v404_v35 = vmul.f32 %v3630_v50, %v382_v29 }
  0xbe   : > { %v1363_v56 = vshrl.u32 %v1362_v47, 23  ;;  %v742_v11 = vand.u32 2139095040, %v3669_v31  ;;  %v6236_v47 = vmov 2475754826  }
  0xbf   : > { %v412_v37 = vadd.f32 %v404_v35, %v363_v33  ;;  %v398_v26 = vpop.permute.xlu1 %397 }
  0xc0   : > { %v408_v38 = vmul.f32 %v3630_v50, %v398_v26  ;;  %v1743_v40 = vpop.permute.xlu0 %1742  ;;  %v3258_v61 = vadd.s32 4294967169, %v1363_v56  ;;  %v743_v28 = vshrl.u32 %v742_v11, 23 }
  0xc1   : > { %v3678_v21 = vadd.f32 %v3646_v5, %v412_v37  ;;  %v1783_v52 = vmul.f32 %v3684_v44, %v1743_v40  ;;  %v6238_v40 = vmov 683565275  }
  0xc2   : > { %v416_v42 = vadd.f32 %v408_v38, %v3618_v34  ;;  %v3252_v34 = vadd.s32 4294967169, %v1053_v41  ;;  %v1369_v43 = vadd.s32 1, %v3258_v61  ;;  %v3240_v38 = vadd.s32 4294967169, %v433_v23 }
  0xc3   : > { %v3705_v17 = vadd.f32 %v3692_v46, %v1783_v52  ;;  %v897_v18 = vand.u32 2139095040, %v3678_v21  ;;  %v1214_v52 = vadd.s32 1, %v3255_v27 }
  0xc4   : > { %v3687_v45 = vadd.f32 %v3646_v5, %v416_v42  ;;  %v1059_v57 = vadd.s32 1, %v3252_v34  ;;  %vm1370_vm9 = vcmp.gt.s32.totalorder %v1369_v43, 0  ;;  %v6234_v34 = vmov 2131351028  }
  0xc5   : > { %v1753_v49 = vpop.permute.xlu2 %1752  ;;  %6318 = vst [vmem:[#allocation7_spill] sm:$0xff] %v3705_v17  ;;  %v1806_v1 = vand.u32 2139095040, %v3705_v17  ;;  %v439_v13 = vadd.s32 1, %v3240_v38  ;;  %vm1215_vm11 = vcmp.gt.s32.totalorder %v1214_v52, 0 }
  0xc6   : > { %6316 = vst [vmem:[#allocation5_spill] sm:$0xff] %v3687_v45  ;;  %v1785_v51 = vmul.f32 %v3684_v44, %v1753_v49  ;;  %vm1060_vm8 = vcmp.gt.s32.totalorder %v1059_v57, 0  ;;  %v1517_v32 = vand.u32 2139095040, %v3687_v45 }
  0xc7   : > { %v1061_v7 = vsel %vm1060_vm8, %v1059_v57, 0  ;;  %v1807_v16 = vshrl.u32 %v1806_v1, 23  ;;  %vm440_vm12 = vcmp.gt.s32.totalorder %v439_v13, 0 }
  0xc8   : > { %v325_v53 = vpop.permute.xlu1 %324  ;;  %v3702_v54 = vadd.f32 %v3692_v46, %v1785_v51  ;;  %v1768_v55 = vpop.permute.xlu0 %1767  ;;  %v3727_v22 = vand.u32 31, %v1061_v7  ;;  %v3735_v37 = vshrl.u32 %v1061_v7, 5  ;;  %v1518_v59 = vshrl.u32 %v1517_v32, 23 }
  0xc9   : > { %v1788_v58 = vmul.f32 %v3684_v44, %v1768_v55  ;;  %v353_v0 = vmul.f32 %v3615_v30, %v325_v53  ;;  %v3246_v53 = vadd.s32 4294967169, %v743_v28  ;;  %v6248_v28 = vmov 920167782  }
  0xca   : > { %6317 = vst [vmem:[#allocation6_spill] sm:$0xff] %v3702_v54  ;;  %v2116_v10 = vand.u32 2139095040, %v3702_v54  ;;  %v1064_v26 = vsub.s32 32, %v3727_v22  ;;  %v1066_v41 = vshll.u32 %v6238_v40, %v3727_v22  ;;  %v1069_v49 = vshll.u32 %v6236_v47, %v3727_v22 }
  0xcb   : > { %v3712_v63 = vadd.f32 %v3692_v46, %v1788_v58  ;;  %v361_v14 = vadd.f32 %v353_v0, %v3627_v48  ;;  %v3272_v48 = vadd.s32 4294967169, %v1807_v16  ;;  %v1072_v51 = vshll.u32 %v6234_v34, %v3727_v22 }
  0xcc   : > { %v2117_v24 = vshrl.u32 %v2116_v10, 23  ;;  %v1067_v0 = vshrl.u32 %v6236_v47, %v1064_v26  ;;  %v1070_v1 = vshrl.u32 %v6234_v34, %v1064_v26  ;;  %v749_v10 = vadd.s32 1, %v3246_v53 }
  0xcd   : > { %v1763_v62 = vpop.permute.xlu2 %1762  ;;  %6319 = vst [vmem:[#allocation8_spill] sm:$0xff] %v3712_v63  ;;  %v1813_v55 = vadd.s32 1, %v3272_v48  ;;  %v1076_v48 = vshrl.u32 %v6248_v28, %v1064_v26  ;;  %v1216_v32 = vsel %vm1215_vm11, %v1214_v52, 0  ;;  %v1672_v52 = vld [vmem:[%s6229_s3 + $0x18] sm:$0xff]  ;;  %vm1081_vm0 = vcmp.lt.s32.totalorder %v3735_v37, 1 }
  0xce   : > { %v1787_v33 = vmul.f32 %v3684_v44, %v1763_v62  ;;  %v3278_v42 = vadd.s32 4294967169, %v2117_v24  ;;  %v3751_v62 = vshrl.u32 %v6238_v40, %v1064_v26  ;;  %v3769_v23 = vor.u32 %v1067_v0, %v1066_v41  ;;  %3311 = vmatpush.msra.mxu2 %v1672_v52  ;;  %3312 = vmatpush.msra.mxu3 %v1672_v52 }
  0xcf   : > { %vm1814_vm10 = vcmp.gt.s32.totalorder %v1813_v55, 0  ;;  %vm750_vm14 = vcmp.gt.s32.totalorder %v749_v10, 0  ;;  %v441_v41 = vsel %vm440_vm12, %v439_v13, 0  ;;  %1710 = vmatpush.msra.mxu0 %v1672_v52  ;;  %3310 = vmatpush.msra.mxu1 %v1672_v52  ;;  %vm1083_vm2 = vcmp.lt.s32.totalorder %v3735_v37, 3 }
  0xd0   : > { %v3747_v60 = vadd.f32 %v3692_v46, %v1787_v33  ;;  %v2123_v2 = vadd.s32 1, %v3278_v42  ;;  %v3773_v24 = vsel %vm1814_vm10, %v1813_v55, 0  ;;  %v3795_v55 = vshll.u32 %v6248_v28, %v3727_v22 }
  0xd1   : > { %v374_v9 = vpop.permute.xlu1 %373  ;;  %vm1084_vm3 = vcmp.lt.s32.totalorder %v3735_v37, 4  ;;  %vm1082_vm4 = vcmp.lt.s32.totalorder %v3735_v37, 2  ;;  %v3873_v47 = vshrl.u32 %v3773_v24, 5 }
  0xd2   : > { %v402_v30 = vmul.f32 %v3630_v50, %v374_v9  ;;  %v898_v50 = vshrl.u32 %v897_v18, 23  ;;  %6321 = vst [vmem:[#allocation10_spill] sm:$0xff] %v3747_v60  ;;  %v2426_v16 = vand.u32 2139095040, %v3747_v60  ;;  %vm2124_vm13 = vcmp.gt.s32.totalorder %v2123_v2, 0 }
  0xd3   : > { %6332 = vst [vmem:[#allocation21_spill] sm:$0xff] %v3873_v47  ;;  %vm1838_vm6 = vcmp.lt.s32.totalorder %v3873_v47, 4 }
  0xd4   : > { %v410_v19 = vadd.f32 %v402_v30, %v361_v14  ;;  %v3249_v58 = vadd.s32 4294967169, %v898_v50  ;;  %v3261_v30 = vadd.s32 4294967169, %v1518_v59  ;;  %v2427_v42 = vshrl.u32 %v2426_v16, 23 }
  0xd5   : > { %v1778_v35 = vpop.permute.xlu2 %1777 }
  0xd6   : > { %v3730_v29 = vadd.f32 %v3646_v5, %v410_v19  ;;  %v1371_v5 = vsel %vm1370_vm9, %v1369_v43, 0  ;;  %v1790_v57 = vmul.f32 %v3684_v44, %v1778_v35  ;;  %v6246_v43 = vmov 2102212464  }
  0xd7   : > { %v1073_v8 = vshrl.u32 %v6246_v43, %v1064_v26  ;;  %v3762_v9 = vand.u32 31, %v1371_v5  ;;  %v1075_v11 = vshll.u32 %v6246_v43, %v3727_v22  ;;  %v904_v14 = vadd.s32 1, %v3249_v58  ;;  %v1671_v58 = vld [vmem:[%s6229_s3 + $0x10] sm:$0xff]  ;;  %v1670_v22 = vld [vmem:[%s6229_s3 + $0x8] sm:$0xff] }
  0xd8   : > { %6320 = vst [vmem:[#allocation9_spill] sm:$0xff] %v3730_v29  ;;  %v3759_v7 = vadd.f32 %v3692_v46, %v1790_v57  ;;  %v3767_v18 = vshrl.u32 %v1371_v5, 5  ;;  %v3771_v19 = vor.u32 %v1070_v1, %v1069_v49  ;;  %v6252_v35 = vmov 1326507024   ;;  %3314 = vmatpush.msra.mxu2 %v1671_v58  ;;  %3315 = vmatpush.msra.mxu3 %v1671_v58 }
  0xd9   : > { %v3775_v27 = vor.u32 %v1073_v8, %v1072_v51  ;;  %v3779_v50 = vsub.s32 32, %v3762_v9  ;;  %v3782_v38 = vshrl.u32 %v6252_v35, %v1064_v26  ;;  %vm905_vm15 = vcmp.gt.s32.totalorder %v904_v14, 0  ;;  %1711 = vmatpush.msra.mxu0 %v1671_v58  ;;  %3313 = vmatpush.msra.mxu1 %v1671_v58 }
  0xda   : > { %v1748_v56 = vpop.permute.xlu1 %1747  ;;  %6323 = vst [vmem:[#allocation12_spill] sm:$0xff] %v3759_v7  ;;  %v1524_v5 = vadd.s32 1, %v3261_v30  ;;  %v3784_v49 = vsel %vm2124_vm13, %v2123_v2, 0  ;;  %v3787_v51 = vand.u32 31, %v3773_v24  ;;  %v3797_v26 = vand.u32 31, %v1216_v32  ;;  %v1669_v30 = vld [vmem:[%s6229_s3] sm:$0xff]  ;;  %3317 = vmatpush.msra.mxu2 %v1670_v22  ;;  %3318 = vmatpush.msra.mxu3 %v1670_v22 }
  0xdb   : > { %v1784_v61 = vmul.f32 %v3684_v44, %v1748_v56  ;;  %v751_v56 = vsel %vm750_vm14, %v749_v10, 0  ;;  %v587_v57 = vand.u32 2139095040, %v3730_v29  ;;  %v3803_v59 = vor.u32 %v1076_v48, %v1075_v11  ;;  %1712 = vmatpush.msra.mxu0 %v1670_v22  ;;  %3316 = vmatpush.msra.mxu1 %v1670_v22 }
  0xdc   : > { %6324 = vst [vmem:[#allocation13_spill] sm:$0xff] %v3787_v51  ;;  %vm1525_vm1 = vcmp.gt.s32.totalorder %v1524_v5, 0  ;;  %v3815_v0 = vand.u32 31, %v3784_v49  ;;  %v3284_v1 = vadd.s32 4294967169, %v2427_v42  ;;  %v2581_v2 = vand.u32 2139095040, %v3712_v63  ;;  %3320 = vmatpush.msra.mxu2 %v1669_v30  ;;  %3321 = vmatpush.msra.mxu3 %v1669_v30 }
  0xdd   : > { %v3756_v4 = vadd.f32 %v3692_v46, %v1784_v61  ;;  %v906_v61 = vsel %vm905_vm15, %v904_v14, 0  ;;  %v3818_v8 = vshrl.u32 %v1216_v32, 5  ;;  %v3820_v10 = vand.u32 31, %v751_v56  ;;  %1713 = vmatpush.msra.mxu0 %v1669_v30  ;;  %3319 = vmatpush.msra.mxu1 %v1669_v30 }
  0xde   : > { %6325 = vst [vmem:[#allocation14_spill] sm:$0xff] %v3815_v0  ;;  %v3823_v11 = vsub.s32 32, %v3787_v51  ;;  %v3832_v16 = vsub.s32 32, %v3797_v26  ;;  %v3834_v48 = vshrl.u32 %v441_v41, 5  ;;  %v3836_v32 = vand.u32 31, %v906_v61 }
  0xdf   : > { %6322 = vst [vmem:[#allocation11_spill] sm:$0xff] %v3756_v4  ;;  %v3853_v52 = vsub.s32 32, %v3815_v0  ;;  %v2582_v58 = vshrl.u32 %v2581_v2, 23  ;;  %v3859_v3 = vshrl.u32 %v906_v61, 5  ;;  %v1832_v61 = vshll.u32 %v6248_v28, %v3787_v51 }
  0xe0   : > { %6326 = vst [vmem:[#allocation15_spill] sm:$0xff] %v3823_v11  ;;  %v3866_v22 = vsub.s32 32, %v3836_v32  ;;  %v1833_v40 = vshrl.u32 %v6252_v35, %v3823_v11  ;;  %v1086_v30 = vsel %vm1084_vm3, %v3775_v27, 2102212464  ;;  %v2139_v6 = vshll.u32 %v6246_v43, %v3815_v0 }
  0xe1   : > { %6327 = vst [vmem:[#allocation16_spill] sm:$0xff] %v3836_v32  ;;  %v3887_v24 = vshrl.u32 %v3784_v49, 5  ;;  %v2142_v36 = vshll.u32 %v6248_v28, %v3815_v0  ;;  %v2143_v13 = vshrl.u32 %v6252_v35, %v3853_v52  ;;  %v6335_v49 = vor.u32 %v3782_v38, %v3795_v55 }
  0xe2   : > { %v1758_v33 = vpop.permute.xlu1 %1757  ;;  %6328 = vst [vmem:[#allocation17_spill] sm:$0xff] %v3853_v52  ;;  %v1834_v0 = vor.u32 %v1833_v40, %v1832_v61  ;;  %v6337_v38 = vor.u32 8388608, %v3725_v20 }
  0xe3   : > { %v1786_v53 = vmul.f32 %v3684_v44, %v1758_v33  ;;  %v3805_v44 = vand.u32 31, %v441_v41  ;;  %v588_v33 = vshrl.u32 %v587_v57, 23  ;;  %v3848_v41 = vsel %vm1081_vm0, %v3751_v62, %v3769_v23  ;;  %6329 = vst [vmem:[#allocation18_spill] sm:$0xff] %v3859_v3 }
  0xe4   : > { %v2433_v57 = vadd.s32 1, %v3284_v1  ;;  %v1829_v62 = vshll.u32 %v6246_v43, %v3787_v51  ;;  %6333 = vst [vmem:[#allocation22_spill] sm:$0xff] %v3887_v24  ;;  %v1090_v43 = vsel %vm1084_vm3, %v3803_v59, 920167782  ;;  %v3919_v55 = vshll.u32 %v6337_v38, 8 }
  0xe5   : > { %v3826_v14 = vadd.f32 %v3692_v46, %v1786_v53  ;;  %v3839_v42 = vsub.s32 32, %v3805_v44  ;;  %v1526_v46 = vsel %vm1525_vm1, %v1524_v5, 0  ;;  %v3850_v53 = vshrl.u32 %v751_v56, 5 }
  0xe6   : > { %v3857_v5 = vsub.s32 32, %v3820_v10  ;;  %v1830_v56 = vshrl.u32 %v6248_v28, %v3823_v11  ;;  %v3868_v1 = vshrl.u32 %v1526_v46, 5  ;;  %v3870_v2 = vand.u32 31, %v1526_v46 }
  0xe7   : > { %v3243_v34 = vadd.s32 4294967169, %v588_v33  ;;  %v2140_v46 = vshrl.u32 %v6248_v28, %v3853_v52  ;;  %vm2434_vm5 = vcmp.gt.s32.totalorder %v2433_v57, 0  ;;  %v3287_v33 = vadd.s32 4294967169, %v2582_v58 }
  0xe8   : > { %6330 = vst [vmem:[#allocation19_spill] sm:$0xff] %v3868_v1  ;;  %v3893_v54 = vor.u32 %v1830_v56, %v1829_v62  ;;  %v1093_v58 = vsel %vm1081_vm0, %v3771_v19, %v3775_v27  ;;  %v1094_v28 = vsel %vm1084_vm3, %v6335_v49, 1326507024  ;;  %v2435_v62 = vsel %vm2434_vm5, %v2433_v57, 0 }
  0xe9   : > { %6331 = vst [vmem:[#allocation20_spill] sm:$0xff] %v3870_v2  ;;  %v594_v63 = vadd.s32 1, %v3243_v34  ;;  %v1089_v34 = vsel %vm1081_vm0, %v3769_v23, %v3771_v19  ;;  %v3912_v56 = vor.u32 %v2140_v46, %v2139_v6  ;;  %v2588_v35 = vadd.s32 1, %v3287_v33 }
  0xea   : > { %6334 = vst [vmem:[#allocation23_spill] sm:$0xff] %v3893_v54  ;;  %v1095_v52 = vsel %vm1083_vm2, %v3803_v59, %v1094_v28  ;;  %v2144_v40 = vor.u32 %v2143_v13, %v2142_v36  ;;  %vm6306_vm7 = vcmp.lt.s32.totalorder %v3887_v24, 4  ;;  %v1091_v57 = vsel %vm1083_vm2, %v3775_v27, %v1090_v43 }
  0xeb   : > { %6336 = vst [vmem:[#allocation24_spill] sm:$0xff] %v3912_v56  ;;  %v1096_v6 = vsel %vm1082_vm4, %v1093_v58, %v1095_v52  ;;  %v3928_v23 = vsub.s32 32, %v3870_v2  ;;  %vm595_vm8 = vcmp.gt.s32.totalorder %v594_v63, 0  ;;  %v3933_v20 = vsel %vm1838_vm6, %v3893_v54, 920167782 }
  0xec   : > { %6339 = vst [vmem:[#allocation26_spill] sm:$0xff] %v3933_v20  ;;  %v3935_v28 = vand.u32 31, %v2435_v62  ;;  %v3939_v36 = vsel %vm1838_vm6, %v1834_v0, 1326507024  ;;  %v1087_v43 = vsel %vm1083_vm2, %v3771_v19, %v1086_v30  ;;  %v1100_v27 = vand.u32 65535, %v1096_v6 }
  0xed   : > { %6338 = vst [vmem:[#allocation25_spill] sm:$0xff] %v3928_v23  ;;  %v1101_v59 = vshrl.u32 %v1096_v6, 16  ;;  %v3947_v13 = vsel %vm6306_vm7, %v3912_v56, 920167782  ;;  %vm2589_vm9 = vcmp.gt.s32.totalorder %v2588_v35, 0  ;;  %v1092_v52 = vsel %vm1082_vm4, %v1089_v34, %v1091_v57 }
  0xee   : > { %6340 = vst [vmem:[#allocation27_spill] sm:$0xff] %v3935_v28  ;;  %v1098_v61 = vand.u32 65535, %v3919_v55  ;;  %v596_v46 = vsel %vm595_vm8, %v594_v63, 0  ;;  %v3954_v0 = vsel %vm6306_vm7, %v2144_v40, 1326507024  ;;  %v1961_v19 = vand.u32 2139095040, %v3756_v4 }
  0xef   : > { %6341 = vst [vmem:[#allocation28_spill] sm:$0xff] %v3939_v36  ;;  %v1099_v30 = vshrl.u32 %v3919_v55, 16  ;;  %v3958_v33 = vshrl.u32 %v2435_v62, 5  ;;  %v3961_v58 = vsub.s32 32, %v3935_v28  ;;  %v3966_v49 = vsel %vm1082_vm4, %v3848_v41, %v1087_v43 }
  0xf0   : > { %6342 = vst [vmem:[#allocation29_spill] sm:$0xff] %v3947_v13  ;;  %v1103_v34 = vmul.u32 %v1101_v59, %v1098_v61  ;;  %v2590_v63 = vsel %vm2589_vm9, %v2588_v35, 0  ;;  %v2891_v38 = vand.u32 2139095040, %v3759_v7  ;;  %v1123_v57 = vshrl.u32 %v1092_v52, 16 }
  0xf1   : > { %6343 = vst [vmem:[#allocation30_spill] sm:$0xff] %v3954_v0  ;;  %v1104_v40 = vmul.u32 %v1100_v27, %v1099_v30  ;;  %v3969_v6 = vand.u32 31, %v596_v46  ;;  %v6347_v4 = vmov 2102212464   ;;  %v1102_v13 = vmul.u32 %v1100_v27, %v1098_v61 }
  0xf2   : > { %6344 = vst [vmem:[#allocation31_spill] sm:$0xff] %v3958_v33  ;;  %v2449_v62 = vshll.u32 %v6347_v4, %v3935_v28  ;;  %v1106_v56 = vshll.u32 %v1103_v34, 16  ;;  %v3973_v0 = vshrl.u32 %v596_v46, 5  ;;  %v6349_v24 = vmov 920167782  }
  0xf3   : > { %6345 = vst [vmem:[#allocation32_spill] sm:$0xff] %v3961_v58  ;;  %v2452_v37 = vshll.u32 %v6349_v24, %v3935_v28  ;;  %v1962_v41 = vshrl.u32 %v1961_v19, 23  ;;  %v1122_v43 = vand.u32 65535, %v1092_v52  ;;  %v2450_v35 = vshrl.u32 %v6349_v24, %v3961_v58 }
  0xf4   : > { %6346 = vst [vmem:[#allocation33_spill] sm:$0xff] %v3969_v6  ;;  %v6350_v7 = vmov 1326507024   ;;  %vm1110_vm10 = vc.u32 %v1102_v13, %v1106_v56  ;;  %v1112_v36 = vadd.s32 %v1106_v56, %v1102_v13  ;;  %v1105_v20 = vmul.u32 %v1101_v59, %v1099_v30 }
  0xf5   : > { %6348 = vst [vmem:[#allocation34_spill] sm:$0xff] %v3973_v0  ;;  %v2453_v54 = vshrl.u32 %v6350_v7, %v3961_v58  ;;  %v1108_v47 = vshll.u32 %v1104_v40, 16  ;;  %v6351_v11 = vmov 0   ;;  %v1125_v51 = vmul.u32 %v1123_v57, %v1098_v61 }
  0xf6   : > { %v1111_v27 = vsel %vm1110_vm10, 1, %v6351_v11  ;;  %v3983_v46 = vsub.s32 32, %v3969_v6  ;;  %vm2458_vm11 = vcmp.lt.s32.totalorder %v3958_v33, 4  ;;  %v3986_v19 = vshrl.u32 %v2590_v63, 5 }
  0xf7   : > { %v3988_v52 = vand.u32 31, %v2590_v63  ;;  %v3275_v17 = vadd.s32 4294967169, %v1962_v41  ;;  %v1113_v28 = vadd.s32 %v1111_v27, %v1105_v20  ;;  %vm1114_vm12 = vc.u32 %v1112_v36, %v1108_v47 }
  0xf8   : > { %6352 = vst [vmem:[#allocation35_spill] sm:$0xff] %v3983_v46  ;;  %v1126_v58 = vmul.u32 %v1122_v43, %v1099_v30  ;;  %v2892_v60 = vshrl.u32 %v2891_v38, 23  ;;  %v1115_v56 = vsel %vm1114_vm12, 1, %v6351_v11  ;;  %v1124_v59 = vmul.u32 %v1122_v43, %v1098_v61 }
  0xf9   : > { %6353 = vst [vmem:[#allocation36_spill] sm:$0xff] %v3986_v19  ;;  %v1128_v13 = vshll.u32 %v1125_v51, 16  ;;  %v3991_v0 = vor.u32 %v2450_v35, %v2449_v62  ;;  %v2454_v29 = vor.u32 %v2453_v54, %v2452_v37  ;;  %v1107_v6 = vshrl.u32 %v1103_v34, 16 }
  0xfa   : > { %6354 = vst [vmem:[#allocation37_spill] sm:$0xff] %v3988_v52  ;;  %v1117_v46 = vadd.s32 %v1115_v56, %v1113_v28  ;;  %v1127_v1 = vmul.u32 %v1123_v57, %v1099_v30  ;;  %v1130_v2 = vshll.u32 %v1126_v58, 16  ;;  %v3994_v63 = vsub.s32 32, %v3988_v52 }
  0xfb   : > { %6355 = vst [vmem:[#allocation38_spill] sm:$0xff] %v3991_v0  ;;  %vm1132_vm13 = vc.u32 %v1124_v59, %v1128_v13  ;;  %v1134_v23 = vadd.s32 %v1128_v13, %v1124_v59  ;;  %v3998_v47 = vshll.u32 %v6347_v4, %v3988_v52  ;;  %v4001_v61 = vadd.s32 1, %v3275_v17 }
  0xfc   : > { %6356 = vst [vmem:[#allocation39_spill] sm:$0xff] %v3994_v63  ;;  %v1118_v20 = vadd.s32 %v1117_v46, %v1107_v6  ;;  %v1133_v36 = vsel %vm1132_vm13, 1, %v6351_v11  ;;  %v6288_v54 = vand.u32 2147483647, %v3675_v39  ;;  %v4006_v28 = vshll.u32 %v6349_v24, %v3988_v52 }
  0xfd   : > { %v1135_v38 = vadd.s32 %v1133_v36, %v1127_v1  ;;  %vm1136_vm14 = vc.u32 %v1134_v23, %v1130_v2  ;;  %v3293_v30 = vadd.s32 4294967169, %v2892_v60  ;;  %v1109_v34 = vshrl.u32 %v1104_v40, 16 }
  0xfe   : > { %v1137_v57 = vsel %vm1136_vm14, 1, %v6351_v11  ;;  %v4012_v6 = vsel %vm2458_vm11, %v3991_v0, 920167782  ;;  %v4016_v17 = vsel %vm2458_vm11, %v2454_v29, 1326507024  ;;  %v1129_v1 = vshrl.u32 %v1125_v51, 16 }
  0xff   : > { %6357 = vst [vmem:[#allocation40_spill] sm:$0xff] %v4012_v6  ;;  %v1139_v62 = vadd.s32 %v1137_v57, %v1135_v38  ;;  %v4018_v37 = vadd.s32 %v1118_v20, %v1109_v34  ;;  %v1131_v41 = vshrl.u32 %v1126_v58, 16  ;;  %v6359_v43 = vmov 683565275  }
 0x100   : > { %6358 = vst [vmem:[#allocation41_spill] sm:$0xff] %v4016_v17  ;;  %v1376_v60 = vshll.u32 %v6359_v43, %v3762_v9  ;;  %v6360_v40 = vmov 2475754826   ;;  %v1366_v46 = vand.u32 8388607, %v6288_v54  ;;  %v4030_v59 = vadd.s32 %v1134_v23, %v1130_v2 }
 0x101   : > { %v1377_v35 = vshrl.u32 %v6360_v40, %v3779_v50  ;;  %v1140_v27 = vadd.s32 %v1139_v62, %v1129_v1  ;;  %v1379_v56 = vshll.u32 %v6360_v40, %v3762_v9  ;;  %v6361_v29 = vmov 2131351028  }
 0x102   : > { %v1380_v51 = vshrl.u32 %v6361_v29, %v3779_v50  ;;  %v1382_v58 = vshll.u32 %v6361_v29, %v3762_v9  ;;  %v1383_v20 = vshrl.u32 %v6347_v4, %v3779_v50  ;;  %v1385_v34 = vshll.u32 %v6347_v4, %v3762_v9 }
 0x103   : > { %v1378_v13 = vor.u32 %v1377_v35, %v1376_v60  ;;  %v1141_v36 = vadd.s32 %v1140_v27, %v1131_v41  ;;  %v1386_v57 = vshrl.u32 %v6349_v24, %v3779_v50  ;;  %vm1144_vm15 = vc.u32 %v4018_v37, %v4030_v59 }
 0x104   : > { %v1381_v38 = vor.u32 %v1380_v51, %v1379_v56  ;;  %v1384_v2 = vor.u32 %v1383_v20, %v1382_v58  ;;  %v1388_v23 = vshll.u32 %v6349_v24, %v3762_v9  ;;  %v1389_v1 = vshrl.u32 %v6350_v7, %v3779_v50 }
 0x105   : > { %v1145_v62 = vadd.s32 1, %v1141_v36  ;;  %v1367_v60 = vor.u32 8388608, %v1366_v46  ;;  %v1387_v41 = vor.u32 %v1386_v57, %v1385_v34  ;;  %vm1391_vm0 = vcmp.lt.s32.totalorder %v3767_v18, 1 }
 0x106   : > { %v1142_v35 = vmul.u32 %v3919_v55, %v3966_v49  ;;  %v1390_v27 = vor.u32 %v1389_v1, %v1388_v23  ;;  %vm1394_vm1 = vcmp.lt.s32.totalorder %v3767_v18, 4  ;;  %v1399_v56 = vsel %vm1391_vm0, %v1378_v13, %v1381_v38 }
 0x107   : > { %v1146_v51 = vsel %vm1144_vm15, %v1145_v62, %v1141_v36  ;;  %vm1393_vm2 = vcmp.lt.s32.totalorder %v3767_v18, 3  ;;  %v1400_v9 = vsel %vm1394_vm1, %v1387_v41, 920167782  ;;  %v1403_v46 = vsel %vm1391_vm0, %v1381_v38, %v1384_v2 }
 0x108   : > { %v1147_v58 = vadd.s32 %v1146_v51, %v1142_v35  ;;  %vm1392_vm3 = vcmp.lt.s32.totalorder %v3767_v18, 2  ;;  %v1401_v55 = vsel %vm1393_vm2, %v1384_v2, %v1400_v9  ;;  %v1404_v49 = vsel %vm1394_vm1, %v1390_v27, 1326507024 }
 0x109   : > { %v2605_v20 = vshrl.u32 %v6349_v24, %v3994_v63  ;;  %v1402_v36 = vsel %vm1392_vm3, %v1399_v56, %v1401_v55  ;;  %v1405_v34 = vsel %vm1393_vm2, %v1387_v41, %v1404_v49  ;;  %v4068_v57 = vshll.u32 %v1367_v60, 8 }
 0x10a   : > { %vm1969_vm4 = vcmp.gt.s32.totalorder %v4001_v61, 0  ;;  %v1148_v23 = vadd.s32 536870912, %v1147_v58  ;;  %v1406_v1 = vsel %vm1392_vm3, %v1403_v46, %v1405_v34  ;;  %v1433_v62 = vshrl.u32 %v1402_v36, 16 }
 0x10b   : > { %v1408_v35 = vand.u32 65535, %v4068_v57  ;;  %v1409_v27 = vshrl.u32 %v4068_v57, 16  ;;  %v1410_v51 = vand.u32 65535, %v1406_v1  ;;  %v1411_v9 = vshrl.u32 %v1406_v1, 16 }
 0x10c   : > { %v4077_v56 = vshrl.u32 %v6350_v7, %v3994_v63  ;;  %v4079_v41 = vshrl.u32 %v1148_v23, 30  ;;  %v1396_v60 = vsel %vm1394_vm1, %v1384_v2, 2102212464  ;;  %v1432_v55 = vand.u32 65535, %v1402_v36 }
 0x10d   : > { %v4083_v49 = vadd.s32 1, %v3293_v30  ;;  %v1375_v46 = vshrl.u32 %v6359_v43, %v3779_v50  ;;  %v1413_v34 = vmul.u32 %v1411_v9, %v1408_v35  ;;  %v1414_v54 = vmul.u32 %v1410_v51, %v1409_v27 }
 0x10e   : > { %v1970_v1 = vsel %vm1969_vm4, %v4001_v61, 0  ;;  %v4091_v63 = vor.u32 %v2605_v20, %v3998_v47  ;;  %v1150_v23 = vshll.u32 %v4079_v41, 30  ;;  %v1435_v52 = vmul.u32 %v1433_v62, %v1408_v35 }
 0x10f   : > { %v1395_v2 = vsel %vm1391_vm0, %v1375_v46, %v1378_v13  ;;  %v1397_v30 = vsel %vm1393_vm2, %v1381_v38, %v1396_v60  ;;  %v1412_v36 = vmul.u32 %v1410_v51, %v1408_v35  ;;  %v1416_v50 = vshll.u32 %v1413_v34, 16 }
 0x110   : > { %6362 = vst [vmem:[#allocation42_spill] sm:$0xff] %v4091_v63  ;;  %v4100_v0 = vsub.s32 %v1147_v58, %v1150_v23  ;;  %v1415_v61 = vmul.u32 %v1411_v9, %v1409_v27  ;;  %v1436_v17 = vmul.u32 %v1432_v55, %v1409_v27  ;;  %v1418_v47 = vshll.u32 %v1414_v54, 16 }
 0x111   : > { %vm1420_vm5 = vc.u32 %v1412_v36, %v1416_v50  ;;  %v1422_v20 = vadd.s32 %v1416_v50, %v1412_v36  ;;  %v1438_v33 = vshll.u32 %v1435_v52, 16  ;;  %v4106_v38 = vsel %vm1392_vm3, %v1395_v2, %v1397_v30 }
 0x112   : > { %vm1152_vm8 = vcmp.lt.s32.totalorder %v4100_v0, 0  ;;  %v1153_v13 = vsub.s32 0, %v4100_v0  ;;  %v1421_v51 = vsel %vm1420_vm5, 1, %v6351_v11  ;;  %v1417_v60 = vshrl.u32 %v1413_v34, 16 }
 0x113   : > { %v1423_v46 = vadd.s32 %v1421_v51, %v1415_v61  ;;  %vm1424_vm9 = vc.u32 %v1422_v20, %v1418_v47  ;;  %v1434_v58 = vmul.u32 %v1432_v55, %v1408_v35  ;;  %v1437_v36 = vmul.u32 %v1433_v62, %v1409_v27 }
 0x114   : > { %v1154_v9 = vsel %vm1152_vm8, %v1153_v13, %v4100_v0  ;;  %v1425_v23 = vsel %vm1424_vm9, 1, %v6351_v11  ;;  %v1440_v50 = vshll.u32 %v1436_v17, 16  ;;  %v4111_v32 = vshrl.u32 %v1970_v1, 5 }
 0x115   : > { %v1155_v6 = vclz %v1154_v9  ;;  %v1427_v45 = vadd.s32 %v1425_v23, %v1423_v46  ;;  %vm1442_vm10 = vc.u32 %v1434_v58, %v1438_v33  ;;  %v1444_v3 = vadd.s32 %v1438_v33, %v1434_v58 }
 0x116   : > { %6363 = vst [vmem:[#allocation43_spill] sm:$0xff] %v4111_v32  ;;  %vm1051_vm12 = vcmp.lt.s32.totalorder %v3663_v25, 0  ;;  %v1419_v18 = vshrl.u32 %v1414_v54, 16  ;;  %v1443_v34 = vsel %vm1442_vm10, 1, %v6351_v11  ;;  %v6301_v2 = vand.u32 2147483647, %v3655_v15 }
 0x117   : > { %v3253_v35 = vadd.s32 4294967294, %v1155_v6  ;;  %v1428_v55 = vadd.s32 %v1427_v45, %v1417_v60  ;;  %v1445_v30 = vadd.s32 %v1443_v34, %v1437_v36  ;;  %vm1446_vm13 = vc.u32 %v1444_v3, %v1440_v50 }
 0x118   : > { %v4116_v61 = vand.u32 31, %v1970_v1  ;;  %v1143_v62 = vadd.s32 %v4030_v59, %v4018_v37  ;;  %v1447_v33 = vsel %vm1446_vm13, 1, %v6351_v11  ;;  %v1452_v27 = vmul.u32 %v4068_v57, %v4106_v38 }
 0x119   : > { %vm6307_vm14 = vcmp.lt.s32.totalorder %v3986_v19, 4  ;;  %v6365_v54 = vand.u32 2147483647, %v3663_v25  ;;  %vm3254_vm0 = vcmp.lt.s32.totalorder %v3253_v35, 0  ;;  %v4130_v45 = vadd.s32 %v1428_v55, %v1419_v18 }
 0x11a   : > { %6364 = vst [vmem:[#allocation44_spill] sm:$0xff] %v4116_v61  ;;  %v1439_v6 = vshrl.u32 %v1435_v52, 16  ;;  %v1449_v1 = vadd.s32 %v1447_v33, %v1445_v30  ;;  %v1158_v20 = vsel %vm3254_vm0, 0, %v3253_v35  ;;  %v1173_v37 = vsub.s32 4, %v4079_v41 }
 0x11b   : > { %vm4126_vm15 = vcmp.le.f32.partialorder %v6365_v54, 0.7853982  ;;  %v1441_v59 = vshrl.u32 %v1436_v17, 16  ;;  %v4133_v13 = vadd.s32 %v1444_v3, %v1440_v50  ;;  %v1159_v57 = vsub.s32 32, %v1158_v20 }
 0x11c   : > { %v1163_v38 = vsub.s32 4294967266, %v1158_v20  ;;  %v1450_v51 = vadd.s32 %v1449_v1, %v1439_v6  ;;  %v436_v60 = vand.u32 8388607, %v6301_v2  ;;  %v1160_v46 = vshll.u32 %v4100_v0, %v1158_v20 }
 0x11d   : > { %vm1454_vm1 = vc.u32 %v4130_v45, %v4133_v13  ;;  %v447_v52 = vshrl.u32 %v6360_v40, %v3839_v42  ;;  %v449_v58 = vshll.u32 %v6360_v40, %v3805_v44  ;;  %vm2899_vm2 = vcmp.gt.s32.totalorder %v4083_v49, 0 }
 0x11e   : > { %v1161_v3 = vshrl.u32 %v1143_v62, %v1159_v57  ;;  %v1164_v17 = vadd.s32 127, %v1163_v38  ;;  %v1451_v9 = vadd.s32 %v1450_v51, %v1441_v59  ;;  %v450_v23 = vshrl.u32 %v6361_v29, %v3839_v42 }
 0x11f   : > { %v452_v0 = vshll.u32 %v6361_v29, %v3805_v44  ;;  %v453_v36 = vshrl.u32 %v6347_v4, %v3839_v42  ;;  %v455_v50 = vshll.u32 %v6347_v4, %v3805_v44  ;;  %v456_v18 = vshrl.u32 %v6349_v24, %v3839_v42 }
 0x120   : > { %v1162_v34 = vor.u32 %v1161_v3, %v1160_v46  ;;  %v1165_v35 = vshll.u32 %v1164_v17, 23  ;;  %v1174_v55 = vsel %vm1051_vm12, %v1173_v37, %v4079_v41  ;;  %v1455_v30 = vadd.s32 1, %v1451_v9 }
 0x121   : > { %v446_v62 = vshll.u32 %v6359_v43, %v3805_v44  ;;  %v4160_v33 = vor.u32 %v450_v23, %v449_v58  ;;  %v454_v54 = vor.u32 %v453_v36, %v452_v0  ;;  %v457_v6 = vor.u32 %v456_v18, %v455_v50 }
 0x122   : > { %v1166_v1 = vor.u32 4788187, %v1165_v35  ;;  %v1456_v20 = vsel %vm1454_vm1, %v1455_v30, %v1451_v9  ;;  %v458_v59 = vshll.u32 %v6349_v24, %v3805_v44  ;;  %v459_v57 = vshrl.u32 %v6350_v7, %v3839_v42 }
 0x123   : > { %v1176_v41 = vsel %vm4126_vm15, 0, %v1174_v55  ;;  %v1457_v37 = vadd.s32 %v1456_v20, %v1452_v27  ;;  %v437_v38 = vor.u32 8388608, %v436_v60  ;;  %v448_v51 = vor.u32 %v447_v52, %v446_v62 }
 0x124   : > { %v1167_v46 = vand.u32 2147483647, %v1166_v1  ;;  %v1169_v58 = vcvt.s32.f32 %v1162_v34  ;;  %v460_v3 = vor.u32 %v459_v57, %v458_v59  ;;  %vm464_vm3 = vcmp.lt.s32.totalorder %v3834_v48, 4 }
 0x125   : > { %v4175_v17 = vsel %vm6307_vm14, %v4091_v63, 920167782  ;;  %v1458_v44 = vadd.s32 536870912, %v1457_v37  ;;  %vm461_vm4 = vcmp.lt.s32.totalorder %v3834_v48, 1  ;;  %v470_v9 = vsel %vm464_vm3, %v457_v6, 920167782 }
 0x126   : > { %6368 = vst [vmem:[#allocation45_spill] sm:$0xff] %v4175_v17  ;;  %v1170_v23 = vmul.f32 %v1169_v58, %v1167_v46  ;;  %v1193_v27 = vadd.s32 3, %v1176_v41  ;;  %vm463_vm5 = vcmp.lt.s32.totalorder %v3834_v48, 3  ;;  %v473_v60 = vsel %vm461_vm4, %v4160_v33, %v454_v54 }
 0x127   : > { %v1459_v52 = vshrl.u32 %v1458_v44, 30  ;;  %v469_v0 = vsel %vm461_vm4, %v448_v51, %v4160_v33  ;;  %v471_v36 = vsel %vm463_vm5, %v454_v54, %v470_v9  ;;  %v474_v50 = vsel %vm464_vm3, %v460_v3, 1326507024 }
 0x128   : > { %v1171_v18 = vxor.u32 2147483648, %v1170_v23  ;;  %vm462_vm8 = vcmp.lt.s32.totalorder %v3834_v48, 2  ;;  %v475_v34 = vsel %vm463_vm5, %v457_v6, %v474_v50  ;;  %v4194_v35 = vshll.u32 %v437_v38, 8 }
 0x129   : > { %v6369_v55 = vor.u32 %v4077_v56, %v4006_v28  ;;  %v4206_v62 = vsel %vm2899_vm2, %v4083_v49, 0  ;;  %v1460_v1 = vshll.u32 %v1459_v52, 30  ;;  %v476_v20 = vsel %vm462_vm8, %v473_v60, %v475_v34 }
 0x12a   : > { %v1172_v6 = vsel %vm1051_vm12, %v1171_v18, %v1170_v23  ;;  %v4212_v59 = vand.u32 3, %v1193_v27  ;;  %vm1361_vm9 = vcmp.lt.s32.totalorder %v3675_v39, 0  ;;  %v4217_v28 = vsel %vm462_vm8, %v469_v0, %v471_v36 }
 0x12b   : > { %v4201_v30 = vsel %vm6307_vm14, %v6369_v55, 1326507024  ;;  %v478_v56 = vand.u32 65535, %v4194_v35  ;;  %v4223_v49 = vsel %vm4126_vm15, %v3663_v25, %v1172_v6  ;;  %v4225_v57 = vsub.s32 %v1457_v37, %v1460_v1 }
 0x12c   : > { %6370 = vst [vmem:[#allocation46_spill] sm:$0xff] %v4201_v30  ;;  %v480_v41 = vand.u32 65535, %v476_v20  ;;  %v481_v38 = vshrl.u32 %v476_v20, 16  ;;  %v1177_v46 = vmul.f32 %v4223_v49, %v4223_v49  ;;  %v1453_v58 = vadd.s32 %v4133_v13, %v4130_v45 }
 0x12d   : > { %v445_v3 = vshrl.u32 %v6359_v43, %v3839_v42  ;;  %v466_v44 = vsel %vm464_vm3, %v454_v54, 2102212464  ;;  %vm1462_vm10 = vcmp.lt.s32.totalorder %v4225_v57, 0  ;;  %v1463_v47 = vsub.s32 0, %v4225_v57 }
 0x12e   : > { %v479_v37 = vshrl.u32 %v4194_v35, 16  ;;  %v483_v9 = vmul.u32 %v481_v38, %v478_v56  ;;  %v1178_v23 = vmul.f32 -0.001358992, %v1177_v46  ;;  %v1185_v27 = vmul.f32 -0.00019511016, %v1177_v46 }
 0x12f   : > { %v1483_v60 = vsub.s32 4, %v1459_v52  ;;  %v503_v0 = vshrl.u32 %v4217_v28, 16  ;;  %v1464_v45 = vsel %vm1462_vm10, %v1463_v47, %v4225_v57  ;;  %v482_v13 = vmul.u32 %v480_v41, %v478_v56 }
 0x130   : > { %v4240_v36 = vmul.u32 %v480_v41, %v479_v37  ;;  %v486_v42 = vshll.u32 %v483_v9, 16  ;;  %v1179_v50 = vadd.f32 0.041655596, %v1178_v23  ;;  %v1186_v54 = vadd.f32 0.008332121, %v1185_v27 }
 0x131   : > { %v1465_v18 = vclz %v1464_v45  ;;  %v465_v34 = vsel %vm461_vm4, %v445_v3, %v448_v51  ;;  %v467_v55 = vsel %vm463_vm5, %v4160_v33, %v466_v44  ;;  %v485_v1 = vmul.u32 %v481_v38, %v479_v37 }
 0x132   : > { %vm490_vm12 = vc.u32 %v482_v13, %v486_v42  ;;  %v502_v20 = vand.u32 65535, %v4217_v28  ;;  %v1180_v6 = vmul.f32 %v1179_v50, %v1177_v46  ;;  %v1187_v47 = vmul.f32 %v1186_v54, %v1177_v46 }
 0x133   : > { %v3259_v2 = vadd.s32 4294967294, %v1465_v18  ;;  %v491_v41 = vsel %vm490_vm12, 1, %v6351_v11  ;;  %v6371_v23 = vand.u32 2147483647, %v3675_v39  ;;  %v4257_v51 = vsel %vm1361_vm9, %v1483_v60, %v1459_v52 }
 0x134   : > { %v488_v33 = vshll.u32 %v4240_v36, 16  ;;  %v492_v38 = vadd.s32 %v486_v42, %v482_v13  ;;  %v505_v3 = vmul.u32 %v503_v0, %v478_v56  ;;  %v1181_v28 = vadd.f32 -0.4999988, %v1180_v6 }
 0x135   : > { %vm4251_vm13 = vcmp.le.f32.partialorder %v6371_v23, 0.7853982  ;;  %v1188_v44 = vadd.f32 -0.16666654, %v1187_v47  ;;  %vm3260_vm15 = vcmp.lt.s32.totalorder %v3259_v2, 0  ;;  %v493_v45 = vadd.s32 %v491_v41, %v485_v1 }
 0x136   : > { %vm1196_vm0 = vcmp.eq.s32.totalorder %v4212_v59, 0  ;;  %vm1199_vm1 = vcmp.eq.s32.totalorder %v4212_v59, 2  ;;  %v1468_v50 = vsel %vm3260_vm15, 0, %v3259_v2  ;;  %vm494_vm2 = vc.u32 %v492_v38, %v488_v33 }
 0x137   : > { %v506_v54 = vmul.u32 %v502_v20, %v479_v37  ;;  %v508_v18 = vshll.u32 %v505_v3, 16  ;;  %v1182_v23 = vmul.f32 %v1181_v28, %v1177_v46  ;;  %v1189_v32 = vmul.f32 %v1188_v44, %v1177_v46 }
 0x138   : > { %vm1195_vm3 = vcmp.lt.s32.totalorder %v4212_v59, 2  ;;  %v1469_v52 = vsub.s32 32, %v1468_v50  ;;  %v487_v60 = vshrl.u32 %v483_v9, 16  ;;  %vm1192_vm4 = vweird.f32 %v3663_v25 }
 0x139   : > { %v1470_v13 = vshll.u32 %v4225_v57, %v1468_v50  ;;  %v1473_v42 = vsub.s32 4294967266, %v1468_v50  ;;  %v495_v1 = vsel %vm494_vm2, 1, %v6351_v11  ;;  %v504_v6 = vmul.u32 %v502_v20, %v478_v56 }
 0x13a   : > { %v1183_v47 = vadd.f32 1.0, %v1182_v23  ;;  %v1190_v41 = vadd.f32 1.0, %v1189_v32  ;;  %v1471_v2 = vshrl.u32 %v1453_v58, %v1469_v52  ;;  %v497_v33 = vadd.s32 %v495_v1, %v493_v45 }
 0x13b   : > { %v1474_v38 = vadd.s32 127, %v1473_v42  ;;  %v510_v17 = vshll.u32 %v506_v54, 16  ;;  %vm512_vm5 = vc.u32 %v504_v6, %v508_v18  ;;  %v514_v46 = vadd.s32 %v508_v18, %v504_v6 }
 0x13c   : > { %v1191_v28 = vmul.f32 %v1190_v41, %v4223_v49  ;;  %v1200_v44 = vxor.u32 2147483648, %v1183_v47  ;;  %v1472_v9 = vor.u32 %v1471_v2, %v1470_v13  ;;  %v507_v63 = vmul.u32 %v503_v0, %v479_v37 }
 0x13d   : > { %v1475_v30 = vshll.u32 %v1474_v38, 23  ;;  %v498_v19 = vadd.s32 %v497_v33, %v487_v60  ;;  %v513_v57 = vsel %vm512_vm5, 1, %v6351_v11  ;;  %vm516_vm10 = vc.u32 %v514_v46, %v510_v17 }
 0x13e   : > { %v1197_v50 = vxor.u32 2147483648, %v1191_v28  ;;  %vm1673_vm12 = vcmask 261120   ;;  %v1486_v32 = vsel %vm4251_vm13, 0, %v4257_v51  ;;  %v468_v56 = vsel %vm462_vm8, %v465_v34, %v467_v55 }
 0x13f   : > { %v1476_v58 = vor.u32 4788187, %v1475_v30  ;;  %v489_v49 = vshrl.u32 %v4240_v36, 16  ;;  %v515_v20 = vadd.s32 %v513_v57, %v507_v63  ;;  %v517_v37 = vsel %vm516_vm10, 1, %v6351_v11 }
 0x140   : > { %v1198_v0 = vsel %vm1196_vm0, %v1183_v47, %v1197_v50  ;;  %v1201_v45 = vsel %vm1199_vm1, %v1200_v44, %v1191_v28  ;;  %v1479_v18 = vcvt.s32.f32 %v1472_v9  ;;  %v509_v23 = vshrl.u32 %v505_v3, 16 }
 0x141   : > { %v1202_v51 = vsel %vm1195_vm3, %v1198_v0, %v1201_v45  ;;  %v1477_v52 = vand.u32 2147483647, %v1476_v58  ;;  %v4281_v48 = vadd.s32 %v498_v19, %v489_v49  ;;  %v519_v30 = vadd.s32 %v517_v37, %v515_v20 }
 0x142   : > { %v4284_v36 = vsub.s32 32, %v4116_v61  ;;  %v2271_v63 = vand.u32 2139095040, %v3826_v14  ;;  %v1203_v34 = vsel %vm1192_vm4, nan, %v1202_v51  ;;  %v1204_v55 = vand.u32 2147483647, %v3652_v12 }
 0x143   : > { %3268 = vmatmul.msk.f32.vlgmr.msra.gmra.mxu2 %vm1673_vm12, %v1203_v34  ;;  %v1480_v3 = vmul.f32 %v1479_v18, %v1477_v52  ;;  %v511_v60 = vshrl.u32 %v506_v54, 16  ;;  %v4291_v59 = vadd.s32 %v514_v46, %v510_v17  ;;  %v520_v13 = vadd.s32 %v519_v30, %v509_v23 }
 0x144   : > { %v4295_v19 = vshll.u32 %v6347_v4, %v4116_v61  ;;  %v1503_v42 = vadd.s32 3, %v1486_v32  ;;  %v522_v1 = vmul.u32 %v4194_v35, %v468_v56  ;;  %v1225_v25 = vshrl.u32 %v6361_v29, %v3832_v16 }
 0x145   : > { %v1481_v6 = vxor.u32 2147483648, %v1480_v3  ;;  %v521_v47 = vadd.s32 %v520_v13, %v511_v60  ;;  %vm524_vm8 = vc.u32 %v4281_v48, %v4291_v59  ;;  %v1228_v17 = vshrl.u32 %v6347_v4, %v3832_v16  ;;  %v1773_v13 = vpop.permute.xlu1 %1772 }
 0x146   : > { %6374 = vst [vmem:[#allocation47_spill] sm:$0xff] %v4295_v19  ;;  %v1211_v54 = vand.u32 8388607, %v1204_v55  ;;  %v1222_v41 = vshrl.u32 %v6360_v40, %v3832_v16  ;;  %v1224_v35 = vshll.u32 %v6360_v40, %v3797_v26  ;;  %v1231_v2 = vshrl.u32 %v6349_v24, %v3832_v16 }
 0x147   : > { %v1482_v33 = vsel %vm1361_vm9, %v1481_v6, %v1480_v3  ;;  %v525_v38 = vadd.s32 1, %v521_v47  ;;  %v1227_v46 = vshll.u32 %v6361_v29, %v3797_v26  ;;  %v1230_v28 = vshll.u32 %v6347_v4, %v3797_v26 }
 0x148   : > { %v4321_v44 = vsel %vm4251_vm13, %v3675_v39, %v1482_v33  ;;  %v4323_v9 = vor.u32 %v1225_v25, %v1224_v35  ;;  %v1233_v57 = vshll.u32 %v6349_v24, %v3797_v26  ;;  %v1234_v50 = vshrl.u32 %v6350_v7, %v3832_v16 }
 0x149   : > { %v1487_v32 = vmul.f32 %v4321_v44, %v4321_v44  ;;  %v526_v56 = vsel %vm524_vm8, %v525_v38, %v521_v47  ;;  %v1229_v58 = vor.u32 %v1228_v17, %v1227_v46  ;;  %v1232_v49 = vor.u32 %v1231_v2, %v1230_v28  ;;  %v3417_v38 = vld [vmem:[%s6230_s4] ss:$0 sm:$0xff] }
 0x14a   : > { %v527_v20 = vadd.s32 %v526_v56, %v522_v1  ;;  %v1212_v37 = vor.u32 8388608, %v1211_v54  ;;  %v1221_v27 = vshll.u32 %v6359_v43, %v3797_v26  ;;  %v1235_v0 = vor.u32 %v1234_v50, %v1233_v57 }
 0x14b   : > { %v4335_v45 = vshll.u32 %v6349_v24, %v4116_v61  ;;  %v1488_v18 = vmul.f32 -0.001358992, %v1487_v32  ;;  %v1495_v23 = vmul.f32 -0.00019511016, %v1487_v32  ;;  %v4337_v51 = vand.u32 3, %v1503_v42 }
 0x14c   : > { %v528_v52 = vadd.s32 536870912, %v527_v20  ;;  %v1223_v30 = vor.u32 %v1222_v41, %v1221_v27  ;;  %vm1236_vm9 = vcmp.lt.s32.totalorder %v3818_v8, 1  ;;  %vm1239_vm13 = vcmp.lt.s32.totalorder %v3818_v8, 4 }
 0x14d   : > { %6375 = vst [vmem:[#allocation48_spill] sm:$0xff] %v4335_v45  ;;  %v1489_v34 = vadd.f32 0.041655596, %v1488_v18  ;;  %v1496_v3 = vadd.f32 0.008332121, %v1495_v23  ;;  %v1248_v60 = vsel %vm1236_vm9, %v4323_v9, %v1229_v58  ;;  %vm1238_vm15 = vcmp.lt.s32.totalorder %v3818_v8, 3 }
 0x14e   : > { %v1245_v26 = vsel %vm1239_vm13, %v1232_v49, 920167782  ;;  %v4346_v1 = vshrl.u32 %v528_v52, 30  ;;  %v1249_v42 = vsel %vm1239_vm13, %v1235_v0, 1326507024  ;;  %v4351_v25 = vshll.u32 %v1212_v37, 8 }
 0x14f   : > { %v1490_v6 = vmul.f32 %v1489_v34, %v1487_v32  ;;  %v1497_v47 = vmul.f32 %v1496_v3, %v1487_v32  ;;  %vm1237_vm0 = vcmp.lt.s32.totalorder %v3818_v8, 2  ;;  %v1250_v17 = vsel %vm1238_vm15, %v1232_v49, %v1249_v42 }
 0x150   : > { %v530_v54 = vshll.u32 %v4346_v1, 30  ;;  %v1244_v41 = vsel %vm1236_vm9, %v1223_v30, %v4323_v9  ;;  %v1246_v35 = vsel %vm1238_vm15, %v1229_v58, %v1245_v26  ;;  %v1251_v2 = vsel %vm1237_vm0, %v1248_v60, %v1250_v17 }
 0x151   : > { %v4365_v33 = vshrl.u32 %v4206_v62, 5  ;;  %v4370_v46 = vmul.f32 %v3417_v38, %v1773_v13  ;;  %v1491_v28 = vadd.f32 -0.4999988, %v1490_v6  ;;  %v1498_v57 = vadd.f32 -0.16666654, %v1497_v47 }
 0x152   : > { %vm1506_vm1 = vcmp.eq.s32.totalorder %v4337_v51, 0  ;;  %vm1509_vm2 = vcmp.eq.s32.totalorder %v4337_v51, 2  ;;  %v4374_v50 = vsub.s32 %v527_v20, %v530_v54  ;;  %v1253_v56 = vand.u32 65535, %v4351_v25 }
 0x153   : > { %v1255_v49 = vand.u32 65535, %v1251_v2  ;;  %v1256_v37 = vshrl.u32 %v1251_v2, 16  ;;  %v1492_v27 = vmul.f32 %v1491_v28, %v1487_v32  ;;  %v1499_v0 = vmul.f32 %v1498_v57, %v1487_v32 }
 0x154   : > { %vm1505_vm3 = vcmp.lt.s32.totalorder %v4337_v51, 2  ;;  %v523_v18 = vadd.s32 %v4291_v59, %v4281_v48  ;;  %v1247_v23 = vsel %vm1237_vm0, %v1244_v41, %v1246_v35  ;;  %vm1502_vm4 = vweird.f32 %v3675_v39 }
 0x155   : > { %vm431_vm5 = vcmp.lt.s32.totalorder %v3655_v15, 0  ;;  %vm532_vm10 = vcmp.lt.s32.totalorder %v4374_v50, 0  ;;  %v533_v20 = vsub.s32 0, %v4374_v50  ;;  %v1254_v52 = vshrl.u32 %v4351_v25, 16 }
 0x156   : > { %v1258_v34 = vmul.u32 %v1256_v37, %v1253_v56  ;;  %v1493_v32 = vadd.f32 1.0, %v1492_v27  ;;  %v1500_v3 = vadd.f32 1.0, %v1499_v0  ;;  %v1220_v26 = vshrl.u32 %v6359_v43, %v3832_v16 }
 0x157   : > { %v1241_v48 = vsel %vm1239_vm13, %v1229_v58, 2102212464  ;;  %v534_v59 = vsel %vm532_vm10, %v533_v20, %v4374_v50  ;;  %v1259_v60 = vmul.u32 %v1255_v49, %v1254_v52  ;;  %v1278_v42 = vshrl.u32 %v1247_v23, 16 }
 0x158   : > { %v1261_v13 = vshll.u32 %v1258_v34, 16  ;;  %v1501_v6 = vmul.f32 %v1500_v3, %v4321_v44  ;;  %v1510_v47 = vxor.u32 2147483648, %v1493_v32  ;;  %v535_v17 = vclz %v534_v59 }
 0x159   : > { %v1257_v54 = vmul.u32 %v1255_v49, %v1253_v56  ;;  %v553_v41 = vsub.s32 4, %v4346_v1  ;;  %v1240_v35 = vsel %vm1236_vm9, %v1220_v26, %v1223_v30  ;;  %v1242_v16 = vsel %vm1238_vm15, %v4323_v9, %v1241_v48 }
 0x15a   : > { %v1277_v58 = vand.u32 65535, %v1247_v23  ;;  %v1507_v2 = vxor.u32 2147483648, %v1501_v6  ;;  %v6376_v38 = vand.u32 2147483647, %v3655_v15  ;;  %v3241_v44 = vadd.s32 4294967294, %v535_v17 }
 0x15b   : > { %v1260_v57 = vmul.u32 %v1256_v37, %v1254_v52  ;;  %vm1265_vm13 = vc.u32 %v1257_v54, %v1261_v13  ;;  %v1263_v49 = vshll.u32 %v1259_v60, 16  ;;  %v1267_v0 = vadd.s32 %v1261_v13, %v1257_v54 }
 0x15c   : > { %vm4401_vm8 = vcmp.le.f32.partialorder %v6376_v38, 0.7853982  ;;  %v1266_v27 = vsel %vm1265_vm13, 1, %v6351_v11  ;;  %v1280_v30 = vmul.u32 %v1278_v42, %v1253_v56  ;;  %v1508_v20 = vsel %vm1506_vm1, %v1493_v32, %v1507_v2 }
 0x15d   : > { %v1511_v9 = vsel %vm1509_vm2, %v1510_v47, %v1501_v6  ;;  %vm3242_vm9 = vcmp.lt.s32.totalorder %v3241_v44, 0  ;;  %v1268_v23 = vadd.s32 %v1266_v27, %v1260_v57  ;;  %vm1269_vm15 = vc.u32 %v1267_v0, %v1263_v49 }
 0x15e   : > { %v1512_v3 = vsel %vm1505_vm3, %v1508_v20, %v1511_v9  ;;  %v538_v26 = vsel %vm3242_vm9, 0, %v3241_v44  ;;  %v1281_v37 = vmul.u32 %v1277_v58, %v1254_v52  ;;  %v554_v32 = vsel %vm431_vm5, %v553_v41, %v4346_v1 }
 0x15f   : > { %v1513_v48 = vsel %vm1502_vm4, nan, %v1512_v3  ;;  %v539_v59 = vsub.s32 32, %v538_v26  ;;  %v543_v13 = vsub.s32 4294967266, %v538_v26  ;;  %v1262_v6 = vshrl.u32 %v1258_v34, 16 }
 0x160   : > { %3270 = vmatmul.msk.f32.vlgmr.msra.gmra.mxu3 %vm1673_vm12, %v1513_v48  ;;  %v1270_v47 = vsel %vm1269_vm15, 1, %v6351_v11  ;;  %v1279_v17 = vmul.u32 %v1277_v58, %v1253_v56  ;;  %v1283_v51 = vshll.u32 %v1280_v30, 16  ;;  %v540_v54 = vshll.u32 %v4374_v50, %v538_v26 }
 0x161   : > { %v541_v2 = vshrl.u32 %v523_v18, %v539_v59  ;;  %v544_v38 = vadd.s32 127, %v543_v13  ;;  %v1272_v44 = vadd.s32 %v1270_v47, %v1268_v23  ;;  %v1282_v39 = vmul.u32 %v1278_v42, %v1254_v52 }
 0x162   : > { %v1285_v57 = vshll.u32 %v1281_v37, 16  ;;  %vm1287_vm1 = vc.u32 %v1279_v17, %v1283_v51  ;;  %v1289_v49 = vadd.s32 %v1283_v51, %v1279_v17  ;;  %v556_v34 = vsel %vm4401_vm8, 0, %v554_v32 }
 0x163   : > { %v542_v27 = vor.u32 %v541_v2, %v540_v54  ;;  %v545_v0 = vshll.u32 %v544_v38, 23  ;;  %v1273_v20 = vadd.s32 %v1272_v44, %v1262_v6  ;;  %v1288_v1 = vsel %vm1287_vm1, 1, %v6351_v11 }
 0x164   : > { %v1264_v41 = vshrl.u32 %v1259_v60, 16  ;;  %v1290_v56 = vadd.s32 %v1288_v1, %v1282_v39  ;;  %vm1291_vm2 = vc.u32 %v1289_v49, %v1285_v57  ;;  %v1243_v50 = vsel %vm1237_vm0, %v1240_v35, %v1242_v16  ;;  %v3418_v60 = vld [vmem:[%s6231_s5] ss:$0 sm:$0xff] }
 0x165   : > { %v546_v58 = vor.u32 4788187, %v545_v0  ;;  %v1292_v18 = vsel %vm1291_vm2, 1, %v6351_v11  ;;  %v739_v52 = vand.u32 2147483647, %v3669_v31  ;;  %v4428_v42 = vand.u32 31, %v4206_v62 }
 0x166   : > { %v4430_v9 = vadd.s32 %v1273_v20, %v1264_v41  ;;  %v1284_v23 = vshrl.u32 %v1280_v30, 16  ;;  %v1294_v3 = vadd.s32 %v1292_v18, %v1290_v56  ;;  %v4436_v26 = vadd.f32 %v3418_v60, %v4370_v46 }
 0x167   : > { %v547_v8 = vand.u32 2147483647, %v546_v58  ;;  %v549_v35 = vcvt.s32.f32 %v542_v27  ;;  %v573_v16 = vadd.s32 3, %v556_v34  ;;  %v1286_v48 = vshrl.u32 %v1281_v37, 16 }
 0x168   : > { %v1293_v59 = vadd.s32 %v1289_v49, %v1285_v57  ;;  %v1295_v13 = vadd.s32 %v1294_v3, %v1284_v23  ;;  %v1297_v62 = vmul.u32 %v4351_v25, %v1243_v50  ;;  %v746_v30 = vand.u32 8388607, %v739_v52 }
 0x169   : > { %v550_v32 = vmul.f32 %v549_v35, %v547_v8  ;;  %v757_v6 = vshrl.u32 %v6360_v40, %v3857_v5  ;;  %v760_v47 = vshrl.u32 %v6361_v29, %v3857_v5  ;;  %v756_v37 = vshll.u32 %v6359_v43, %v3820_v10 }
 0x16a   : > { %v1296_v46 = vadd.s32 %v1295_v13, %v1286_v48  ;;  %vm1299_vm0 = vc.u32 %v4430_v9, %v1293_v59  ;;  %v763_v17 = vshrl.u32 %v6347_v4, %v3857_v5  ;;  %v759_v51 = vshll.u32 %v6360_v40, %v3820_v10 }
 0x16b   : > { %v551_v25 = vxor.u32 2147483648, %v550_v32  ;;  %v765_v54 = vshll.u32 %v6347_v4, %v3820_v10  ;;  %v766_v2 = vshrl.u32 %v6349_v24, %v3857_v5  ;;  %v762_v44 = vshll.u32 %v6361_v29, %v3820_v10 }
 0x16c   : > { %v1300_v38 = vadd.s32 1, %v1296_v46  ;;  %v768_v39 = vshll.u32 %v6349_v24, %v3820_v10  ;;  %v769_v57 = vshrl.u32 %v6350_v7, %v3857_v5  ;;  %v4464_v27 = vor.u32 %v757_v6, %v756_v37 }
 0x16d   : > { %v552_v49 = vsel %vm431_vm5, %v551_v25, %v550_v32  ;;  %v4466_v0 = vor.u32 %v760_v47, %v759_v51  ;;  %v767_v20 = vor.u32 %v766_v2, %v765_v54  ;;  %v764_v10 = vor.u32 %v763_v17, %v762_v44 }
 0x16e   : > { %v4471_v1 = vsel %vm4401_vm8, %v3655_v15, %v552_v49  ;;  %v1301_v34 = vsel %vm1299_vm0, %v1300_v38, %v1296_v46  ;;  %v770_v41 = vor.u32 %v769_v57, %v768_v39  ;;  %v747_v50 = vor.u32 8388608, %v746_v30 }
 0x16f   : > { %v557_v56 = vmul.f32 %v4471_v1, %v4471_v1  ;;  %v1302_v58 = vadd.s32 %v1301_v34, %v1297_v62  ;;  %vm774_vm3 = vcmp.lt.s32.totalorder %v3850_v53, 4  ;;  %v2736_v18 = vand.u32 2139095040, %v4436_v26 }
 0x170   : > { %v4479_v23 = vand.u32 3, %v573_v16  ;;  %vm771_vm4 = vcmp.lt.s32.totalorder %v3850_v53, 1  ;;  %v780_v28 = vsel %vm774_vm3, %v767_v20, 920167782  ;;  %vm773_vm5 = vcmp.lt.s32.totalorder %v3850_v53, 3 }
 0x171   : > { %v558_v3 = vmul.f32 -0.001358992, %v557_v56  ;;  %v565_v60 = vmul.f32 -0.00019511016, %v557_v56  ;;  %v1303_v8 = vadd.s32 536870912, %v1302_v58  ;;  %v779_v35 = vsel %vm771_vm4, %v4464_v27, %v4466_v0 }
 0x172   : > { %v781_v48 = vsel %vm773_vm5, %v764_v10, %v780_v28  ;;  %v783_v16 = vsel %vm771_vm4, %v4466_v0, %v764_v10  ;;  %v784_v13 = vsel %vm774_vm3, %v770_v41, 1326507024  ;;  %v4498_v6 = vshll.u32 %v747_v50, 8 }
 0x173   : > { %v559_v62 = vadd.f32 0.041655596, %v558_v3  ;;  %v566_v32 = vadd.f32 0.008332121, %v565_v60  ;;  %v4496_v30 = vshrl.u32 %v1303_v8, 30  ;;  %v4502_v47 = vshrl.u32 %v6349_v24, %v4284_v36 }
 0x174   : > { %v4506_v46 = vshrl.u32 %v2271_v63, 23  ;;  %vm772_vm10 = vcmp.lt.s32.totalorder %v3850_v53, 2  ;;  %v785_v37 = vsel %vm773_vm5, %v767_v20, %v784_v13  ;;  %v4517_v2 = vsub.s32 32, %v4428_v42 }
 0x175   : > { %6379 = vst [vmem:[#allocation49_spill] sm:$0xff] %v4502_v47  ;;  %v560_v17 = vmul.f32 %v559_v62, %v557_v56  ;;  %v567_v25 = vmul.f32 %v566_v32, %v557_v56  ;;  %v1305_v51 = vshll.u32 %v4496_v30, 30  ;;  %v4514_v54 = vsel %vm772_vm10, %v779_v35, %v781_v48 }
 0x176   : > { %v4519_v38 = vshrl.u32 %v2736_v18, 23  ;;  %v1298_v63 = vadd.s32 %v1293_v59, %v4430_v9  ;;  %v786_v44 = vsel %vm772_vm10, %v783_v16, %v785_v37  ;;  %vm579_vm8 = vcmp.eq.s32.totalorder %v4479_v23, 2 }
 0x177   : > { %v561_v39 = vadd.f32 -0.4999988, %v560_v17  ;;  %v568_v57 = vadd.f32 -0.16666654, %v567_v25  ;;  %v4525_v49 = vsub.s32 %v1302_v58, %v1305_v51  ;;  %v788_v20 = vand.u32 65535, %v4498_v6 }
 0x178   : > { %vm576_vm13 = vcmp.eq.s32.totalorder %v4479_v23, 0  ;;  %v789_v34 = vshrl.u32 %v4498_v6, 16  ;;  %v790_v41 = vand.u32 65535, %v786_v44  ;;  %v791_v50 = vshrl.u32 %v786_v44, 16 }
 0x179   : > { %v813_v18 = vshrl.u32 %v4514_v54, 16  ;;  %v562_v9 = vmul.f32 %v561_v39, %v557_v56  ;;  %v569_v59 = vmul.f32 %v568_v57, %v557_v56  ;;  %vm575_vm9 = vcmp.lt.s32.totalorder %v4479_v23, 2 }
 0x17a   : > { %vm1307_vm15 = vcmp.lt.s32.totalorder %v4525_v49, 0  ;;  %v1308_v28 = vsub.s32 0, %v4525_v49  ;;  %vm572_vm1 = vweird.f32 %v3655_v15  ;;  %vm1206_vm2 = vcmp.lt.s32.totalorder %v3652_v12, 0 }
 0x17b   : > { %v755_v58 = vshrl.u32 %v6359_v43, %v3857_v5  ;;  %v776_v3 = vsel %vm774_vm3, %v764_v10, 2102212464  ;;  %v793_v60 = vmul.u32 %v791_v50, %v788_v20  ;;  %v812_v8 = vand.u32 65535, %v4514_v54 }
 0x17c   : > { %v563_v56 = vadd.f32 1.0, %v562_v9  ;;  %v570_v35 = vadd.f32 1.0, %v569_v59  ;;  %v1309_v48 = vsel %vm1307_vm15, %v1308_v28, %v4525_v49  ;;  %v794_v16 = vmul.u32 %v790_v41, %v789_v34 }
 0x17d   : > { %v1310_v13 = vclz %v1309_v48  ;;  %v775_v62 = vsel %vm771_vm4, %v755_v58, %v4464_v27  ;;  %v796_v32 = vshll.u32 %v793_v60, 16  ;;  %v815_v37 = vmul.u32 %v813_v18, %v788_v20 }
 0x17e   : > { %v571_v5 = vmul.f32 %v570_v35, %v4471_v1  ;;  %v580_v17 = vxor.u32 2147483648, %v563_v56  ;;  %v777_v10 = vsel %vm773_vm5, %v4466_v0, %v776_v3  ;;  %v792_v25 = vmul.u32 %v790_v41, %v788_v20 }
 0x17f   : > { %vm4551_vm0 = vcmp.le.f32.partialorder %v1204_v55, 0.7853982  ;;  %v3256_v54 = vadd.s32 4294967294, %v1310_v13  ;;  %v1328_v44 = vsub.s32 4, %v4496_v30  ;;  %v795_v27 = vmul.u32 %v791_v50, %v789_v34 }
 0x180   : > { %v816_v39 = vmul.u32 %v812_v8, %v789_v34  ;;  %v577_v57 = vxor.u32 2147483648, %v571_v5  ;;  %v798_v9 = vshll.u32 %v794_v16, 16  ;;  %vm800_vm3 = vc.u32 %v792_v25, %v796_v32 }
 0x181   : > { %v802_v1 = vadd.s32 %v796_v32, %v792_v25  ;;  %v581_v59 = vsel %vm579_vm8, %v580_v17, %v571_v5  ;;  %vm3257_vm4 = vcmp.lt.s32.totalorder %v3256_v54, 0  ;;  %v801_v0 = vsel %vm800_vm3, 1, %v6351_v11 }
 0x182   : > { %v818_v41 = vshll.u32 %v815_v37, 16  ;;  %v578_v55 = vsel %vm576_vm13, %v563_v56, %v577_v57  ;;  %v1313_v28 = vsel %vm3257_vm4, 0, %v3256_v54  ;;  %v803_v58 = vadd.s32 %v801_v0, %v795_v27 }
 0x183   : > { %vm804_vm5 = vc.u32 %v802_v1, %v798_v9  ;;  %v582_v50 = vsel %vm575_vm9, %v578_v55, %v581_v59  ;;  %v1314_v3 = vsub.s32 32, %v1313_v28  ;;  %v1318_v35 = vsub.s32 4294967266, %v1313_v28 }
 0x184   : > { %v814_v48 = vmul.u32 %v812_v8, %v788_v20  ;;  %v583_v13 = vsel %vm572_vm1, nan, %v582_v50  ;;  %v1329_v32 = vsel %vm1206_vm2, %v1328_v44, %v4496_v30  ;;  %v797_v5 = vshrl.u32 %v793_v60, 16 }
 0x185   : > { %v805_v17 = vsel %vm804_vm5, 1, %v6351_v11  ;;  %3264 = vmatmul.msk.f32.vlgmr.msra.gmra.mxu0 %vm1673_vm12, %v583_v13  ;;  %v1315_v56 = vshll.u32 %v4525_v49, %v1313_v28  ;;  %v1316_v25 = vshrl.u32 %v1298_v63, %v1314_v3  ;;  %v1319_v23 = vadd.s32 127, %v1318_v35 }
 0x186   : > { %v807_v54 = vadd.s32 %v805_v17, %v803_v58  ;;  %v817_v27 = vmul.u32 %v813_v18, %v789_v34  ;;  %v820_v57 = vshll.u32 %v816_v39, 16  ;;  %vm822_vm8 = vc.u32 %v814_v48, %v818_v41 }
 0x187   : > { %v824_v20 = vadd.s32 %v818_v41, %v814_v48  ;;  %v1317_v15 = vor.u32 %v1316_v25, %v1315_v56  ;;  %v1320_v8 = vshll.u32 %v1319_v23, 23  ;;  %v823_v1 = vsel %vm822_vm8, 1, %v6351_v11 }
 0x188   : > { %v808_v9 = vadd.s32 %v807_v54, %v797_v5  ;;  %v1331_v30 = vsel %vm4551_vm0, 0, %v1329_v32  ;;  %v799_v60 = vshrl.u32 %v794_v16, 16  ;;  %v825_v44 = vadd.s32 %v823_v1, %v817_v27 }
 0x189   : > { %vm826_vm13 = vc.u32 %v824_v20, %v820_v57  ;;  %v1321_v59 = vor.u32 4788187, %v1320_v8  ;;  %v778_v63 = vsel %vm772_vm10, %v775_v62, %v777_v10  ;;  %v894_v34 = vand.u32 2147483647, %v3678_v21 }
 0x18a   : > { %v827_v49 = vsel %vm826_vm13, 1, %v6351_v11  ;;  %v4580_v18 = vshll.u32 %v6347_v4, %v4428_v42  ;;  %v4582_v0 = vadd.s32 %v808_v9, %v799_v60  ;;  %v819_v41 = vshrl.u32 %v815_v37, 16 }
 0x18b   : > { %v829_v55 = vadd.s32 %v827_v49, %v825_v44  ;;  %v3290_v16 = vadd.s32 4294967169, %v4519_v38  ;;  %v1322_v28 = vand.u32 2147483647, %v1321_v59  ;;  %v1324_v58 = vcvt.s32.f32 %v1317_v15 }
 0x18c   : > { %v1348_v50 = vadd.s32 3, %v1331_v30  ;;  %v821_v3 = vshrl.u32 %v816_v39, 16  ;;  %v4585_v53 = vadd.s32 %v824_v20, %v820_v57  ;;  %v832_v10 = vmul.u32 %v4498_v6, %v778_v63  ;;  %v6382_v39 = vld [vmem:[#allocation16_spill] sm:$0xff] }
 0x18d   : > { %v830_v62 = vadd.s32 %v829_v55, %v819_v41  ;;  %v1325_v35 = vmul.f32 %v1324_v58, %v1322_v28  ;;  %v901_v48 = vand.u32 8388607, %v894_v34  ;;  %v915_v13 = vshrl.u32 %v6361_v29, %v3866_v22  ;;  %v6383_v41 = vld [vmem:[#allocation18_spill] sm:$0xff] }
 0x18e   : > { %v918_v37 = vshrl.u32 %v6347_v4, %v3866_v22  ;;  %vm834_vm10 = vc.u32 %v4582_v0, %v4585_v53  ;;  %v920_v32 = vshll.u32 %v6347_v4, %v6382_v39  ;;  %v921_v6 = vshrl.u32 %v6349_v24, %v3866_v22 }
 0x18f   : > { %v831_v38 = vadd.s32 %v830_v62, %v821_v3  ;;  %v1326_v5 = vxor.u32 2147483648, %v1325_v35  ;;  %v912_v17 = vshrl.u32 %v6360_v40, %v3866_v22  ;;  %v914_v56 = vshll.u32 %v6360_v40, %v6382_v39 }
 0x190   : > { %v917_v25 = vshll.u32 %v6361_v29, %v6382_v39  ;;  %v922_v54 = vor.u32 %v921_v6, %v920_v32  ;;  %v923_v27 = vshll.u32 %v6349_v24, %v6382_v39  ;;  %v924_v57 = vshrl.u32 %v6350_v7, %v3866_v22 }
 0x191   : > { %v835_v23 = vadd.s32 1, %v831_v38  ;;  %v1327_v20 = vsel %vm1206_vm2, %v1326_v5, %v1325_v35  ;;  %v911_v15 = vshll.u32 %v6359_v43, %v6382_v39  ;;  %v4614_v8 = vor.u32 %v915_v13, %v914_v56 }
 0x192   : > { %v4616_v9 = vor.u32 %v918_v37, %v917_v25  ;;  %v4621_v1 = vsel %vm4551_vm0, %v3652_v12, %v1327_v20  ;;  %v902_v60 = vor.u32 8388608, %v901_v48  ;;  %v925_v44 = vor.u32 %v924_v57, %v923_v27 }
 0x193   : > { %v836_v30 = vsel %vm834_vm10, %v835_v23, %v831_v38  ;;  %v1332_v59 = vmul.f32 %v4621_v1, %v4621_v1  ;;  %v4628_v49 = vor.u32 %v912_v17, %v911_v15  ;;  %vm929_vm9 = vcmp.lt.s32.totalorder %v6383_v41, 4 }
 0x194   : > { %v837_v63 = vadd.s32 %v836_v30, %v832_v10  ;;  %vm926_vm15 = vcmp.lt.s32.totalorder %v6383_v41, 1  ;;  %vm928_vm1 = vcmp.lt.s32.totalorder %v6383_v41, 3  ;;  %v935_v51 = vsel %vm929_vm9, %v922_v54, 920167782 }
 0x195   : > { %v939_v55 = vsel %vm929_vm9, %v925_v44, 1326507024  ;;  %v1333_v28 = vmul.f32 -0.001358992, %v1332_v59  ;;  %v1340_v58 = vmul.f32 -0.00019511016, %v1332_v59  ;;  %v938_v62 = vsel %vm926_vm15, %v4614_v8, %v4616_v9 }
 0x196   : > { %v838_v3 = vadd.s32 536870912, %v837_v63  ;;  %v4643_v10 = vshll.u32 %v6349_v24, %v4428_v42  ;;  %v4646_v35 = vadd.s32 4294967169, %v4506_v46  ;;  %v940_v48 = vsel %vm928_vm1, %v922_v54, %v939_v55 }
 0x197   : > { %v4650_v13 = vshll.u32 %v902_v60, 8  ;;  %v1334_v37 = vadd.f32 0.041655596, %v1333_v28  ;;  %v1341_v38 = vadd.f32 0.008332121, %v1340_v58  ;;  %vm927_vm2 = vcmp.lt.s32.totalorder %v6383_v41, 2 }
 0x198   : > { %v4652_v39 = vshrl.u32 %v838_v3, 30  ;;  %v4655_v32 = vand.u32 3, %v1348_v50  ;;  %v934_v6 = vsel %vm926_vm15, %v4628_v49, %v4614_v8  ;;  %v936_v46 = vsel %vm928_vm1, %v4616_v9, %v935_v51 }
 0x199   : > { %v941_v5 = vsel %vm927_vm2, %v938_v62, %v940_v48  ;;  %v4666_v17 = vadd.s32 1, %v3290_v16  ;;  %v1335_v56 = vmul.f32 %v1334_v37, %v1332_v59  ;;  %v1342_v25 = vmul.f32 %v1341_v38, %v1332_v59 }
 0x19a   : > { %v840_v23 = vshll.u32 %v4652_v39, 30  ;;  %v943_v50 = vand.u32 65535, %v4650_v13  ;;  %v4671_v54 = vshrl.u32 %v4650_v13, 16  ;;  %v945_v27 = vand.u32 65535, %v941_v5 }
 0x19b   : > { %v946_v57 = vshrl.u32 %v941_v5, 16  ;;  %v1336_v20 = vadd.f32 -0.4999988, %v1335_v56  ;;  %v1343_v15 = vadd.f32 -0.16666654, %v1342_v25  ;;  %v937_v60 = vsel %vm927_vm2, %v934_v6, %v936_v46 }
 0x19c   : > { %v4673_v30 = vsub.s32 %v837_v63, %v840_v23  ;;  %vm1351_vm0 = vcmp.eq.s32.totalorder %v4655_v32, 0  ;;  %vm1354_vm3 = vcmp.eq.s32.totalorder %v4655_v32, 2  ;;  %v910_v16 = vshrl.u32 %v6359_v43, %v3866_v22 }
 0x19d   : > { %v948_v44 = vmul.u32 %v946_v57, %v943_v50  ;;  %v4682_v51 = vmul.u32 %v945_v27, %v4671_v54  ;;  %v1337_v55 = vmul.f32 %v1336_v20, %v1332_v59  ;;  %v1344_v28 = vmul.f32 %v1343_v15, %v1332_v59 }
 0x19e   : > { %vm1350_vm4 = vcmp.lt.s32.totalorder %v4655_v32, 2  ;;  %vm842_vm5 = vcmp.lt.s32.totalorder %v4673_v30, 0  ;;  %v843_v63 = vsub.s32 0, %v4673_v30  ;;  %vm1347_vm8 = vweird.f32 %v3652_v12 }
 0x19f   : > { %vm741_vm13 = vcmp.lt.s32.totalorder %v3669_v31, 0  ;;  %v833_v58 = vadd.s32 %v4585_v53, %v4582_v0  ;;  %v947_v22 = vmul.u32 %v945_v27, %v943_v50  ;;  %v951_v3 = vshll.u32 %v948_v44, 16 }
 0x1a0   : > { %v967_v62 = vand.u32 65535, %v937_v60  ;;  %v1338_v48 = vadd.f32 1.0, %v1337_v55  ;;  %v1345_v37 = vadd.f32 1.0, %v1344_v28  ;;  %v844_v59 = vsel %vm842_vm5, %v843_v63, %v4673_v30 }
 0x1a1   : > { %v968_v38 = vshrl.u32 %v937_v60, 16  ;;  %v845_v6 = vclz %v844_v59  ;;  %v950_v46 = vmul.u32 %v946_v57, %v4671_v54  ;;  %v953_v5 = vshll.u32 %v4682_v51, 16 }
 0x1a2   : > { %vm955_vm10 = vc.u32 %v947_v22, %v951_v3  ;;  %v1346_v56 = vmul.f32 %v1345_v37, %v4621_v1  ;;  %v1355_v25 = vxor.u32 2147483648, %v1338_v48  ;;  %v957_v0 = vadd.s32 %v951_v3, %v947_v22 }
 0x1a3   : > { %v956_v23 = vsel %vm955_vm10, 1, %v6351_v11  ;;  %vm2744_vm7 = vcmp.gt.s32.totalorder %v4666_v17, 0  ;;  %vm4699_vm14 = vcmp.le.f32.partialorder %v739_v52, 0.7853982  ;;  %v3247_v27 = vadd.s32 4294967294, %v845_v6 }
 0x1a4   : > { %v863_v57 = vsub.s32 4, %v4652_v39  ;;  %v930_v20 = vsel %vm926_vm15, %v910_v16, %v4628_v49  ;;  %v931_v1 = vsel %vm929_vm9, %v4616_v9, 2102212464  ;;  %v1352_v15 = vxor.u32 2147483648, %v1346_v56 }
 0x1a5   : > { %v952_v60 = vshrl.u32 %v948_v44, 16  ;;  %v958_v55 = vadd.s32 %v956_v23, %v950_v46  ;;  %vm959_vm5 = vc.u32 %v957_v0, %v953_v5  ;;  %v1356_v52 = vsel %vm1354_vm3, %v1355_v25, %v1346_v56 }
 0x1a6   : > { %vm3248_vm10 = vcmp.lt.s32.totalorder %v3247_v27, 0  ;;  %v960_v28 = vsel %vm959_vm5, 1, %v6351_v11  ;;  %v970_v63 = vmul.u32 %v968_v38, %v943_v50  ;;  %v1353_v22 = vsel %vm1351_vm0, %v1338_v48, %v1352_v15 }
 0x1a7   : > { %v848_v3 = vsel %vm3248_vm10, 0, %v3247_v27  ;;  %v962_v49 = vadd.s32 %v960_v28, %v958_v55  ;;  %v971_v16 = vmul.u32 %v967_v62, %v4671_v54  ;;  %v1357_v9 = vsel %vm1350_vm4, %v1353_v22, %v1356_v52 }
 0x1a8   : > { %v849_v44 = vsub.s32 32, %v848_v3  ;;  %v853_v37 = vsub.s32 4294967266, %v848_v3  ;;  %v969_v59 = vmul.u32 %v967_v62, %v943_v50  ;;  %v1358_v6 = vsel %vm1347_vm8, nan, %v1357_v9 }
 0x1a9   : > { %v864_v46 = vsel %vm741_vm13, %v863_v57, %v4652_v39  ;;  %v963_v5 = vadd.s32 %v962_v49, %v952_v60  ;;  %v973_v56 = vshll.u32 %v970_v63, 16  ;;  %3269 = vmatmul.msk.f32.gmra.mxu2 %vm1673_vm12, %v1358_v6  ;;  %v850_v48 = vshll.u32 %v4673_v30, %v848_v3  ;;  %v6386_v60 = vld [vmem:[#allocation5_spill] sm:$0xff] }
 0x1aa   : > { %v851_v25 = vshrl.u32 %v833_v58, %v849_v44  ;;  %v854_v23 = vadd.s32 127, %v853_v37  ;;  %v954_v32 = vshrl.u32 %v4682_v51, 16  ;;  %v972_v0 = vmul.u32 %v968_v38, %v4671_v54 }
 0x1ab   : > { %v975_v50 = vshll.u32 %v971_v16, 16  ;;  %vm977_vm9 = vc.u32 %v969_v59, %v973_v56  ;;  %v979_v12 = vadd.s32 %v973_v56, %v969_v59  ;;  %v932_v39 = vsel %vm928_vm1, %v4614_v8, %v931_v1  ;;  %v6387_v59 = vld [vmem:[#allocation25_spill] sm:$0xff] }
 0x1ac   : > { %v852_v62 = vor.u32 %v851_v25, %v850_v48  ;;  %v855_v27 = vshll.u32 %v854_v23, 23  ;;  %v978_v57 = vsel %vm977_vm9, 1, %v6351_v11  ;;  %v866_v30 = vsel %vm4699_vm14, 0, %v864_v46 }
 0x1ad   : > { %v4733_v58 = vadd.s32 %v963_v5, %v954_v32  ;;  %v980_v15 = vadd.s32 %v978_v57, %v972_v0  ;;  %vm981_vm15 = vc.u32 %v979_v12, %v975_v50  ;;  %v4737_v54 = vshrl.u32 %v6349_v24, %v4517_v2 }
 0x1ae   : > { %v856_v51 = vor.u32 4788187, %v855_v27  ;;  %v982_v38 = vsel %vm981_vm15, 1, %v6351_v11  ;;  %v1514_v55 = vand.u32 2147483647, %v6386_v60  ;;  %v4744_v8 = vsel %vm2744_vm7, %v4666_v17, 0 }
 0x1af   : > { %v974_v1 = vshrl.u32 %v970_v63, 16  ;;  %v4746_v52 = vadd.s32 %v979_v12, %v975_v50  ;;  %v984_v28 = vadd.s32 %v982_v38, %v980_v15  ;;  %v859_v3 = vcvt.s32.f32 %v852_v62 }
 0x1b0   : > { %v857_v22 = vand.u32 2147483647, %v856_v51  ;;  %v883_v49 = vadd.s32 3, %v866_v30  ;;  %v933_v9 = vsel %vm927_vm2, %v930_v20, %v932_v39  ;;  %v976_v44 = vshrl.u32 %v971_v16, 16  ;;  %v6388_v20 = vld [vmem:[#allocation20_spill] sm:$0xff] }
 0x1b1   : > { %v985_v37 = vadd.s32 %v984_v28, %v974_v1  ;;  %vm989_vm1 = vc.u32 %v4733_v58, %v4746_v52  ;;  %v1535_v6 = vshrl.u32 %v6361_v29, %v6387_v59  ;;  %v1521_v63 = vand.u32 8388607, %v1514_v55 }
 0x1b2   : > { %v860_v17 = vmul.f32 %v859_v3, %v857_v22  ;;  %v1532_v46 = vshrl.u32 %v6360_v40, %v6387_v59  ;;  %v1538_v5 = vshrl.u32 %v6347_v4, %v6387_v59  ;;  %v1534_v16 = vshll.u32 %v6360_v40, %v6388_v20 }
 0x1b3   : > { %v986_v41 = vadd.s32 %v985_v37, %v976_v44  ;;  %v1537_v56 = vshll.u32 %v6361_v29, %v6388_v20  ;;  %v1541_v48 = vshrl.u32 %v6349_v24, %v6387_v59  ;;  %v1531_v23 = vshll.u32 %v6359_v43, %v6388_v20  ;;  %v6389_v44 = vld [vmem:[#allocation19_spill] sm:$0xff] }
 0x1b4   : > { %v861_v25 = vxor.u32 2147483648, %v860_v17  ;;  %v1543_v32 = vshll.u32 %v6349_v24, %v6388_v20  ;;  %v1544_v0 = vshrl.u32 %v6350_v7, %v6387_v59  ;;  %v4772_v12 = vor.u32 %v1535_v6, %v1534_v16 }
 0x1b5   : > { %v990_v50 = vadd.s32 1, %v986_v41  ;;  %v1539_v62 = vor.u32 %v1538_v5, %v1537_v56  ;;  %v1540_v27 = vshll.u32 %v6347_v4, %v6388_v20  ;;  %v987_v57 = vmul.u32 %v4650_v13, %v933_v9 }
 0x1b6   : > { %v862_v39 = vsel %vm741_vm13, %v861_v25, %v860_v17  ;;  %v1522_v30 = vor.u32 8388608, %v1521_v63  ;;  %v1545_v15 = vor.u32 %v1544_v0, %v1543_v32  ;;  %v4787_v1 = vor.u32 %v1532_v46, %v1531_v23 }
 0x1b7   : > { %v4782_v51 = vsel %vm4699_vm14, %v3669_v31, %v862_v39  ;;  %v991_v38 = vsel %vm989_vm1, %v990_v50, %v986_v41  ;;  %v1542_v28 = vor.u32 %v1541_v48, %v1540_v27  ;;  %vm1546_vm7 = vcmp.lt.s32.totalorder %v6389_v44, 1 }
 0x1b8   : > { %v867_v22 = vmul.f32 %v4782_v51, %v4782_v51  ;;  %v992_v3 = vadd.s32 %v991_v38, %v987_v57  ;;  %vm1549_vm2 = vcmp.lt.s32.totalorder %v6389_v44, 4  ;;  %v4793_v13 = vand.u32 3, %v883_v49 }
 0x1b9   : > { %vm1547_vm14 = vcmp.lt.s32.totalorder %v6389_v44, 2  ;;  %v1558_v53 = vsel %vm1546_vm7, %v4772_v12, %v1539_v62  ;;  %v1559_v9 = vsel %vm1549_vm2, %v1545_v15, 1326507024  ;;  %vm1548_vm0 = vcmp.lt.s32.totalorder %v6389_v44, 3 }
 0x1ba   : > { %v868_v37 = vmul.f32 -0.001358992, %v867_v22  ;;  %v875_v6 = vmul.f32 -0.00019511016, %v867_v22  ;;  %v993_v17 = vadd.s32 536870912, %v992_v3  ;;  %v1554_v49 = vsel %vm1546_vm7, %v4787_v1, %v4772_v12 }
 0x1bb   : > { %v1555_v63 = vsel %vm1549_vm2, %v1542_v28, 920167782  ;;  %v1560_v46 = vsel %vm1548_vm0, %v1542_v28, %v1559_v9  ;;  %v4810_v5 = vshll.u32 %v1522_v30, 8  ;;  %vm4824_vm3 = vcmp.le.f32.partialorder %v894_v34, 0.7853982 }
 0x1bc   : > { %v869_v41 = vadd.f32 0.041655596, %v868_v37  ;;  %v876_v20 = vadd.f32 0.008332121, %v875_v6  ;;  %v994_v16 = vshrl.u32 %v993_v17, 30  ;;  %v1561_v56 = vsel %vm1547_vm14, %v1558_v53, %v1560_v46 }
 0x1bd   : > { %v4815_v48 = vand.u32 65535, %v4810_v5  ;;  %v4818_v25 = vshrl.u32 %v4810_v5, 16  ;;  %v1565_v23 = vand.u32 65535, %v1561_v56  ;;  %v1566_v32 = vshrl.u32 %v1561_v56, 16 }
 0x1be   : > { %v870_v0 = vmul.f32 %v869_v41, %v867_v22  ;;  %v877_v50 = vmul.f32 %v876_v20, %v867_v22  ;;  %v995_v27 = vshll.u32 %v994_v16, 30  ;;  %v1556_v39 = vsel %vm1548_vm0, %v1539_v62, %v1555_v63 }
 0x1bf   : > { %vm896_vm4 = vcmp.lt.s32.totalorder %v3678_v21, 0  ;;  %v1530_v30 = vshrl.u32 %v6359_v43, %v6387_v59  ;;  %v1568_v15 = vmul.u32 %v1566_v32, %v4815_v48  ;;  %v4833_v38 = vmul.u32 %v1565_v23, %v4818_v25 }
 0x1c0   : > { %v871_v28 = vadd.f32 -0.4999988, %v870_v0  ;;  %v878_v53 = vadd.f32 -0.16666654, %v877_v50  ;;  %v4835_v9 = vsub.s32 %v992_v3, %v995_v27  ;;  %v1551_v34 = vsel %vm1549_vm2, %v1539_v62, 2102212464 }
 0x1c1   : > { %vm886_vm8 = vcmp.eq.s32.totalorder %v4793_v13, 0  ;;  %v1018_v37 = vsub.s32 4, %v994_v16  ;;  %v1557_v6 = vsel %vm1547_vm14, %v1554_v49, %v1556_v39  ;;  %v1567_v59 = vmul.u32 %v1565_v23, %v4815_v48 }
 0x1c2   : > { %v1571_v17 = vshll.u32 %v1568_v15, 16  ;;  %v872_v63 = vmul.f32 %v871_v28, %v867_v22  ;;  %v879_v46 = vmul.f32 %v878_v53, %v867_v22  ;;  %vm885_vm13 = vcmp.lt.s32.totalorder %v4793_v13, 2 }
 0x1c3   : > { %vm997_vm5 = vcmp.lt.s32.totalorder %v4835_v9, 0  ;;  %v998_v3 = vsub.s32 0, %v4835_v9  ;;  %vm882_vm10 = vweird.f32 %v3669_v31  ;;  %v1570_v62 = vmul.u32 %v1566_v32, %v4818_v25 }
 0x1c4   : > { %v1573_v41 = vshll.u32 %v4833_v38, 16  ;;  %vm1575_vm9 = vc.u32 %v1567_v59, %v1571_v17  ;;  %v1577_v20 = vadd.s32 %v1571_v17, %v1567_v59  ;;  %v873_v49 = vadd.f32 1.0, %v872_v63 }
 0x1c5   : > { %v880_v56 = vadd.f32 1.0, %v879_v46  ;;  %v999_v23 = vsel %vm997_vm5, %v998_v3, %v4835_v9  ;;  %v1576_v22 = vsel %vm1575_vm9, 1, %v6351_v11  ;;  %v1019_v50 = vsel %vm896_vm4, %v1018_v37, %v994_v16 }
 0x1c6   : > { %v1000_v0 = vclz %v999_v23  ;;  %v1578_v27 = vadd.s32 %v1576_v22, %v1570_v62  ;;  %vm1579_vm15 = vc.u32 %v1577_v20, %v1573_v41  ;;  %v890_v28 = vxor.u32 2147483648, %v873_v49 }
 0x1c7   : > { %v881_v39 = vmul.f32 %v880_v56, %v4782_v51  ;;  %v1580_v32 = vsel %vm1579_vm15, 1, %v6351_v11  ;;  %v1587_v53 = vand.u32 65535, %v1557_v6  ;;  %vm889_vm1 = vcmp.eq.s32.totalorder %v4793_v13, 2 }
 0x1c8   : > { %v988_v59 = vadd.s32 %v4746_v52, %v4733_v58  ;;  %v3250_v17 = vadd.s32 4294967294, %v1000_v0  ;;  %v1550_v63 = vsel %vm1546_vm7, %v1530_v30, %v4787_v1  ;;  %v1021_v16 = vsel %vm4824_vm3, 0, %v1019_v50 }
 0x1c9   : > { %v887_v46 = vxor.u32 2147483648, %v881_v39  ;;  %v1582_v37 = vadd.s32 %v1580_v32, %v1578_v27  ;;  %v1588_v51 = vshrl.u32 %v1557_v6, 16  ;;  %v891_v3 = vsel %vm889_vm1, %v890_v28, %v881_v39 }
 0x1ca   : > { %vm3251_vm2 = vcmp.lt.s32.totalorder %v3250_v17, 0  ;;  %v1552_v62 = vsel %vm1548_vm0, %v4772_v12, %v1551_v34  ;;  %v1572_v41 = vshrl.u32 %v1568_v15, 16  ;;  %v1591_v1 = vmul.u32 %v1587_v53, %v4818_v25 }
 0x1cb   : > { %v888_v58 = vsel %vm886_vm8, %v873_v49, %v887_v46  ;;  %v1003_v52 = vsel %vm3251_vm2, 0, %v3250_v17  ;;  %v1590_v20 = vmul.u32 %v1588_v51, %v4815_v48  ;;  %v1038_v23 = vadd.s32 3, %v1021_v16 }
 0x1cc   : > { %v892_v30 = vsel %vm885_vm13, %v888_v58, %v891_v3  ;;  %v1004_v56 = vsub.s32 32, %v1003_v52  ;;  %v1008_v6 = vsub.s32 4294967266, %v1003_v52  ;;  %v1583_v0 = vadd.s32 %v1582_v37, %v1572_v41 }
 0x1cd   : > { %v893_v22 = vsel %vm882_vm10, nan, %v892_v30  ;;  %v1589_v12 = vmul.u32 %v1587_v53, %v4815_v48  ;;  %v1593_v15 = vshll.u32 %v1590_v20, 16  ;;  %v1005_v34 = vshll.u32 %v4835_v9, %v1003_v52  ;;  %v6392_v9 = vld [vmem:[#allocation9_spill] sm:$0xff] }
 0x1ce   : > { %3266 = vmatmul.msk.f32.vlgmr.msra.gmra.mxu1 %vm1673_vm12, %v893_v22  ;;  %v1006_v49 = vshrl.u32 %v988_v59, %v1004_v56  ;;  %v1009_v50 = vadd.s32 127, %v1008_v6  ;;  %v1574_v27 = vshrl.u32 %v4833_v38, 16  ;;  %v1592_v13 = vmul.u32 %v1588_v51, %v4818_v25  ;;  %v6393_v56 = vld [vmem:[#allocation35_spill] sm:$0xff]  ;;  %v6394_v22 = vld [vmem:[#allocation33_spill] sm:$0xff] }
 0x1cf   : > { %v1595_v39 = vshll.u32 %v1591_v1, 16  ;;  %vm1597_vm7 = vc.u32 %v1589_v12, %v1593_v15  ;;  %v1599_v28 = vadd.s32 %v1593_v15, %v1589_v12  ;;  %v1553_v17 = vsel %vm1547_vm14, %v1550_v63, %v1552_v62 }
 0x1d0   : > { %v1007_v32 = vor.u32 %v1006_v49, %v1005_v34  ;;  %v1010_v31 = vshll.u32 %v1009_v50, 23  ;;  %v1598_v48 = vsel %vm1597_vm7, 1, %v6351_v11  ;;  %v4882_v53 = vadd.s32 %v1583_v0, %v1574_v27 }
 0x1d1   : > { %v1600_v46 = vadd.s32 %v1598_v48, %v1592_v13  ;;  %vm1601_vm0 = vc.u32 %v1599_v28, %v1595_v39  ;;  %v6309_v59 = vand.u32 2147483647, %v6392_v9  ;;  %v4886_v38 = vadd.s32 1, %v4646_v35 }
 0x1d2   : > { %v4889_v25 = vand.u32 31, %v4744_v8  ;;  %v1011_v16 = vor.u32 4788187, %v1010_v31  ;;  %v1602_v37 = vsel %vm1601_vm0, 1, %v6351_v11  ;;  %v4892_v51 = vand.u32 3, %v1038_v23 }
 0x1d3   : > { %v1594_v44 = vshrl.u32 %v1590_v20, 16  ;;  %v4894_v63 = vadd.s32 %v1599_v28, %v1595_v39  ;;  %v1604_v3 = vadd.s32 %v1602_v37, %v1600_v46  ;;  %v1014_v41 = vcvt.s32.f32 %v1007_v32 }
 0x1d4   : > { %v1012_v62 = vand.u32 2147483647, %v1011_v16  ;;  %v1596_v58 = vshrl.u32 %v1591_v1, 16  ;;  %v1607_v52 = vmul.u32 %v4810_v5, %v1553_v17  ;;  %v591_v35 = vand.u32 8388607, %v6309_v59 }
 0x1d5   : > { %v1605_v30 = vadd.s32 %v1604_v3, %v1594_v44  ;;  %vm1609_vm14 = vc.u32 %v4882_v53, %v4894_v63  ;;  %v605_v6 = vshrl.u32 %v6361_v29, %v6393_v56  ;;  %v602_v20 = vshrl.u32 %v6360_v40, %v6393_v56 }
 0x1d6   : > { %v1015_v23 = vmul.f32 %v1014_v41, %v1012_v62  ;;  %v604_v0 = vshll.u32 %v6360_v40, %v6394_v22  ;;  %v608_v5 = vshrl.u32 %v6347_v4, %v6393_v56  ;;  %v607_v12 = vshll.u32 %v6361_v29, %v6394_v22  ;;  %v6395_v62 = vld [vmem:[#allocation34_spill] sm:$0xff] }
 0x1d7   : > { %v1606_v1 = vadd.s32 %v1605_v30, %v1596_v58  ;;  %v610_v15 = vshll.u32 %v6347_v4, %v6394_v22  ;;  %v611_v34 = vshrl.u32 %v6349_v24, %v6393_v56  ;;  %vm2279_vm8 = vcmp.gt.s32.totalorder %v4886_v38, 0 }
 0x1d8   : > { %v1016_v49 = vxor.u32 2147483648, %v1015_v23  ;;  %v601_v50 = vshll.u32 %v6359_v43, %v6394_v22  ;;  %v613_v27 = vshll.u32 %v6349_v24, %v6394_v22  ;;  %v614_v13 = vshrl.u32 %v6350_v7, %v6393_v56 }
 0x1d9   : > { %v1610_v39 = vadd.s32 1, %v1606_v1  ;;  %v606_v28 = vor.u32 %v605_v6, %v604_v0  ;;  %v609_v32 = vor.u32 %v608_v5, %v607_v12  ;;  %v612_v31 = vor.u32 %v611_v34, %v610_v15 }
 0x1da   : > { %v1017_v17 = vsel %vm896_vm4, %v1016_v49, %v1015_v23  ;;  %v592_v48 = vor.u32 8388608, %v591_v35  ;;  %v600_v46 = vshrl.u32 %v6359_v43, %v6393_v56  ;;  %v615_v16 = vor.u32 %v614_v13, %v613_v27 }
 0x1db   : > { %v4929_v37 = vsel %vm4824_vm3, %v3678_v21, %v1017_v17  ;;  %v1611_v44 = vsel %vm1609_vm14, %v1610_v39, %v1606_v1  ;;  %v603_v3 = vor.u32 %v602_v20, %v601_v50  ;;  %vm619_vm13 = vcmp.lt.s32.totalorder %v6395_v62, 4 }
 0x1dc   : > { %v1022_v41 = vmul.f32 %v4929_v37, %v4929_v37  ;;  %v1612_v58 = vadd.s32 %v1611_v44, %v1607_v52  ;;  %vm616_vm4 = vcmp.lt.s32.totalorder %v6395_v62, 1  ;;  %v625_v30 = vsel %vm619_vm13, %v612_v31, 920167782 }
 0x1dd   : > { %vm617_vm5 = vcmp.lt.s32.totalorder %v6395_v62, 2  ;;  %v621_v35 = vsel %vm619_vm13, %v609_v32, 2102212464  ;;  %v628_v57 = vsel %vm616_vm4, %v606_v28, %v609_v32  ;;  %v629_v56 = vsel %vm619_vm13, %v615_v16, 1326507024 }
 0x1de   : > { %v1023_v6 = vmul.f32 -0.001358992, %v1022_v41  ;;  %v1030_v23 = vmul.f32 -0.00019511016, %v1022_v41  ;;  %v1613_v22 = vadd.s32 536870912, %v1612_v58  ;;  %vm618_vm3 = vcmp.lt.s32.totalorder %v6395_v62, 3 }
 0x1df   : > { %v624_v20 = vsel %vm616_vm4, %v603_v3, %v606_v28  ;;  %v626_v52 = vsel %vm618_vm3, %v609_v32, %v625_v30  ;;  %v630_v0 = vsel %vm618_vm3, %v612_v31, %v629_v56  ;;  %v4948_v5 = vshll.u32 %v592_v48, 8 }
 0x1e0   : > { %v1024_v1 = vadd.f32 0.041655596, %v1023_v6  ;;  %v1031_v12 = vadd.f32 0.008332121, %v1030_v23  ;;  %v4950_v15 = vshrl.u32 %v1613_v22, 30  ;;  %v631_v34 = vsel %vm617_vm5, %v628_v57, %v630_v0 }
 0x1e1   : > { %v633_v49 = vand.u32 65535, %v4948_v5  ;;  %v4956_v50 = vshrl.u32 %v4948_v5, 16  ;;  %v635_v27 = vand.u32 65535, %v631_v34  ;;  %v636_v13 = vshrl.u32 %v631_v34, 16 }
 0x1e2   : > { %v1025_v39 = vmul.f32 %v1024_v1, %v1022_v41  ;;  %v1032_v32 = vmul.f32 %v1031_v12, %v1022_v41  ;;  %v1615_v31 = vshll.u32 %v4950_v15, 30  ;;  %v627_v17 = vsel %vm617_vm5, %v624_v20, %v626_v52 }
 0x1e3   : > { %v4964_v48 = vsel %vm2279_vm8, %v4886_v38, 0  ;;  %v4967_v16 = vsub.s32 32, %v4889_v25  ;;  %v638_v44 = vmul.u32 %v636_v13, %v633_v49  ;;  %v4970_v30 = vmul.u32 %v635_v27, %v4956_v50 }
 0x1e4   : > { %v1026_v57 = vadd.f32 -0.4999988, %v1025_v39  ;;  %v1033_v56 = vadd.f32 -0.16666654, %v1032_v32  ;;  %v4972_v6 = vsub.s32 %v1612_v58, %v1615_v31  ;;  %v620_v23 = vsel %vm616_vm4, %v600_v46, %v603_v3 }
 0x1e5   : > { %v622_v22 = vsel %vm618_vm3, %v606_v28, %v621_v35  ;;  %v637_v20 = vmul.u32 %v635_v27, %v633_v49  ;;  %v641_v38 = vshll.u32 %v638_v44, 16  ;;  %v658_v52 = vshrl.u32 %v627_v17, 16 }
 0x1e6   : > { %v1027_v0 = vmul.f32 %v1026_v57, %v1022_v41  ;;  %v1034_v1 = vmul.f32 %v1033_v56, %v1022_v41  ;;  %vm1040_vm10 = vcmp.lt.s32.totalorder %v4892_v51, 2  ;;  %vm1617_vm9 = vcmp.lt.s32.totalorder %v4972_v6, 0 }
 0x1e7   : > { %v1618_v12 = vsub.s32 0, %v4972_v6  ;;  %vm1037_vm15 = vweird.f32 %v3678_v21  ;;  %vm1516_vm1 = vcmp.lt.s32.totalorder %v6386_v60, 0  ;;  %v640_v46 = vmul.u32 %v636_v13, %v4956_v50 }
 0x1e8   : > { %v643_v3 = vshll.u32 %v4970_v30, 16  ;;  %vm645_vm2 = vc.u32 %v637_v20, %v641_v38  ;;  %v647_v28 = vadd.s32 %v641_v38, %v637_v20  ;;  %v1028_v58 = vadd.f32 1.0, %v1027_v0 }
 0x1e9   : > { %v1035_v35 = vadd.f32 1.0, %v1034_v1  ;;  %v1619_v41 = vsel %vm1617_vm9, %v1618_v12, %v4972_v6  ;;  %v646_v34 = vsel %vm645_vm2, 1, %v6351_v11  ;;  %v657_v32 = vand.u32 65535, %v627_v17 }
 0x1ea   : > { %v1620_v27 = vclz %v1619_v41  ;;  %v648_v39 = vadd.s32 %v646_v34, %v640_v46  ;;  %vm649_vm7 = vc.u32 %v647_v28, %v643_v3  ;;  %vm1041_vm0 = vcmp.eq.s32.totalorder %v4892_v51, 0 }
 0x1eb   : > { %v1036_v31 = vmul.f32 %v1035_v35, %v4929_v37  ;;  %v1045_v57 = vxor.u32 2147483648, %v1028_v58  ;;  %v650_v13 = vsel %vm649_vm7, 1, %v6351_v11  ;;  %vm1044_vm14 = vcmp.eq.s32.totalorder %v4892_v51, 2 }
 0x1ec   : > { %v1608_v56 = vadd.s32 %v4894_v63, %v4882_v53  ;;  %v3262_v20 = vadd.s32 4294967294, %v1620_v27  ;;  %v4995_v38 = vsel %vm617_vm5, %v620_v23, %v622_v22  ;;  %v1638_v17 = vsub.s32 4, %v4950_v15 }
 0x1ed   : > { %v1042_v0 = vxor.u32 2147483648, %v1036_v31  ;;  %v652_v1 = vadd.s32 %v650_v13, %v648_v39  ;;  %v660_v37 = vmul.u32 %v658_v52, %v633_v49  ;;  %v1046_v12 = vsel %vm1044_vm14, %v1045_v57, %v1036_v31 }
 0x1ee   : > { %vm3263_vm8 = vcmp.lt.s32.totalorder %v3262_v20, 0  ;;  %v642_v46 = vshrl.u32 %v638_v44, 16  ;;  %v659_v3 = vmul.u32 %v657_v32, %v633_v49  ;;  %v661_v41 = vmul.u32 %v657_v32, %v4956_v50 }
 0x1ef   : > { %v1043_v28 = vsel %vm1041_vm0, %v1028_v58, %v1042_v0  ;;  %v1623_v35 = vsel %vm3263_vm8, 0, %v3262_v20  ;;  %v663_v34 = vshll.u32 %v660_v37, 16  ;;  %v5006_v27 = vsel %vm1516_vm1, %v1638_v17, %v4950_v15  ;;  %v6399_v20 = vld [vmem:[#allocation27_spill] sm:$0xff]  ;;  %v6400_v0 = vld [vmem:[#allocation32_spill] sm:$0xff] }
 0x1f0   : > { %v1047_v53 = vsel %vm1040_vm10, %v1043_v28, %v1046_v12  ;;  %v1624_v63 = vsub.s32 32, %v1623_v35  ;;  %v1628_v62 = vsub.s32 4294967266, %v1623_v35  ;;  %v653_v23 = vadd.s32 %v652_v1, %v642_v46 }
 0x1f1   : > { %v1048_v22 = vsel %vm1037_vm15, nan, %v1047_v53  ;;  %v644_v49 = vshrl.u32 %v4970_v30, 16  ;;  %v662_v44 = vmul.u32 %v658_v52, %v4956_v50  ;;  %v1625_v51 = vshll.u32 %v4972_v6, %v1623_v35  ;;  %v6398_v30 = vld [vmem:[#allocation10_spill] sm:$0xff] }
 0x1f2   : > { %3267 = vmatmul.msk.f32.gmra.mxu1 %vm1673_vm12, %v1048_v22  ;;  %v1626_v58 = vshrl.u32 %v1608_v56, %v1624_v63  ;;  %v1629_v39 = vadd.s32 127, %v1628_v62  ;;  %vm667_vm13 = vc.u32 %v659_v3, %v663_v34  ;;  %vm5014_vm4 = vcmp.le.f32.partialorder %v1514_v55, 0.7853982 }
 0x1f3   : > { %v665_v32 = vshll.u32 %v661_v41, 16  ;;  %v668_v15 = vsel %vm667_vm13, 1, %v6351_v11  ;;  %v669_v31 = vadd.s32 %v663_v34, %v659_v3  ;;  %v6308_v57 = vand.u32 2147483647, %v6398_v30 }
 0x1f4   : > { %v1627_v50 = vor.u32 %v1626_v58, %v1625_v51  ;;  %v1630_v52 = vshll.u32 %v1629_v39, 23  ;;  %v5020_v13 = vadd.s32 %v653_v23, %v644_v49  ;;  %v670_v6 = vadd.s32 %v668_v15, %v662_v44  ;;  %v6401_v51 = vld [vmem:[#allocation31_spill] sm:$0xff] }
 0x1f5   : > { %vm671_vm5 = vc.u32 %v669_v31, %v665_v32  ;;  %v2430_v56 = vand.u32 8388607, %v6308_v57  ;;  %v2440_v55 = vshll.u32 %v6359_v43, %v6399_v20  ;;  %v2441_v17 = vshrl.u32 %v6360_v40, %v6400_v0 }
 0x1f6   : > { %v1631_v1 = vor.u32 4788187, %v1630_v52  ;;  %v664_v12 = vshrl.u32 %v660_v37, 16  ;;  %v672_v46 = vsel %vm671_vm5, 1, %v6351_v11  ;;  %v2443_v3 = vshll.u32 %v6360_v40, %v6399_v20 }
 0x1f7   : > { %v666_v28 = vshrl.u32 %v661_v41, 16  ;;  %v5031_v35 = vadd.s32 %v669_v31, %v665_v32  ;;  %v674_v34 = vadd.s32 %v672_v46, %v670_v6  ;;  %v2431_v53 = vor.u32 8388608, %v2430_v56  ;;  %v6402_v31 = vld [vmem:[#allocation41_spill] sm:$0xff] }
 0x1f8   : > { %v1632_v63 = vand.u32 2147483647, %v1631_v1  ;;  %v1634_v62 = vcvt.s32.f32 %v1627_v50  ;;  %v2444_v23 = vshrl.u32 %v6361_v29, %v6400_v0  ;;  %v2446_v22 = vshll.u32 %v6361_v29, %v6399_v20  ;;  %v6403_v50 = vld [vmem:[#allocation38_spill] sm:$0xff] }
 0x1f9   : > { %v675_v49 = vadd.s32 %v674_v34, %v664_v12  ;;  %v5037_v37 = vor.u32 %v2441_v17, %v2440_v55  ;;  %v2447_v44 = vshrl.u32 %v6347_v4, %v6400_v0  ;;  %vm2455_vm3 = vcmp.lt.s32.totalorder %v6401_v51, 1  ;;  %v6404_v34 = vld [vmem:[#allocation40_spill] sm:$0xff] }
 0x1fa   : > { %v1635_v41 = vmul.f32 %v1634_v62, %v1632_v63  ;;  %v5042_v58 = vor.u32 %v2444_v23, %v2443_v3  ;;  %vm2457_vm10 = vcmp.lt.s32.totalorder %v6401_v51, 3  ;;  %v5045_v39 = vshll.u32 %v2431_v53, 8 }
 0x1fb   : > { %v676_v32 = vadd.s32 %v675_v49, %v666_v28  ;;  %v2448_v15 = vor.u32 %v2447_v44, %v2446_v22  ;;  %vm2456_vm9 = vcmp.lt.s32.totalorder %v6401_v51, 2  ;;  %v2469_v52 = vsel %vm2457_vm10, %v6403_v50, %v6402_v31 }
 0x1fc   : > { %v5054_v6 = vshll.u32 %v6349_v24, %v4889_v25  ;;  %v1636_v56 = vxor.u32 2147483648, %v1635_v41  ;;  %v1641_v20 = vsel %vm5014_vm4, 0, %v5006_v27  ;;  %vm679_vm15 = vc.u32 %v5020_v13, %v5031_v35 }
 0x1fd   : > { %v677_v55 = vmul.u32 %v4948_v5, %v4995_v38  ;;  %v680_v17 = vadd.s32 1, %v676_v32  ;;  %v2467_v1 = vsel %vm2455_vm3, %v5042_v58, %v2448_v15  ;;  %v5067_v12 = vshrl.u32 %v5045_v39, 16 }
 0x1fe   : > { %v1637_v46 = vsel %vm1516_vm1, %v1636_v56, %v1635_v41  ;;  %v2463_v27 = vsel %vm2455_vm3, %v5037_v37, %v5042_v58  ;;  %v2470_v3 = vsel %vm2456_vm9, %v2467_v1, %v2469_v52  ;;  %v2472_v5 = vand.u32 65535, %v5045_v39 }
 0x1ff   : > { %v5081_v38 = vsel %vm5014_vm4, %v6386_v60, %v1637_v46  ;;  %v681_v28 = vsel %vm679_vm15, %v680_v17, %v676_v32  ;;  %v2465_v53 = vsel %vm2457_vm10, %v2448_v15, %v6404_v34  ;;  %v2474_v63 = vand.u32 65535, %v2470_v3 }
 0x200   : > { %v5088_v62 = vshrl.u32 %v6350_v7, %v4967_v16  ;;  %v1642_v23 = vmul.f32 %v5081_v38, %v5081_v38  ;;  %v682_v22 = vadd.s32 %v681_v28, %v677_v55  ;;  %v2475_v49 = vshrl.u32 %v2470_v3, 16 }
 0x201   : > { %v5093_v44 = vand.u32 31, %v4964_v48  ;;  %v5096_v21 = vshrl.u32 %v4744_v8, 5  ;;  %v1658_v41 = vadd.s32 3, %v1641_v20  ;;  %v5099_v32 = vmul.u32 %v2474_v63, %v5067_v12 }
 0x202   : > { %v1643_v31 = vmul.f32 -0.001358992, %v1642_v23  ;;  %v1650_v50 = vmul.f32 -0.00019511016, %v1642_v23  ;;  %v683_v52 = vadd.s32 536870912, %v682_v22  ;;  %v2466_v56 = vsel %vm2456_vm9, %v2463_v27, %v2465_v53 }
 0x203   : > { %v5105_v55 = vshll.u32 %v6347_v4, %v4889_v25  ;;  %v5109_v17 = vshrl.u32 %v6349_v24, %v4967_v16  ;;  %v2476_v8 = vmul.u32 %v2474_v63, %v2472_v5  ;;  %v5111_v1 = vmul.u32 %v2475_v49, %v2472_v5 }
 0x204   : > { %v1644_v46 = vadd.f32 0.041655596, %v1643_v31  ;;  %v1651_v3 = vadd.f32 0.008332121, %v1650_v50  ;;  %v5115_v28 = vshrl.u32 %v683_v52, 30  ;;  %v5117_v34 = vand.u32 3, %v1658_v41 }
 0x205   : > { %v2480_v27 = vshll.u32 %v5111_v1, 16  ;;  %v2482_v53 = vshll.u32 %v5099_v32, 16  ;;  %v2497_v57 = vshrl.u32 %v2466_v56, 16  ;;  %v2479_v47 = vmul.u32 %v2475_v49, %v5067_v12 }
 0x206   : > { %v1645_v59 = vmul.f32 %v1644_v46, %v1642_v23  ;;  %v1652_v61 = vmul.f32 %v1651_v3, %v1642_v23  ;;  %v685_v63 = vshll.u32 %v5115_v28, 30  ;;  %v2496_v50 = vand.u32 65535, %v2466_v56 }
 0x207   : > { %vm2484_vm1 = vc.u32 %v2476_v8, %v2480_v27  ;;  %v2486_v31 = vadd.s32 %v2480_v27, %v2476_v8  ;;  %v5126_v19 = vmul.u32 %v2497_v57, %v2472_v5  ;;  %vm1661_vm2 = vcmp.eq.s32.totalorder %v5117_v34, 0 }
 0x208   : > { %v1646_v52 = vadd.f32 -0.4999988, %v1645_v59  ;;  %v1653_v20 = vadd.f32 -0.16666654, %v1652_v61  ;;  %v5124_v41 = vsub.s32 %v682_v22, %v685_v63  ;;  %v2439_v46 = vshrl.u32 %v6359_v43, %v6400_v0 }
 0x209   : > { %v2460_v3 = vsel %vm2458_vm11, %v2448_v15, 2102212464  ;;  %v2485_v45 = vsel %vm2484_vm1, 1, %v6351_v11  ;;  %vm2488_vm7 = vc.u32 %v2486_v31, %v2482_v53  ;;  %vm1660_vm0 = vcmp.lt.s32.totalorder %v5117_v34, 2 }
 0x20a   : > { %v1647_v49 = vmul.f32 %v1646_v52, %v1642_v23  ;;  %v1654_v8 = vmul.f32 %v1653_v20, %v1642_v23  ;;  %vm687_vm14 = vcmp.lt.s32.totalorder %v5124_v41, 0  ;;  %v688_v61 = vsub.s32 0, %v5124_v41 }
 0x20b   : > { %vm1657_vm8 = vweird.f32 %v6386_v60  ;;  %v2487_v59 = vadd.s32 %v2485_v45, %v2479_v47  ;;  %v2489_v22 = vsel %vm2488_vm7, 1, %v6351_v11  ;;  %v2498_v0 = vmul.u32 %v2496_v50, %v2472_v5 }
 0x20c   : > { %v5140_v56 = vmul.u32 %v2496_v50, %v5067_v12  ;;  %v1648_v15 = vadd.f32 1.0, %v1647_v49  ;;  %v1655_v27 = vadd.f32 1.0, %v1654_v8  ;;  %v689_v53 = vsel %vm687_vm14, %v688_v61, %v5124_v41 }
 0x20d   : > { %v2502_v23 = vshll.u32 %v5126_v19, 16  ;;  %vm1664_vm11 = vcmp.eq.s32.totalorder %v5117_v34, 2  ;;  %vm586_vm13 = vcmp.lt.s32.totalorder %v6392_v9, 0  ;;  %v678_v20 = vadd.s32 %v5031_v35, %v5020_v13 }
 0x20e   : > { %v690_v45 = vclz %v689_v53  ;;  %v6405_v47 = vand.u32 2147483647, %v4436_v26  ;;  %v1656_v63 = vmul.f32 %v1655_v27, %v5081_v38  ;;  %v1665_v31 = vxor.u32 2147483648, %v1648_v15 }
 0x20f   : > { %v2459_v50 = vsel %vm2455_vm3, %v2439_v46, %v5037_v37  ;;  %v2501_v52 = vmul.u32 %v2497_v57, %v5067_v12  ;;  %vm2768_vm4 = vcmp.lt.s32.totalorder %v5096_v21, 4  ;;  %v2461_v13 = vsel %vm2457_vm10, %v5042_v58, %v2460_v3 }
 0x210   : > { %v5150_v5 = vand.u32 8388607, %v6405_v47  ;;  %v3244_v49 = vadd.s32 4294967294, %v690_v45  ;;  %v2481_v35 = vshrl.u32 %v5111_v1, 16  ;;  %v2491_v8 = vadd.s32 %v2489_v22, %v2487_v59 }
 0x211   : > { %v1662_v61 = vxor.u32 2147483648, %v1656_v63  ;;  %v2483_v38 = vshrl.u32 %v5099_v32, 16  ;;  %v2504_v27 = vshll.u32 %v5140_v56, 16  ;;  %vm2506_vm5 = vc.u32 %v2498_v0, %v2502_v23 }
 0x212   : > { %vm3245_vm15 = vcmp.lt.s32.totalorder %v3244_v49, 0  ;;  %v708_v37 = vsub.s32 4, %v5115_v28  ;;  %v2507_v57 = vsel %vm2506_vm5, 1, %v6351_v11  ;;  %v2508_v12 = vadd.s32 %v2502_v23, %v2498_v0 }
 0x213   : > { %v1663_v46 = vsel %vm1661_vm2, %v1648_v15, %v1662_v61  ;;  %v1666_v58 = vsel %vm1664_vm11, %v1665_v31, %v1656_v63  ;;  %v693_v1 = vsel %vm3245_vm15, 0, %v3244_v49  ;;  %v2509_v3 = vadd.s32 %v2507_v57, %v2501_v52 }
 0x214   : > { %v1667_v32 = vsel %vm1660_vm0, %v1663_v46, %v1666_v58  ;;  %v694_v59 = vsub.s32 32, %v693_v1  ;;  %v698_v22 = vsub.s32 4294967266, %v693_v1  ;;  %v2492_v53 = vadd.s32 %v2491_v8, %v2481_v35 }
 0x215   : > { %v1668_v45 = vsel %vm1657_vm8, nan, %v1667_v32  ;;  %v2503_v47 = vshrl.u32 %v5126_v19, 16  ;;  %vm2510_vm3 = vc.u32 %v2508_v12, %v2504_v27  ;;  %v2750_v0 = vshll.u32 %v6359_v43, %v4889_v25 }
 0x216   : > { %3271 = vmatmul.msk.f32.gmra.mxu3 %vm1673_vm12, %v1668_v45  ;;  %v695_v15 = vshll.u32 %v5124_v41, %v693_v1  ;;  %v696_v23 = vshrl.u32 %v678_v20, %v694_v59  ;;  %v699_v63 = vadd.s32 127, %v698_v22  ;;  %v2511_v34 = vsel %vm2510_vm3, 1, %v6351_v11 }
 0x217   : > { %v709_v31 = vsel %vm586_vm13, %v708_v37, %v5115_v28  ;;  %v2462_v60 = vsel %vm2456_vm9, %v2459_v50, %v2461_v13  ;;  %v2505_v19 = vshrl.u32 %v5140_v56, 16  ;;  %v2513_v52 = vadd.s32 %v2511_v34, %v2509_v3 }
 0x218   : > { %v697_v49 = vor.u32 %v696_v23, %v695_v15  ;;  %v700_v35 = vshll.u32 %v699_v63, 23  ;;  %v2493_v8 = vadd.s32 %v2492_v53, %v2483_v38  ;;  %v2512_v61 = vadd.s32 %v2508_v12, %v2504_v27 }
 0x219   : > { %v2514_v57 = vadd.s32 %v2513_v52, %v2503_v47  ;;  %v2751_v41 = vshrl.u32 %v6360_v40, %v4967_v16  ;;  %v2753_v20 = vshll.u32 %v6360_v40, %v4889_v25  ;;  %v2754_v28 = vshrl.u32 %v6361_v29, %v4967_v16 }
 0x21a   : > { %v2761_v51 = vor.u32 %v5109_v17, %v5105_v55  ;;  %v6406_v56 = vand.u32 2147483647, %v6392_v9  ;;  %v701_v13 = vor.u32 4788187, %v700_v35  ;;  %v2756_v38 = vshll.u32 %v6361_v29, %v4889_v25 }
 0x21b   : > { %v6409_v27 = vor.u32 %v5088_v62, %v5054_v6  ;;  %v2516_v55 = vmul.u32 %v5045_v39, %v2462_v60  ;;  %v2741_v17 = vor.u32 8388608, %v5150_v5  ;;  %v704_v58 = vcvt.s32.f32 %v697_v49 }
 0x21c   : > { %vm5196_vm10 = vcmp.le.f32.partialorder %v6406_v56, 0.7853982  ;;  %v702_v46 = vand.u32 2147483647, %v701_v13  ;;  %v2515_v1 = vadd.s32 %v2514_v57, %v2505_v19  ;;  %v2757_v3 = vshrl.u32 %v6347_v4, %v4967_v16 }
 0x21d   : > { %v2778_v37 = vsel %vm2768_vm4, %v6409_v27, 1326507024  ;;  %v711_v12 = vsel %vm5196_vm10, 0, %v709_v31  ;;  %vm2518_vm9 = vc.u32 %v2493_v8, %v2512_v61  ;;  %v2752_v25 = vor.u32 %v2751_v41, %v2750_v0 }
 0x21e   : > { %v5213_v32 = vor.u32 %v2754_v28, %v2753_v20  ;;  %vm2767_vm1 = vcmp.lt.s32.totalorder %v5096_v21, 3  ;;  %v705_v6 = vmul.f32 %v704_v58, %v702_v46  ;;  %v2519_v62 = vadd.s32 1, %v2515_v1 }
 0x21f   : > { %v2758_v59 = vor.u32 %v2757_v3, %v2756_v38  ;;  %vm2765_vm2 = vcmp.lt.s32.totalorder %v5096_v21, 1  ;;  %v5219_v39 = vor.u32 %v4737_v54, %v4580_v18  ;;  %v5223_v5 = vshrl.u32 %v6350_v7, %v4517_v2 }
 0x220   : > { %v2774_v22 = vsel %vm2768_vm4, %v2761_v51, 920167782  ;;  %v5227_v53 = vshll.u32 %v2741_v17, 8  ;;  %v706_v45 = vxor.u32 2147483648, %v705_v6  ;;  %v2520_v47 = vsel %vm2518_vm9, %v2519_v62, %v2515_v1 }
 0x221   : > { %vm2766_vm7 = vcmp.lt.s32.totalorder %v5096_v21, 2  ;;  %v2779_v0 = vsel %vm2767_vm1, %v2761_v51, %v2778_v37  ;;  %v5233_v15 = vshrl.u32 %v4964_v48, 5  ;;  %v728_v18 = vadd.s32 3, %v711_v12 }
 0x222   : > { %v2521_v54 = vadd.s32 %v2520_v47, %v2516_v55  ;;  %v2777_v23 = vsel %vm2765_vm2, %v5213_v32, %v2758_v59  ;;  %v5239_v63 = vsub.s32 32, %v5093_v44  ;;  %v707_v34 = vsel %vm586_vm13, %v706_v45, %v705_v6 }
 0x223   : > { %v2773_v31 = vsel %vm2765_vm2, %v2752_v25, %v5213_v32  ;;  %v2775_v48 = vsel %vm2767_vm1, %v2758_v59, %v2774_v22  ;;  %v5251_v60 = vsel %vm5196_vm10, %v6392_v9, %v707_v34  ;;  %v2780_v52 = vsel %vm2766_vm7, %v2777_v23, %v2779_v0 }
 0x224   : > { %v2522_v19 = vadd.s32 536870912, %v2521_v54  ;;  %v2782_v49 = vand.u32 65535, %v5227_v53  ;;  %v712_v35 = vmul.f32 %v5251_v60, %v5251_v60  ;;  %v2783_v57 = vshrl.u32 %v5227_v53, 16 }
 0x225   : > { %v2784_v41 = vand.u32 65535, %v2780_v52  ;;  %v2785_v20 = vshrl.u32 %v2780_v52, 16  ;;  %v5259_v28 = vand.u32 3, %v728_v18  ;;  %v2749_v56 = vshrl.u32 %v6359_v43, %v4967_v16 }
 0x226   : > { %v5261_v51 = vshrl.u32 %v2522_v19, 30  ;;  %v2776_v50 = vsel %vm2766_vm7, %v2773_v31, %v2775_v48  ;;  %v713_v13 = vmul.f32 -0.001358992, %v712_v35  ;;  %v720_v38 = vmul.f32 -0.00019511016, %v712_v35 }
 0x227   : > { %v2786_v27 = vmul.u32 %v2784_v41, %v2782_v49  ;;  %v5267_v37 = vmul.u32 %v2785_v20, %v2782_v49  ;;  %v5269_v12 = vadd.s32 %v2512_v61, %v2493_v8  ;;  %v5272_v17 = vmul.u32 %v2784_v41, %v2783_v57 }
 0x228   : > { %v2524_v55 = vshll.u32 %v5261_v51, 30  ;;  %v2806_v46 = vand.u32 65535, %v2776_v50  ;;  %v714_v58 = vadd.f32 0.041655596, %v713_v13  ;;  %v721_v1 = vadd.f32 0.008332121, %v720_v38 }
 0x229   : > { %v2789_v3 = vmul.u32 %v2785_v20, %v2783_v57  ;;  %v2790_v16 = vshll.u32 %v5267_v37, 16  ;;  %v2769_v62 = vsel %vm2765_vm2, %v2749_v56, %v2752_v25  ;;  %v2792_v22 = vshll.u32 %v5272_v17, 16 }
 0x22a   : > { %v5275_v6 = vsub.s32 %v2521_v54, %v2524_v55  ;;  %v2807_v45 = vshrl.u32 %v2776_v50, 16  ;;  %v715_v8 = vmul.f32 %v714_v58, %v712_v35  ;;  %v722_v61 = vmul.f32 %v721_v1, %v712_v35 }
 0x22b   : > { %v2770_v47 = vsel %vm2768_vm4, %v2758_v59, 2102212464  ;;  %vm2794_vm0 = vc.u32 %v2786_v27, %v2790_v16  ;;  %v2796_v54 = vadd.s32 %v2790_v16, %v2786_v27  ;;  %v2808_v25 = vmul.u32 %v2806_v46, %v2782_v49  ;;  %v6410_v27 = vld [vmem:[#allocation7_spill] sm:$0xff] }
 0x22c   : > { %vm2526_vm14 = vcmp.lt.s32.totalorder %v5275_v6, 0  ;;  %v2527_v0 = vsub.s32 0, %v5275_v6  ;;  %v2795_v18 = vsel %vm2794_vm0, 1, %v6351_v11  ;;  %v716_v23 = vadd.f32 -0.4999988, %v715_v8 }
 0x22d   : > { %v723_v34 = vadd.f32 -0.16666654, %v722_v61  ;;  %v2797_v31 = vadd.s32 %v2795_v18, %v2789_v3  ;;  %vm731_vm8 = vcmp.eq.s32.totalorder %v5259_v28, 0  ;;  %vm734_vm11 = vcmp.eq.s32.totalorder %v5259_v28, 2  ;;  %v6412_v18 = vld [vmem:[#allocation15_spill] sm:$0xff] }
 0x22e   : > { %v2528_v48 = vsel %vm2526_vm14, %v2527_v0, %v5275_v6  ;;  %vm2798_vm13 = vc.u32 %v2796_v54, %v2792_v22  ;;  %v2809_v59 = vmul.u32 %v2807_v45, %v2782_v49  ;;  %v5288_v19 = vmul.u32 %v2806_v46, %v2783_v57 }
 0x22f   : > { %v717_v52 = vmul.f32 %v716_v23, %v712_v35  ;;  %v724_v41 = vmul.f32 %v723_v34, %v712_v35  ;;  %vm730_vm4 = vcmp.lt.s32.totalorder %v5259_v28, 2  ;;  %v2529_v20 = vclz %v2528_v48 }
 0x230   : > { %v2799_v56 = vsel %vm2798_vm13, 1, %v6351_v11  ;;  %vm727_vm5 = vweird.f32 %v6392_v9  ;;  %v2771_v50 = vsel %vm2767_vm1, %v5213_v32, %v2770_v47  ;;  %v2791_v13 = vshrl.u32 %v5267_v37, 16  ;;  %v6411_v47 = vld [vmem:[#allocation13_spill] sm:$0xff] }
 0x231   : > { %v2812_v38 = vshll.u32 %v2809_v59, 16  ;;  %v1803_v49 = vand.u32 2147483647, %v6410_v27  ;;  %v718_v55 = vadd.f32 1.0, %v717_v52  ;;  %v725_v46 = vadd.f32 1.0, %v724_v41 }
 0x232   : > { %v3285_v58 = vadd.s32 4294967294, %v2529_v20  ;;  %v2801_v35 = vadd.s32 %v2799_v56, %v2797_v31  ;;  %vm2425_vm15 = vcmp.lt.s32.totalorder %v6398_v30, 0  ;;  %v2811_v1 = vmul.u32 %v2807_v45, %v2783_v57 }
 0x233   : > { %v2814_v3 = vshll.u32 %v5288_v19, 16  ;;  %vm2816_vm3 = vc.u32 %v2808_v25, %v2812_v38  ;;  %v2818_v16 = vadd.s32 %v2812_v38, %v2808_v25  ;;  %v726_v22 = vmul.f32 %v725_v46, %v5251_v60 }
 0x234   : > { %v735_v8 = vxor.u32 2147483648, %v718_v55  ;;  %vm3286_vm10 = vcmp.lt.s32.totalorder %v3285_v58, 0  ;;  %v2817_v32 = vsel %vm2816_vm3, 1, %v6351_v11  ;;  %v5304_v61 = vsel %vm2766_vm7, %v2769_v62, %v2771_v50 }
 0x235   : > { %v2532_v37 = vsel %vm3286_vm10, 0, %v3285_v58  ;;  %v1820_v0 = vshll.u32 %v6359_v43, %v6411_v47  ;;  %v1821_v57 = vshrl.u32 %v6360_v40, %v6412_v18  ;;  %v732_v45 = vxor.u32 2147483648, %v726_v22 }
 0x236   : > { %v2533_v54 = vsub.s32 32, %v2532_v37  ;;  %v2534_v23 = vshll.u32 %v5275_v6, %v2532_v37  ;;  %v2547_v60 = vsub.s32 4, %v5261_v51  ;;  %v2537_v34 = vsub.s32 4294967266, %v2532_v37  ;;  %v6416_v37 = vld [vmem:[#allocation21_spill] sm:$0xff] }
 0x237   : > { %v2793_v31 = vshrl.u32 %v5272_v17, 16  ;;  %v2802_v25 = vadd.s32 %v2801_v35, %v2791_v13  ;;  %v2819_v48 = vadd.s32 %v2817_v32, %v2811_v1  ;;  %v733_v21 = vsel %vm731_vm8, %v718_v55, %v732_v45 }
 0x238   : > { %v736_v62 = vsel %vm734_vm11, %v735_v8, %v726_v22  ;;  %v6413_v52 = vand.u32 2147483647, %v6398_v30  ;;  %v2535_v6 = vshrl.u32 %v5269_v12, %v2533_v54  ;;  %vm2820_vm1 = vc.u32 %v2818_v16, %v2814_v3 }
 0x239   : > { %v737_v17 = vsel %vm730_vm4, %v733_v21, %v736_v62  ;;  %v2538_v20 = vadd.s32 127, %v2537_v34  ;;  %v2813_v56 = vshrl.u32 %v2809_v59, 16  ;;  %v2826_v50 = vmul.u32 %v5227_v53, %v5304_v61  ;;  %v6418_v62 = vld [vmem:[#allocation28_spill] sm:$0xff] }
 0x23a   : > { %vm5319_vm9 = vcmp.le.f32.partialorder %v6413_v52, 0.7853982  ;;  %v738_v13 = vsel %vm727_vm5, nan, %v737_v17  ;;  %v2536_v38 = vor.u32 %v2535_v6, %v2534_v23  ;;  %v2815_v55 = vshrl.u32 %v5288_v19, 16  ;;  %v6419_v52 = vld [vmem:[#allocation23_spill] sm:$0xff] }
 0x23b   : > { %v2821_v46 = vsel %vm2820_vm1, 1, %v6351_v11  ;;  %3265 = vmatmul.msk.f32.gmra.mxu0 %vm1673_vm12, %v738_v13  ;;  %v2539_v12 = vshll.u32 %v2538_v20, 23  ;;  %v2803_v58 = vadd.s32 %v2802_v25, %v2793_v31  ;;  %v2822_v35 = vadd.s32 %v2818_v16, %v2814_v3  ;;  %v6417_v25 = vld [vmem:[#allocation26_spill] sm:$0xff] }
 0x23c   : > { %v2823_v28 = vadd.s32 %v2821_v46, %v2819_v48  ;;  %v2543_v1 = vcvt.s32.f32 %v2536_v38  ;;  %v2548_v59 = vsel %vm2425_vm15, %v2547_v60, %v5261_v51  ;;  %v1810_v9 = vand.u32 8388607, %v1803_v49 }
 0x23d   : > { %v5338_v53 = vor.u32 %v1821_v57, %v1820_v0  ;;  %v2540_v22 = vor.u32 4788187, %v2539_v12  ;;  %v1823_v8 = vshll.u32 %v6360_v40, %v6411_v47  ;;  %v1824_v32 = vshrl.u32 %v6361_v29, %v6412_v18 }
 0x23e   : > { %v2824_v19 = vadd.s32 %v2823_v28, %v2813_v56  ;;  %v1811_v3 = vor.u32 8388608, %v1810_v9  ;;  %v1826_v16 = vshll.u32 %v6361_v29, %v6411_v47  ;;  %v1827_v51 = vshrl.u32 %v6347_v4, %v6412_v18  ;;  %v5387_v28 = vpop.permute.xlu2 %3405 }
 0x23f   : > { %vm1835_vm12 = vcmp.lt.s32.totalorder %v6416_v37, 1  ;;  %v2541_v61 = vand.u32 2147483647, %v2540_v22  ;;  %vm2828_vm2 = vc.u32 %v2803_v58, %v2822_v35  ;;  %v5349_v57 = vor.u32 %v1824_v32, %v1823_v8 }
 0x240   : > { %v2825_v0 = vadd.s32 %v2824_v19, %v2815_v55  ;;  %v1828_v45 = vor.u32 %v1827_v51, %v1826_v16  ;;  %vm1836_vm7 = vcmp.lt.s32.totalorder %v6416_v37, 2  ;;  %vm1837_vm0 = vcmp.lt.s32.totalorder %v6416_v37, 3 }
 0x241   : > { %v5353_v54 = vshll.u32 %v1811_v3, 8  ;;  %v2544_v23 = vmul.f32 %v2543_v1, %v2541_v61  ;;  %v2550_v47 = vsel %vm5319_vm9, 0, %v2548_v59  ;;  %v1843_v34 = vsel %vm1835_vm12, %v5338_v53, %v5349_v57 }
 0x242   : > { %v2829_v60 = vadd.s32 1, %v2825_v0  ;;  %v5363_v31 = vshll.u32 %v6347_v4, %v5093_v44  ;;  %v1845_v48 = vsel %vm1837_vm0, %v1828_v45, %v6417_v25  ;;  %v1847_v21 = vsel %vm1835_vm12, %v5349_v57, %v1828_v45 }
 0x243   : > { %v1849_v6 = vsel %vm1837_vm0, %v6419_v52, %v6418_v62  ;;  %v5377_v17 = vshll.u32 %v6349_v24, %v5093_v44  ;;  %v2545_v20 = vxor.u32 2147483648, %v2544_v23  ;;  %v5382_v13 = vsel %vm1836_vm7, %v1843_v34, %v1845_v48 }
 0x244   : > { %v2830_v56 = vsel %vm2828_vm2, %v2829_v60, %v2825_v0  ;;  %v2567_v38 = vadd.s32 3, %v2550_v47  ;;  %v1850_v46 = vsel %vm1836_vm7, %v1847_v21, %v1849_v6  ;;  %v1852_v12 = vand.u32 65535, %v5353_v54 }
 0x245   : > { %v2831_v55 = vadd.s32 %v2830_v56, %v2826_v50  ;;  %v2546_v1 = vsel %vm2425_vm15, %v2545_v20, %v2544_v23  ;;  %v1853_v59 = vshrl.u32 %v5353_v54, 16  ;;  %v1854_v9 = vand.u32 65535, %v1850_v46 }
 0x246   : > { %v1855_v22 = vshrl.u32 %v1850_v46, 16  ;;  %v5394_v19 = vshrl.u32 %v6349_v24, %v5239_v63  ;;  %v5399_v50 = vsel %vm5319_vm9, %v6398_v30, %v2546_v1  ;;  %v1877_v32 = vshrl.u32 %v5382_v13, 16 }
 0x247   : > { %v2832_v8 = vadd.s32 536870912, %v2831_v55  ;;  %v2551_v3 = vmul.f32 %v5399_v50, %v5399_v50  ;;  %v1856_v16 = vmul.u32 %v1854_v9, %v1852_v12  ;;  %v5404_v61 = vmul.u32 %v1854_v9, %v1853_v59 }
 0x248   : > { %v1857_v51 = vmul.u32 %v1855_v22, %v1852_v12  ;;  %v3407_v0 = vunpack.i.l.bf16 %v5387_v28  ;;  %v5407_v23 = vand.u32 3, %v2567_v38  ;;  %v1876_v47 = vand.u32 65535, %v5382_v13 }
 0x249   : > { %v2833_v24 = vshrl.u32 %v2832_v8, 30  ;;  %v2552_v41 = vmul.f32 -0.001358992, %v2551_v3  ;;  %v2559_v60 = vmul.f32 -0.00019511016, %v2551_v3  ;;  %v1859_v34 = vmul.u32 %v1855_v22, %v1853_v59 }
 0x24a   : > { %v1860_v25 = vshll.u32 %v1857_v51, 16  ;;  %v5410_v48 = vadd.s32 %v2822_v35, %v2803_v58  ;;  %v1862_v62 = vshll.u32 %v5404_v61, 16  ;;  %v5413_v52 = vmul.u32 %v1877_v32, %v1852_v12 }
 0x24b   : > { %v2834_v21 = vshll.u32 %v2833_v24, 30  ;;  %v2553_v6 = vadd.f32 0.041655596, %v2552_v41  ;;  %v2560_v20 = vadd.f32 0.008332121, %v2559_v60  ;;  %vm2735_vm8 = vcmp.lt.s32.totalorder %v4436_v26, 0 }
 0x24c   : > { %vm1864_vm14 = vc.u32 %v1856_v16, %v1860_v25  ;;  %v1866_v56 = vadd.s32 %v1860_v25, %v1856_v16  ;;  %vm2573_vm11 = vcmp.eq.s32.totalorder %v5407_v23, 2  ;;  %v1819_v38 = vshrl.u32 %v6359_v43, %v6412_v18 }
 0x24d   : > { %v5417_v13 = vsub.s32 %v2831_v55, %v2834_v21  ;;  %v1865_v58 = vsel %vm1864_vm14, 1, %v6351_v11  ;;  %v5422_v35 = vmul.u32 %v1876_v47, %v1853_v59  ;;  %v2554_v46 = vmul.f32 %v2553_v6, %v2551_v3 }
 0x24e   : > { %v2561_v1 = vmul.f32 %v2560_v20, %v2551_v3  ;;  %v1840_v9 = vsel %vm1838_vm6, %v1828_v45, 2102212464  ;;  %v1867_v22 = vadd.s32 %v1865_v58, %v1859_v34  ;;  %vm2570_vm13 = vcmp.eq.s32.totalorder %v5407_v23, 0 }
 0x24f   : > { %vm2836_vm4 = vcmp.lt.s32.totalorder %v5417_v13, 0  ;;  %v2837_v55 = vsub.s32 0, %v5417_v13  ;;  %vm1868_vm5 = vc.u32 %v1866_v56, %v1862_v62  ;;  %v1878_v8 = vmul.u32 %v1876_v47, %v1852_v12 }
 0x250   : > { %v2555_v16 = vadd.f32 -0.4999988, %v2554_v46  ;;  %v2562_v18 = vadd.f32 -0.16666654, %v2561_v1  ;;  %vm2569_vm15 = vcmp.lt.s32.totalorder %v5407_v23, 2  ;;  %v1869_v41 = vsel %vm1868_vm5, 1, %v6351_v11 }
 0x251   : > { %v1882_v60 = vshll.u32 %v5413_v52, 16  ;;  %vm2566_vm3 = vweird.f32 %v6398_v30  ;;  %v2838_v45 = vsel %vm2836_vm4, %v2837_v55, %v5417_v13  ;;  %v1861_v34 = vshrl.u32 %v1857_v51, 16  ;;  %v6425_v30 = vld [vmem:[#allocation39_spill] sm:$0xff] }
 0x252   : > { %v1871_v25 = vadd.s32 %v1869_v41, %v1867_v22  ;;  %v1884_v21 = vshll.u32 %v5422_v35, 16  ;;  %v2556_v6 = vmul.f32 %v2555_v16, %v2551_v3  ;;  %v2563_v20 = vmul.f32 %v2562_v18, %v2551_v3 }
 0x253   : > { %v6420_v12 = vand.u32 2147483647, %v4436_v26  ;;  %v2839_v62 = vclz %v2838_v45  ;;  %v2857_v56 = vsub.s32 4, %v2833_v24  ;;  %v1839_v58 = vsel %vm1835_vm12, %v1819_v38, %v5338_v53 }
 0x254   : > { %v1881_v46 = vmul.u32 %v1877_v32, %v1853_v59  ;;  %vm1886_vm10 = vc.u32 %v1878_v8, %v1882_v60  ;;  %v1888_v51 = vadd.s32 %v1882_v60, %v1878_v8  ;;  %v2557_v1 = vadd.f32 1.0, %v2556_v6 }
 0x255   : > { %vm5437_vm6 = vcmp.le.f32.partialorder %v6420_v12, 0.7853982  ;;  %v2564_v22 = vadd.f32 1.0, %v2563_v20  ;;  %v3291_v55 = vadd.s32 4294967294, %v2839_v62  ;;  %v1841_v3 = vsel %vm1837_vm0, %v5349_v57, %v1840_v9 }
 0x256   : > { %v1863_v16 = vshrl.u32 %v5404_v61, 16  ;;  %v1872_v18 = vadd.s32 %v1871_v25, %v1861_v34  ;;  %v1887_v41 = vsel %vm1886_vm10, 1, %v6351_v11  ;;  %vm1890_vm9 = vc.u32 %v1888_v51, %v1884_v21 }
 0x257   : > { %v2565_v45 = vmul.f32 %v2564_v22, %v5399_v50  ;;  %v2574_v53 = vxor.u32 2147483648, %v2557_v1  ;;  %vm3292_vm1 = vcmp.lt.s32.totalorder %v3291_v55, 0  ;;  %v2858_v59 = vsel %vm2735_vm8, %v2857_v56, %v2833_v24 }
 0x258   : > { %v2842_v32 = vsel %vm3292_vm1, 0, %v3291_v55  ;;  %v1883_v38 = vshrl.u32 %v5413_v52, 16  ;;  %v1889_v8 = vadd.s32 %v1887_v41, %v1881_v46  ;;  %v1891_v57 = vsel %vm1890_vm9, 1, %v6351_v11 }
 0x259   : > { %v2571_v61 = vxor.u32 2147483648, %v2565_v45  ;;  %v2575_v9 = vsel %vm2573_vm11, %v2574_v53, %v2565_v45  ;;  %v2843_v60 = vsub.s32 32, %v2842_v32  ;;  %v2844_v50 = vshll.u32 %v5417_v13, %v2842_v32 }
 0x25a   : > { %v2847_v34 = vsub.s32 4294967266, %v2842_v32  ;;  %v1842_v25 = vsel %vm1836_vm7, %v1839_v58, %v1841_v3  ;;  %v5460_v24 = vadd.s32 %v1872_v18, %v1863_v16  ;;  %v1885_v52 = vshrl.u32 %v5422_v35, 16  ;;  %v6423_v58 = vld [vmem:[#allocation8_spill] sm:$0xff]  ;;  %v1727_v35 = vpop.f32.mrf.mxu2  ;;  %v6424_v3 = vld [vmem:[#allocation37_spill] sm:$0xff]  ;;  %v5484_v18 = vpop.permute.xlu0 %3395 }
 0x25b   : > { %v2572_v6 = vsel %vm2570_vm13, %v2557_v1, %v2571_v61  ;;  %v2845_v20 = vshrl.u32 %v5410_v48, %v2843_v60  ;;  %v5466_v12 = vadd.s32 %v1888_v51, %v1884_v21  ;;  %v1893_v62 = vadd.s32 %v1891_v57, %v1889_v8 }
 0x25c   : > { %v2576_v13 = vsel %vm2569_vm15, %v2572_v6, %v2575_v9  ;;  %v2848_v56 = vadd.s32 127, %v2847_v34  ;;  %v2860_v37 = vsel %vm5437_vm6, 0, %v2858_v59  ;;  %v6313_v46 = vand.u32 2147483647, %v6423_v58  ;;  %v6426_v34 = vld [vmem:[#allocation36_spill] sm:$0xff] }
 0x25d   : > { %v2577_v1 = vsel %vm2566_vm3, nan, %v2576_v13  ;;  %v2846_v22 = vor.u32 %v2845_v20, %v2844_v50  ;;  %v1894_v48 = vadd.s32 %v1893_v62, %v1883_v38  ;;  %v1896_v21 = vmul.u32 %v5353_v54, %v1842_v25  ;;  %v6427_v13 = vld [vmem:[#allocation46_spill] sm:$0xff] }
 0x25e   : > { %v3127_v51 = vmul.f32 %v3407_v0, %v2577_v1  ;;  %v2849_v55 = vshll.u32 %v2848_v56, 23  ;;  %v2585_v23 = vand.u32 8388607, %v6313_v46  ;;  %v2595_v16 = vshll.u32 %v6359_v43, %v6424_v3  ;;  %v6428_v56 = vld [vmem:[#allocation42_spill] sm:$0xff] }
 0x25f   : > { %v1895_v41 = vadd.s32 %v1894_v48, %v1885_v52  ;;  %vm1898_vm12 = vc.u32 %v5460_v24, %v5466_v12  ;;  %v2596_v45 = vshrl.u32 %v6360_v40, %v6425_v30  ;;  %v2598_v54 = vshll.u32 %v6360_v40, %v6424_v3 }
 0x260   : > { %v3135_v0 = vmul.f32 %v3127_v51, %v1727_v35  ;;  %v2850_v53 = vor.u32 4788187, %v2849_v55  ;;  %v2853_v59 = vcvt.s32.f32 %v2846_v22  ;;  %v2599_v32 = vshrl.u32 %v6361_v29, %v6425_v30 }
 0x261   : > { %v1899_v38 = vadd.s32 1, %v1895_v41  ;;  %v2586_v8 = vor.u32 8388608, %v2585_v23  ;;  %v2601_v57 = vshll.u32 %v6361_v29, %v6424_v3  ;;  %v2602_v61 = vshrl.u32 %v6347_v4, %v6425_v30 }
 0x262   : > { %3143 = vst [vmem:[%s5498_s26 + $0x20] sm:$0xff] %v3135_v0  ;;  %v2851_v9 = vand.u32 2147483647, %v2850_v53  ;;  %v2597_v60 = vor.u32 %v2596_v45, %v2595_v16  ;;  %v2600_v50 = vor.u32 %v2599_v32, %v2598_v54  ;;  %vm2610_vm2 = vcmp.lt.s32.totalorder %v6426_v34, 1  ;;  %v6430_v16 = vld [vmem:[#allocation45_spill] sm:$0xff] }
 0x263   : > { %v5504_v25 = vshrl.u32 %v6350_v7, %v5239_v63  ;;  %v1900_v52 = vsel %vm1898_vm12, %v1899_v38, %v1895_v41  ;;  %v2603_v6 = vor.u32 %v2602_v61, %v2601_v57  ;;  %vm2612_vm7 = vcmp.lt.s32.totalorder %v6426_v34, 3  ;;  %v5540_v38 = vpop.permute.xlu0 %3410 }
 0x264   : > { %v2854_v20 = vmul.f32 %v2853_v59, %v2851_v9  ;;  %v1901_v62 = vadd.s32 %v1900_v52, %v1896_v21  ;;  %vm2611_vm0 = vcmp.lt.s32.totalorder %v6426_v34, 2  ;;  %v2624_v35 = vsel %vm2612_vm7, %v6428_v56, %v6427_v13 }
 0x265   : > { %v2877_v1 = vadd.s32 3, %v2860_v37  ;;  %v2594_v22 = vshrl.u32 %v6359_v43, %v6425_v30  ;;  %v2622_v48 = vsel %vm2610_vm2, %v2600_v50, %v2603_v6  ;;  %v5519_v51 = vshll.u32 %v2586_v8, 8 }
 0x266   : > { %v2855_v55 = vxor.u32 2147483648, %v2854_v20  ;;  %v1902_v23 = vadd.s32 536870912, %v1901_v62  ;;  %vm6429_vm14 = vcmp.lt.s32.totalorder %v6426_v34, 4  ;;  %v2618_v3 = vsel %vm2610_vm2, %v2597_v60, %v2600_v50 }
 0x267   : > { %v2615_v21 = vsel %vm6429_vm14, %v2603_v6, 2102212464  ;;  %v2620_v37 = vsel %vm2612_vm7, %v2603_v6, %v6430_v16  ;;  %v2625_v41 = vsel %vm2611_vm0, %v2622_v48, %v2624_v35  ;;  %v2627_v30 = vand.u32 65535, %v5519_v51 }
 0x268   : > { %v5532_v45 = vshrl.u32 %v5519_v51, 16  ;;  %v2856_v54 = vsel %vm2735_vm8, %v2855_v55, %v2854_v20  ;;  %v1903_v0 = vshrl.u32 %v1902_v23, 30  ;;  %v2629_v53 = vand.u32 65535, %v2625_v41 }
 0x269   : > { %v2630_v59 = vshrl.u32 %v2625_v41, 16  ;;  %v5538_v32 = vor.u32 %v5394_v19, %v5363_v31  ;;  %v5545_v8 = vsel %vm5437_vm6, %v4436_v26, %v2856_v54  ;;  %v2614_v57 = vsel %vm2610_vm2, %v2594_v22, %v2597_v60 }
 0x26a   : > { %v2616_v61 = vsel %vm2612_vm7, %v2600_v50, %v2615_v21  ;;  %v3412_v9 = vunpack.i.l.bf16 %v5540_v38  ;;  %v2861_v52 = vmul.f32 %v5545_v8, %v5545_v8  ;;  %v1904_v31 = vshll.u32 %v1903_v0, 30 }
 0x26b   : > { %v2621_v19 = vsel %vm2611_vm0, %v2618_v3, %v2620_v37  ;;  %vm1805_vm8 = vcmp.lt.s32.totalorder %v6410_v27, 0  ;;  %v5557_v47 = vand.u32 3, %v2877_v1  ;;  %v2631_v6 = vmul.u32 %v2629_v53, %v2627_v30 }
 0x26c   : > { %v5559_v20 = vmul.u32 %v2630_v59, %v2627_v30  ;;  %v5562_v60 = vmul.u32 %v2629_v53, %v5532_v45  ;;  %v2862_v50 = vmul.f32 -0.001358992, %v2861_v52  ;;  %v2869_v13 = vmul.f32 -0.00019511016, %v2861_v52 }
 0x26d   : > { %v5564_v56 = vsub.s32 %v1901_v62, %v1904_v31  ;;  %v5568_v35 = vsel %vm2611_vm0, %v2614_v57, %v2616_v61  ;;  %v2634_v22 = vmul.u32 %v2630_v59, %v5532_v45  ;;  %v2652_v55 = vshrl.u32 %v2621_v19, 16 }
 0x26e   : > { %v2635_v48 = vshll.u32 %v5559_v20, 16  ;;  %v2637_v1 = vshll.u32 %v5562_v60, 16  ;;  %v2863_v23 = vadd.f32 0.041655596, %v2862_v50  ;;  %v2870_v21 = vadd.f32 0.008332121, %v2869_v13 }
 0x26f   : > { %vm5575_vm11 = vcmp.le.f32.partialorder %v1803_v49, 0.7853982  ;;  %vm1906_vm13 = vcmp.lt.s32.totalorder %v5564_v56, 0  ;;  %v1907_v34 = vsub.s32 0, %v5564_v56  ;;  %v1927_v62 = vsub.s32 4, %v1903_v0 }
 0x270   : > { %vm2639_vm4 = vc.u32 %v2631_v6, %v2635_v48  ;;  %v2641_v16 = vadd.s32 %v2635_v48, %v2631_v6  ;;  %v2651_v37 = vand.u32 65535, %v2621_v19  ;;  %v2864_v41 = vmul.f32 %v2863_v23, %v2861_v52 }
 0x271   : > { %v2871_v54 = vmul.f32 %v2870_v21, %v2861_v52  ;;  %v1908_v53 = vsel %vm1906_vm13, %v1907_v34, %v5564_v56  ;;  %v2640_v59 = vsel %vm2639_vm4, 1, %v6351_v11  ;;  %vm2880_vm5 = vcmp.eq.s32.totalorder %v5557_v47, 0 }
 0x272   : > { %v1909_v49 = vclz %v1908_v53  ;;  %v2642_v57 = vadd.s32 %v2640_v59, %v2634_v22  ;;  %vm2643_vm15 = vc.u32 %v2641_v16, %v2637_v1  ;;  %v2865_v61 = vadd.f32 -0.4999988, %v2864_v41 }
 0x273   : > { %v2872_v31 = vadd.f32 -0.16666654, %v2871_v54  ;;  %vm2879_vm3 = vcmp.lt.s32.totalorder %v5557_v47, 2  ;;  %v2644_v50 = vsel %vm2643_vm15, 1, %v6351_v11  ;;  %v2654_v13 = vmul.u32 %v2652_v55, %v2627_v30 }
 0x274   : > { %vm2883_vm6 = vcmp.eq.s32.totalorder %v5557_v47, 2  ;;  %v1897_v19 = vadd.s32 %v5466_v12, %v5460_v24  ;;  %v3273_v6 = vadd.s32 4294967294, %v1909_v49  ;;  %v2671_v48 = vmul.u32 %v5519_v51, %v5568_v35 }
 0x275   : > { %v2866_v23 = vmul.f32 %v2865_v61, %v2861_v52  ;;  %v2873_v21 = vmul.f32 %v2872_v31, %v2861_v52  ;;  %v1928_v22 = vsel %vm1805_vm8, %v1927_v62, %v1903_v0  ;;  %v2655_v1 = vmul.u32 %v2651_v37, %v5532_v45 }
 0x276   : > { %vm2876_vm10 = vweird.f32 %v4436_v26  ;;  %vm3274_vm9 = vcmp.lt.s32.totalorder %v3273_v6, 0  ;;  %v2636_v34 = vshrl.u32 %v5559_v20, 16  ;;  %v2646_v16 = vadd.s32 %v2644_v50, %v2642_v57  ;;  %v6435_v26 = vld [vmem:[#allocation17_spill] sm:$0xff] }
 0x277   : > { %v2653_v41 = vmul.u32 %v2651_v37, %v2627_v30  ;;  %v2867_v54 = vadd.f32 1.0, %v2866_v23  ;;  %v2874_v24 = vadd.f32 1.0, %v2873_v21  ;;  %v1912_v12 = vsel %vm3274_vm9, 0, %v3273_v6 }
 0x278   : > { %v2657_v53 = vshll.u32 %v2654_v13, 16  ;;  %v1913_v59 = vsub.s32 32, %v1912_v12  ;;  %v1914_v49 = vshll.u32 %v5564_v56, %v1912_v12  ;;  %v1917_v52 = vsub.s32 4294967266, %v1912_v12 }
 0x279   : > { %v1930_v0 = vsel %vm5575_vm11, 0, %v1928_v22  ;;  %v2875_v62 = vmul.f32 %v2874_v24, %v5545_v8  ;;  %v2884_v61 = vxor.u32 2147483648, %v2867_v54  ;;  %v2656_v31 = vmul.u32 %v2652_v55, %v5532_v45  ;;  %v6433_v8 = vld [vmem:[#allocation6_spill] sm:$0xff] }
 0x27a   : > { %v2659_v46 = vshll.u32 %v2655_v1, 16  ;;  %v1915_v20 = vshrl.u32 %v1897_v19, %v1913_v59  ;;  %v1918_v57 = vadd.s32 127, %v1917_v52  ;;  %v2638_v30 = vshrl.u32 %v5562_v60, 16 }
 0x27b   : > { %v2658_v37 = vshrl.u32 %v2654_v13, 16  ;;  %vm2303_vm1 = vcmp.lt.s32.totalorder %v5233_v15, 4  ;;  %v2881_v50 = vxor.u32 2147483648, %v2875_v62  ;;  %v2647_v6 = vadd.s32 %v2646_v16, %v2636_v34 }
 0x27c   : > { %vm2661_vm12 = vc.u32 %v2653_v41, %v2657_v53  ;;  %v2663_v56 = vadd.s32 %v2657_v53, %v2653_v41  ;;  %v1916_v23 = vor.u32 %v1915_v20, %v1914_v49  ;;  %v1919_v21 = vshll.u32 %v1918_v57, 23  ;;  %v1733_v41 = vpop.f32.mrf.mxu3 }
 0x27d   : > { %v2662_v22 = vsel %vm2661_vm12, 1, %v6351_v11  ;;  %v2113_v24 = vand.u32 2147483647, %v6433_v8  ;;  %v2882_v45 = vsel %vm2880_vm5, %v2867_v54, %v2881_v50  ;;  %v2885_v55 = vsel %vm2883_vm6, %v2884_v61, %v2875_v62 }
 0x27e   : > { %v2664_v60 = vadd.s32 %v2662_v22, %v2656_v31  ;;  %vm2665_vm2 = vc.u32 %v2663_v56, %v2659_v46  ;;  %v2886_v13 = vsel %vm2879_vm3, %v2882_v45, %v2885_v55  ;;  %v1920_v19 = vor.u32 4788187, %v1919_v21  ;;  %v6434_v31 = vld [vmem:[#allocation14_spill] sm:$0xff] }
 0x27f   : > { %v1923_v34 = vcvt.s32.f32 %v1916_v23  ;;  %v2666_v16 = vsel %vm2665_vm2, 1, %v6351_v11  ;;  %v2887_v12 = vsel %vm2876_vm10, nan, %v2886_v13  ;;  %v5614_v53 = vadd.s32 %v2647_v6, %v2638_v30  ;;  %v6436_v13 = vld [vmem:[#allocation22_spill] sm:$0xff] }
 0x280   : > { %v2660_v59 = vshrl.u32 %v2655_v1, 16  ;;  %v2668_v54 = vadd.s32 %v2666_v16, %v2664_v60  ;;  %v3129_v49 = vmul.f32 %v3412_v9, %v2887_v12  ;;  %v1921_v52 = vand.u32 2147483647, %v1920_v19 }
 0x281   : > { %v5618_v62 = vadd.s32 %v2663_v56, %v2659_v46  ;;  %v2120_v47 = vand.u32 8388607, %v2113_v24  ;;  %v2130_v20 = vshll.u32 %v6359_v43, %v6434_v31  ;;  %v2131_v57 = vshrl.u32 %v6360_v40, %v6435_v26 }
 0x282   : > { %v2669_v61 = vadd.s32 %v2668_v54, %v2658_v37  ;;  %v2133_v1 = vshll.u32 %v6360_v40, %v6434_v31  ;;  %v3137_v30 = vmul.f32 %v3129_v49, %v1733_v41  ;;  %v1924_v50 = vmul.f32 %v1923_v34, %v1921_v52 }
 0x283   : > { %v2121_v9 = vor.u32 8388608, %v2120_v47  ;;  %v2134_v46 = vshrl.u32 %v6361_v29, %v6435_v26  ;;  %v1947_v6 = vadd.s32 3, %v1930_v0  ;;  %v2136_v37 = vshll.u32 %v6361_v29, %v6434_v31  ;;  %v6439_v47 = vld [vmem:[#allocation29_spill] sm:$0xff] }
 0x284   : > { %v2670_v56 = vadd.s32 %v2669_v61, %v2660_v59  ;;  %v2137_v23 = vshrl.u32 %v6347_v4, %v6435_v26  ;;  %3145 = vst [vmem:[%s5498_s26 + $0x30] sm:$0xff] %v3137_v30  ;;  %v1925_v21 = vxor.u32 2147483648, %v1924_v50  ;;  %vm2673_vm7 = vc.u32 %v5614_v53, %v5618_v62  ;;  %v6437_v59 = vld [vmem:[#allocation30_spill] sm:$0xff] }
 0x285   : > { %v2132_v22 = vor.u32 %v2131_v57, %v2130_v20  ;;  %v2135_v45 = vor.u32 %v2134_v46, %v2133_v1  ;;  %vm2145_vm0 = vcmp.lt.s32.totalorder %v6436_v13, 1  ;;  %vm2147_vm14 = vcmp.lt.s32.totalorder %v6436_v13, 3 }
 0x286   : > { %v2674_v55 = vadd.s32 1, %v2670_v56  ;;  %v2138_v60 = vor.u32 %v2137_v23, %v2136_v37  ;;  %v2299_v0 = vor.u32 %v5504_v25, %v5377_v17  ;;  %v5644_v19 = vsel %vm2303_vm1, %v5538_v32, 920167782  ;;  %v6438_v17 = vld [vmem:[#allocation24_spill] sm:$0xff] }
 0x287   : > { %v1926_v34 = vsel %vm1805_vm8, %v1925_v21, %v1924_v50  ;;  %v5648_v16 = vshll.u32 %v2121_v9, 8  ;;  %vm2146_vm13 = vcmp.lt.s32.totalorder %v6436_v13, 2  ;;  %v2159_v25 = vsel %vm2147_vm14, %v6438_v17, %v6437_v59 }
 0x288   : > { %v5653_v41 = vsel %vm5575_vm11, %v6410_v27, %v1926_v34  ;;  %v2675_v12 = vsel %vm2673_vm7, %v2674_v55, %v2670_v56  ;;  %v5662_v49 = vand.u32 3, %v1947_v6  ;;  %v2153_v3 = vsel %vm2145_vm0, %v2132_v22, %v2135_v45 }
 0x289   : > { %v1931_v54 = vmul.f32 %v5653_v41, %v5653_v41  ;;  %v2676_v52 = vadd.s32 %v2675_v12, %v2671_v48  ;;  %v2155_v61 = vsel %vm2147_vm14, %v2138_v60, %v6439_v47  ;;  %v2157_v31 = vsel %vm2145_vm0, %v2135_v45, %v2138_v60 }
 0x28a   : > { %v2162_v20 = vand.u32 65535, %v5648_v16  ;;  %v5676_v57 = vshrl.u32 %v5648_v16, 16  ;;  %v2160_v51 = vsel %vm2146_vm13, %v2157_v31, %v2159_v25  ;;  %v5682_v35 = vsel %vm2303_vm1, %v2299_v0, 1326507024 }
 0x28b   : > { %v1932_v1 = vmul.f32 -0.001358992, %v1931_v54  ;;  %v1939_v30 = vmul.f32 -0.00019511016, %v1931_v54  ;;  %v2677_v50 = vadd.s32 536870912, %v2676_v52  ;;  %v3397_v48 = vunpack.i.l.bf16 %v5484_v18 }
 0x28c   : > { %v2164_v9 = vand.u32 65535, %v2160_v51  ;;  %v2165_v46 = vshrl.u32 %v2160_v51, 16  ;;  %v2156_v23 = vsel %vm2146_vm13, %v2153_v3, %v2155_v61  ;;  %vm1953_vm8 = vcmp.eq.s32.totalorder %v5662_v49, 2 }
 0x28d   : > { %v1933_v6 = vadd.f32 0.041655596, %v1932_v1  ;;  %v1940_v56 = vadd.f32 0.008332121, %v1939_v30  ;;  %v5685_v37 = vshrl.u32 %v2677_v50, 30  ;;  %v2129_v21 = vshrl.u32 %v6359_v43, %v6435_v26 }
 0x28e   : > { %v2166_v55 = vmul.u32 %v2164_v9, %v2162_v20  ;;  %v5692_v34 = vmul.u32 %v2165_v46, %v2162_v20  ;;  %v5695_v0 = vmul.u32 %v2164_v9, %v5676_v57  ;;  %vm6440_vm11 = vcmp.lt.s32.totalorder %v6436_v13, 4 }
 0x28f   : > { %v1934_v12 = vmul.f32 %v1933_v6, %v1931_v54  ;;  %v1941_v59 = vmul.f32 %v1940_v56, %v1931_v54  ;;  %v2679_v17 = vshll.u32 %v5685_v37, 30  ;;  %v2150_v25 = vsel %vm6440_vm11, %v2138_v60, 2102212464 }
 0x290   : > { %v2170_v3 = vshll.u32 %v5692_v34, 16  ;;  %v2172_v47 = vshll.u32 %v5695_v0, 16  ;;  %v2186_v61 = vand.u32 65535, %v2156_v23  ;;  %v2187_v31 = vshrl.u32 %v2156_v23, 16 }
 0x291   : > { %v1935_v26 = vadd.f32 -0.4999988, %v1934_v12  ;;  %v1942_v1 = vadd.f32 -0.16666654, %v1941_v59  ;;  %vm1949_vm4 = vcmp.lt.s32.totalorder %v5662_v49, 2  ;;  %v5703_v30 = vsub.s32 %v2676_v52, %v2679_v17 }
 0x292   : > { %v2169_v50 = vmul.u32 %v2165_v46, %v5676_v57  ;;  %vm1946_vm5 = vweird.f32 %v6410_v27  ;;  %v2149_v51 = vsel %vm2145_vm0, %v2129_v21, %v2132_v22  ;;  %v2151_v60 = vsel %vm2147_vm14, %v2135_v45, %v2150_v25 }
 0x293   : > { %vm2174_vm15 = vc.u32 %v2166_v55, %v2170_v3  ;;  %v2176_v9 = vadd.s32 %v2170_v3, %v2166_v55  ;;  %v1936_v6 = vmul.f32 %v1935_v26, %v1931_v54  ;;  %v1943_v56 = vmul.f32 %v1942_v1, %v1931_v54 }
 0x294   : > { %vm2681_vm3 = vcmp.lt.s32.totalorder %v5703_v30, 0  ;;  %v2682_v23 = vsub.s32 0, %v5703_v30  ;;  %vm2580_vm6 = vcmp.lt.s32.totalorder %v6423_v58, 0  ;;  %v2175_v52 = vsel %vm2174_vm15, 1, %v6351_v11 }
 0x295   : > { %vm2178_vm10 = vc.u32 %v2176_v9, %v2172_v47  ;;  %v2188_v46 = vmul.u32 %v2186_v61, %v2162_v20  ;;  %v2189_v12 = vmul.u32 %v2187_v31, %v2162_v20  ;;  %v1937_v59 = vadd.f32 1.0, %v1936_v6 }
 0x296   : > { %v1944_v22 = vadd.f32 1.0, %v1943_v56  ;;  %v2683_v21 = vsel %vm2681_vm3, %v2682_v23, %v5703_v30  ;;  %v2177_v45 = vadd.s32 %v2175_v52, %v2169_v50  ;;  %v2179_v55 = vsel %vm2178_vm10, 1, %v6351_v11 }
 0x297   : > { %v2684_v17 = vclz %v2683_v21  ;;  %v5718_v54 = vmul.u32 %v2186_v61, %v5676_v57  ;;  %v2192_v25 = vshll.u32 %v2189_v12, 16  ;;  %vm1950_vm9 = vcmp.eq.s32.totalorder %v5662_v49, 0 }
 0x298   : > { %v1945_v3 = vmul.f32 %v1944_v22, %v5653_v41  ;;  %v1954_v26 = vxor.u32 2147483648, %v1937_v59  ;;  %v5724_v20 = vsel %vm2146_vm13, %v2149_v51, %v2151_v60  ;;  %v2672_v47 = vadd.s32 %v5618_v62, %v5614_v53 }
 0x299   : > { %v3288_v1 = vadd.s32 4294967294, %v2684_v17  ;;  %v2702_v50 = vsub.s32 4, %v5685_v37  ;;  %vm2196_vm12 = vc.u32 %v2188_v46, %v2192_v25  ;;  %v6441_v41 = vand.u32 2147483647, %v6423_v58 }
 0x29a   : > { %v1951_v9 = vxor.u32 2147483648, %v1945_v3  ;;  %v1955_v61 = vsel %vm1953_vm8, %v1954_v26, %v1945_v3  ;;  %v2171_v13 = vshrl.u32 %v5692_v34, 16  ;;  %v2181_v51 = vadd.s32 %v2179_v55, %v2177_v45 }
 0x29b   : > { %vm5733_vm2 = vcmp.le.f32.partialorder %v6441_v41, 0.7853982  ;;  %vm3289_vm7 = vcmp.lt.s32.totalorder %v3288_v1, 0  ;;  %v2191_v53 = vmul.u32 %v2187_v31, %v5676_v57  ;;  %v2194_v62 = vshll.u32 %v5718_v54, 16  ;;  %v1715_v57 = vpop.f32.mrf.mxu0 }
 0x29c   : > { %v2206_v60 = vmul.u32 %v5648_v16, %v5724_v20  ;;  %v1952_v56 = vsel %vm1950_vm9, %v1937_v59, %v1951_v9  ;;  %v2687_v23 = vsel %vm3289_vm7, 0, %v3288_v1  ;;  %v2197_v52 = vsel %vm2196_vm12, 1, %v6351_v11 }
 0x29d   : > { %v2198_v22 = vadd.s32 %v2192_v25, %v2188_v46  ;;  %v1956_v21 = vsel %vm1949_vm4, %v1952_v56, %v1955_v61  ;;  %v2688_v34 = vsub.s32 32, %v2687_v23  ;;  %v2689_v45 = vshll.u32 %v5703_v30, %v2687_v23 }
 0x29e   : > { %v2692_v17 = vsub.s32 4294967266, %v2687_v23  ;;  %v1957_v31 = vsel %vm1946_vm5, nan, %v1956_v21  ;;  %v2703_v55 = vsel %vm2580_vm6, %v2702_v50, %v5685_v37  ;;  %v2173_v59 = vshrl.u32 %v5695_v0, 16 }
 0x29f   : > { %v2182_v3 = vadd.s32 %v2181_v51, %v2171_v13  ;;  %vm2923_vm0 = vcmp.lt.s32.totalorder %v4365_v33, 4  ;;  %v3123_v49 = vmul.f32 %v3397_v48, %v1957_v31  ;;  %v2690_v46 = vshrl.u32 %v2672_v47, %v2688_v34 }
 0x2a0   : > { %v2693_v30 = vadd.s32 127, %v2692_v17  ;;  %v2193_v25 = vshrl.u32 %v2189_v12, 16  ;;  %v2195_v26 = vshrl.u32 %v5718_v54, 16  ;;  %v2199_v27 = vadd.s32 %v2197_v52, %v2191_v53 }
 0x2a1   : > { %vm2200_vm14 = vc.u32 %v2198_v22, %v2194_v62  ;;  %v2268_v1 = vand.u32 2147483647, %v3826_v14  ;;  %v3131_v9 = vmul.f32 %v3123_v49, %v1715_v57  ;;  %v2691_v37 = vor.u32 %v2690_v46, %v2689_v45 }
 0x2a2   : > { %v2694_v50 = vshll.u32 %v2693_v30, 23  ;;  %v2201_v0 = vsel %vm2200_vm14, 1, %v6351_v11  ;;  %v5760_v61 = vadd.s32 %v2182_v3, %v2173_v59  ;;  %v5762_v41 = vadd.s32 %v2198_v22, %v2194_v62 }
 0x2a3   : > { %v2203_v48 = vadd.s32 %v2201_v0, %v2199_v27  ;;  %v2275_v47 = vand.u32 8388607, %v2268_v1  ;;  %3139 = vst [vmem:[%s5498_s26] sm:$0xff] %v3131_v9  ;;  %v2698_v54 = vcvt.s32.f32 %v2691_v37  ;;  %v2705_v13 = vsel %vm5733_vm2, 0, %v2703_v55 }
 0x2a4   : > { %v2695_v12 = vor.u32 4788187, %v2694_v50  ;;  %v2285_v51 = vshll.u32 %v6359_v43, %v5093_v44  ;;  %v2286_v23 = vshrl.u32 %v6360_v40, %v5239_v63  ;;  %v2288_v62 = vshll.u32 %v6360_v40, %v5093_v44 }
 0x2a5   : > { %v2204_v53 = vadd.s32 %v2203_v48, %v2193_v25  ;;  %v2276_v56 = vor.u32 8388608, %v2275_v47  ;;  %v2289_v22 = vshrl.u32 %v6361_v29, %v5239_v63  ;;  %v2291_v21 = vshll.u32 %v6361_v29, %v5093_v44 }
 0x2a6   : > { %v2696_v52 = vand.u32 2147483647, %v2695_v12  ;;  %v2292_v34 = vshrl.u32 %v6347_v4, %v5239_v63  ;;  %vm2208_vm13 = vc.u32 %v5760_v61, %v5762_v41  ;;  %v2287_v17 = vor.u32 %v2286_v23, %v2285_v51 }
 0x2a7   : > { %v2205_v45 = vadd.s32 %v2204_v53, %v2195_v26  ;;  %vm2300_vm8 = vcmp.lt.s32.totalorder %v5233_v15, 1  ;;  %v2290_v31 = vor.u32 %v2289_v22, %v2288_v62  ;;  %vm2302_vm11 = vcmp.lt.s32.totalorder %v5233_v15, 3 }
 0x2a8   : > { %v2699_v57 = vmul.f32 %v2698_v54, %v2696_v52  ;;  %v2293_v55 = vor.u32 %v2292_v34, %v2291_v21  ;;  %vm2301_vm4 = vcmp.lt.s32.totalorder %v5233_v15, 2  ;;  %v2314_v44 = vsel %vm2302_vm11, %v5538_v32, %v5682_v35 }
 0x2a9   : > { %v2209_v59 = vadd.s32 1, %v2205_v45  ;;  %v5790_v3 = vshll.u32 %v2276_v56, 8  ;;  %v2919_v49 = vor.u32 %v5223_v5, %v4643_v10  ;;  %v2308_v30 = vsel %vm2300_vm8, %v2287_v17, %v2290_v31 }
 0x2aa   : > { %v2700_v46 = vxor.u32 2147483648, %v2699_v57  ;;  %v2310_v25 = vsel %vm2302_vm11, %v2293_v55, %v5644_v19  ;;  %v5802_v26 = vsel %vm2923_vm0, %v5219_v39, 920167782  ;;  %v2722_v27 = vadd.s32 3, %v2705_v13 }
 0x2ab   : > { %v2210_v32 = vsel %vm2208_vm13, %v2209_v59, %v2205_v45  ;;  %v2312_v10 = vsel %vm2300_vm8, %v2290_v31, %v2293_v55  ;;  %v5816_v35 = vsel %vm2301_vm4, %v2308_v30, %v2310_v25  ;;  %v2317_v50 = vand.u32 65535, %v5790_v3 }
 0x2ac   : > { %v2701_v5 = vsel %vm2580_vm6, %v2700_v46, %v2699_v57  ;;  %v2211_v19 = vadd.s32 %v2210_v32, %v2206_v60  ;;  %v2315_v9 = vsel %vm2301_vm4, %v2312_v10, %v2314_v44  ;;  %v2318_v0 = vshrl.u32 %v5790_v3, 16 }
 0x2ad   : > { %v5823_v37 = vsel %vm5733_vm2, %v6423_v58, %v2701_v5  ;;  %v2319_v48 = vand.u32 65535, %v2315_v9  ;;  %v2284_v60 = vshrl.u32 %v6359_v43, %v5239_v63  ;;  %v2320_v47 = vshrl.u32 %v2315_v9, 16 }
 0x2ae   : > { %v2706_v16 = vmul.f32 %v5823_v37, %v5823_v37  ;;  %v2212_v20 = vadd.s32 536870912, %v2211_v19  ;;  %v5833_v12 = vsel %vm2923_vm0, %v2919_v49, 1326507024  ;;  %v2305_v6 = vsel %vm2303_vm1, %v2293_v55, 2102212464 }
 0x2af   : > { %v5837_v54 = vmul.u32 %v2319_v48, %v2318_v0  ;;  %v2342_v13 = vshrl.u32 %v5816_v35, 16  ;;  %v5842_v23 = vmul.u32 %v2320_v47, %v2317_v50  ;;  %v3408_v63 = vunpack.i.h.bf16 %v5387_v28 }
 0x2b0   : > { %v2707_v51 = vmul.f32 -0.001358992, %v2706_v16  ;;  %v2714_v53 = vmul.f32 -0.00019511016, %v2706_v16  ;;  %v5840_v56 = vshrl.u32 %v2212_v20, 30  ;;  %v5845_v62 = vand.u32 3, %v2722_v27 }
 0x2b1   : > { %v2321_v52 = vmul.u32 %v2319_v48, %v2317_v50  ;;  %v2341_v22 = vand.u32 65535, %v5816_v35  ;;  %v2304_v57 = vsel %vm2300_vm8, %v2284_v60, %v2287_v17  ;;  %v2306_v55 = vsel %vm2302_vm11, %v2290_v31, %v2305_v6 }
 0x2b2   : > { %v2708_v21 = vadd.f32 0.041655596, %v2707_v51  ;;  %v2715_v34 = vadd.f32 0.008332121, %v2714_v53  ;;  %v2214_v45 = vshll.u32 %v5840_v56, 30  ;;  %v2325_v59 = vshll.u32 %v5842_v23, 16 }
 0x2b3   : > { %v2327_v44 = vshll.u32 %v5837_v54, 16  ;;  %v5855_v49 = vmul.u32 %v2342_v13, %v2317_v50  ;;  %v2324_v27 = vmul.u32 %v2320_v47, %v2318_v0  ;;  %vm2725_vm1 = vcmp.eq.s32.totalorder %v5845_v62, 0 }
 0x2b4   : > { %v2709_v46 = vmul.f32 %v2708_v21, %v2706_v16  ;;  %v2716_v30 = vmul.f32 %v2715_v34, %v2706_v16  ;;  %v5857_v25 = vsub.s32 %v2211_v19, %v2214_v45  ;;  %vm2728_vm5 = vcmp.eq.s32.totalorder %v5845_v62, 2 }
 0x2b5   : > { %vm2329_vm15 = vc.u32 %v2321_v52, %v2325_v59  ;;  %v2331_v17 = vadd.s32 %v2325_v59, %v2321_v52  ;;  %v2343_v32 = vmul.u32 %v2341_v22, %v2317_v50  ;;  %vm2724_vm3 = vcmp.lt.s32.totalorder %v5845_v62, 2 }
 0x2b6   : > { %v2710_v10 = vadd.f32 -0.4999988, %v2709_v46  ;;  %v2717_v31 = vadd.f32 -0.16666654, %v2716_v30  ;;  %vm2216_vm6 = vcmp.lt.s32.totalorder %v5857_v25, 0  ;;  %v2217_v5 = vsub.s32 0, %v5857_v25 }
 0x2b7   : > { %vm2115_vm10 = vcmp.lt.s32.totalorder %v6433_v8, 0  ;;  %vm2721_vm9 = vweird.f32 %v6423_v58  ;;  %v5868_v19 = vsel %vm2301_vm4, %v2304_v57, %v2306_v55  ;;  %v2330_v35 = vsel %vm2329_vm15, 1, %v6351_v11 }
 0x2b8   : > { %vm2333_vm12 = vc.u32 %v2331_v17, %v2327_v44  ;;  %v2347_v9 = vshll.u32 %v5855_v49, 16  ;;  %v2711_v50 = vmul.f32 %v2710_v10, %v2706_v16  ;;  %v2718_v48 = vmul.f32 %v2717_v31, %v2706_v16  ;;  %v6446_v10 = vld [vmem:[#allocation12_spill] sm:$0xff] }
 0x2b9   : > { %v2218_v20 = vsel %vm2216_vm6, %v2217_v5, %v5857_v25  ;;  %v2332_v60 = vadd.s32 %v2330_v35, %v2324_v27  ;;  %v2207_v47 = vadd.s32 %v5762_v41, %v5760_v61  ;;  %v2334_v51 = vsel %vm2333_vm12, 1, %v6351_v11 }
 0x2ba   : > { %v2219_v6 = vclz %v2218_v20  ;;  %v2345_v53 = vmul.u32 %v2341_v22, %v2318_v0  ;;  %v2712_v15 = vadd.f32 1.0, %v2711_v50  ;;  %v2719_v52 = vadd.f32 1.0, %v2718_v48  ;;  %v1730_v20 = vpop.f32.mrf.mxu2 }
 0x2bb   : > { %vm2351_vm2 = vc.u32 %v2343_v32, %v2347_v9  ;;  %v2361_v21 = vmul.u32 %v5790_v3, %v5868_v19  ;;  %vm5880_vm7 = vcmp.le.f32.partialorder %v2113_v24, 0.7853982  ;;  %v2237_v45 = vsub.s32 4, %v5840_v56 }
 0x2bc   : > { %v3279_v34 = vadd.s32 4294967294, %v2219_v6  ;;  %v2326_v61 = vshrl.u32 %v5842_v23, 16  ;;  %v2346_v41 = vmul.u32 %v2342_v13, %v2318_v0  ;;  %v2720_v22 = vmul.f32 %v2719_v52, %v5823_v37 }
 0x2bd   : > { %v2729_v57 = vxor.u32 2147483648, %v2712_v15  ;;  %v2336_v55 = vadd.s32 %v2334_v51, %v2332_v60  ;;  %v2352_v59 = vsel %vm2351_vm2, 1, %v6351_v11  ;;  %v2328_v44 = vshrl.u32 %v5837_v54, 16 }
 0x2be   : > { %vm3280_vm14 = vcmp.lt.s32.totalorder %v3279_v34, 0  ;;  %v2349_v46 = vshll.u32 %v2345_v53, 16  ;;  %v2353_v24 = vadd.s32 %v2347_v9, %v2343_v32  ;;  %v2726_v30 = vxor.u32 2147483648, %v2720_v22 }
 0x2bf   : > { %v2730_v27 = vsel %vm2728_vm5, %v2729_v57, %v2720_v22  ;;  %v2222_v17 = vsel %vm3280_vm14, 0, %v3279_v34  ;;  %v2888_v31 = vand.u32 2147483647, %v6446_v10  ;;  %v2354_v13 = vadd.s32 %v2352_v59, %v2346_v41 }
 0x2c0   : > { %v2223_v23 = vsub.s32 32, %v2222_v17  ;;  %v2224_v0 = vshll.u32 %v5857_v25, %v2222_v17  ;;  %v2227_v37 = vsub.s32 4294967266, %v2222_v17  ;;  %v2727_v5 = vsel %vm2725_vm1, %v2712_v15, %v2726_v30 }
 0x2c1   : > { %v2238_v54 = vsel %vm2115_vm10, %v2237_v45, %v5840_v56  ;;  %v2337_v32 = vadd.s32 %v2336_v55, %v2326_v61  ;;  %v2348_v35 = vshrl.u32 %v5855_v49, 16  ;;  %v2731_v9 = vsel %vm2724_vm3, %v2727_v5, %v2730_v27 }
 0x2c2   : > { %v2225_v50 = vshrl.u32 %v2207_v47, %v2223_v23  ;;  %v2228_v48 = vadd.s32 127, %v2227_v37  ;;  %vm2355_vm13 = vc.u32 %v2353_v24, %v2349_v46  ;;  %v2732_v25 = vsel %vm2721_vm9, nan, %v2731_v9  ;;  %v6448_v9 = vld [vmem:[#allocation49_spill] sm:$0xff] }
 0x2c3   : > { %v2350_v60 = vshrl.u32 %v2345_v53, 16  ;;  %v2356_v6 = vsel %vm2355_vm13, 1, %v6351_v11  ;;  %v2895_v51 = vand.u32 8388607, %v2888_v31  ;;  %v3128_v56 = vmul.f32 %v3408_v63, %v2732_v25 }
 0x2c4   : > { %v2226_v49 = vor.u32 %v2225_v50, %v2224_v0  ;;  %v2229_v62 = vshll.u32 %v2228_v48, 23  ;;  %v2358_v15 = vadd.s32 %v2356_v6, %v2354_v13  ;;  %v2240_v47 = vsel %vm5880_vm7, 0, %v2238_v54  ;;  %v6449_v6 = vld [vmem:[#allocation48_spill] sm:$0xff] }
 0x2c5   : > { %v2338_v52 = vadd.s32 %v2337_v32, %v2328_v44  ;;  %v2357_v34 = vadd.s32 %v2353_v24, %v2349_v46  ;;  %v2896_v58 = vor.u32 8388608, %v2895_v51  ;;  %v3136_v45 = vmul.f32 %v3128_v56, %v1730_v20  ;;  %v6450_v56 = vld [vmem:[#allocation43_spill] sm:$0xff] }
 0x2c6   : > { %v2230_v53 = vor.u32 4788187, %v2229_v62  ;;  %v2233_v61 = vcvt.s32.f32 %v2226_v49  ;;  %v2359_v41 = vadd.s32 %v2358_v15, %v2348_v35  ;;  %v2905_v22 = vshll.u32 %v6359_v43, %v4428_v42  ;;  %v6447_v35 = vld [vmem:[#allocation47_spill] sm:$0xff]  ;;  %v5975_v49 = vpop.permute.xlu1 %3400 }
 0x2c7   : > { %v2906_v28 = vshrl.u32 %v6360_v40, %v4517_v2  ;;  %v2908_v63 = vshll.u32 %v6360_v40, %v4428_v42  ;;  %v2909_v57 = vshrl.u32 %v6361_v29, %v4517_v2  ;;  %3144 = vst [vmem:[%s5498_s26 + $0x28] sm:$0xff] %v3136_v45  ;;  %v2911_v44 = vshll.u32 %v6361_v29, %v4428_v42 }
 0x2c8   : > { %v2231_v55 = vand.u32 2147483647, %v2230_v53  ;;  %v2360_v59 = vadd.s32 %v2359_v41, %v2350_v60  ;;  %v2912_v46 = vshrl.u32 %v6347_v4, %v4517_v2  ;;  %vm2363_vm8 = vc.u32 %v2338_v52, %v2357_v34 }
 0x2c9   : > { %v5923_v24 = vor.u32 %v2906_v28, %v2905_v22  ;;  %v5925_v30 = vor.u32 %v2909_v57, %v2908_v63  ;;  %vm2920_vm11 = vcmp.lt.s32.totalorder %v4365_v33, 1  ;;  %vm2922_vm4 = vcmp.lt.s32.totalorder %v4365_v33, 3 }
 0x2ca   : > { %v2234_v27 = vmul.f32 %v2233_v61, %v2231_v55  ;;  %v2364_v17 = vadd.s32 1, %v2360_v59  ;;  %v2913_v23 = vor.u32 %v2912_v46, %v2911_v44  ;;  %vm2921_vm1 = vcmp.lt.s32.totalorder %v4365_v33, 2 }
 0x2cb   : > { %v2928_v42 = vsel %vm2920_vm11, %v5923_v24, %v5925_v30  ;;  %v2934_v0 = vsel %vm2922_vm4, %v5219_v39, %v5833_v12  ;;  %v5938_v37 = vshll.u32 %v2896_v58, 8  ;;  %v5942_v13 = vshrl.u32 %v6350_v7, %v4284_v36 }
 0x2cc   : > { %v2235_v5 = vxor.u32 2147483648, %v2234_v27  ;;  %v2365_v54 = vsel %vm2363_vm8, %v2364_v17, %v2360_v59  ;;  %v2930_v32 = vsel %vm2922_vm4, %v2913_v23, %v5802_v26  ;;  %v5949_v50 = vor.u32 %v6448_v9, %v6447_v35 }
 0x2cd   : > { %v2257_v48 = vadd.s32 3, %v2240_v47  ;;  %v2366_v39 = vadd.s32 %v2365_v54, %v2361_v21  ;;  %v2932_v7 = vsel %vm2920_vm11, %v5925_v30, %v2913_v23  ;;  %v5961_v20 = vsel %vm2921_vm1, %v2928_v42, %v2930_v32 }
 0x2ce   : > { %v2236_v12 = vsel %vm2115_vm10, %v2235_v5, %v2234_v27  ;;  %v2935_v26 = vsel %vm2921_vm1, %v2932_v7, %v2934_v0  ;;  %v2937_v25 = vand.u32 65535, %v5938_v37  ;;  %v2938_v21 = vshrl.u32 %v5938_v37, 16 }
 0x2cf   : > { %v5969_v3 = vsel %vm5880_vm7, %v6433_v8, %v2236_v12  ;;  %v2367_v19 = vadd.s32 536870912, %v2366_v39  ;;  %v2939_v60 = vand.u32 65535, %v2935_v26  ;;  %v1989_v51 = vor.u32 %v5942_v13, %v6449_v6 }
 0x2d0   : > { %vm1993_vm5 = vcmp.lt.s32.totalorder %v6450_v56, 4  ;;  %v2241_v62 = vmul.f32 %v5969_v3, %v5969_v3  ;;  %v2940_v15 = vshrl.u32 %v2935_v26, 16  ;;  %v5979_v47 = vand.u32 3, %v2257_v48 }
 0x2d1   : > { %v5981_v16 = vshrl.u32 %v2367_v19, 30  ;;  %v5983_v58 = vmul.u32 %v2939_v60, %v2938_v21  ;;  %v2962_v45 = vshrl.u32 %v5961_v20, 16  ;;  %v2941_v41 = vmul.u32 %v2939_v60, %v2937_v25 }
 0x2d2   : > { %v2242_v53 = vmul.f32 -0.001358992, %v2241_v62  ;;  %v2249_v61 = vmul.f32 -0.00019511016, %v2241_v62  ;;  %v5986_v22 = vmul.u32 %v2940_v15, %v2937_v25  ;;  %v5991_v28 = vsel %vm1993_vm5, %v5949_v50, 920167782 }
 0x2d3   : > { %v3402_v63 = vunpack.i.l.bf16 %v5975_v49  ;;  %v5994_v57 = vadd.s32 %v2357_v34, %v2338_v52  ;;  %v2369_v55 = vshll.u32 %v5981_v16, 30  ;;  %v2961_v27 = vand.u32 65535, %v5961_v20 }
 0x2d4   : > { %v2243_v59 = vadd.f32 0.041655596, %v2242_v53  ;;  %v2250_v44 = vadd.f32 0.008332121, %v2249_v61  ;;  %v2945_v46 = vshll.u32 %v5986_v22, 16  ;;  %vm2263_vm15 = vcmp.eq.s32.totalorder %v5979_v47, 2 }
 0x2d5   : > { %v6000_v17 = vsub.s32 %v2366_v39, %v2369_v55  ;;  %v2904_v42 = vshrl.u32 %v6359_v43, %v4517_v2  ;;  %v2944_v0 = vmul.u32 %v2940_v15, %v2938_v21  ;;  %v2947_v5 = vshll.u32 %v5983_v58, 16 }
 0x2d6   : > { %v2244_v52 = vmul.f32 %v2243_v59, %v2241_v62  ;;  %v2251_v34 = vmul.f32 %v2250_v44, %v2241_v62  ;;  %vm2949_vm3 = vc.u32 %v2941_v41, %v2945_v46  ;;  %v6005_v54 = vmul.u32 %v2962_v45, %v2937_v25 }
 0x2d7   : > { %vm2260_vm6 = vcmp.eq.s32.totalorder %v5979_v47, 0  ;;  %vm2371_vm10 = vcmp.lt.s32.totalorder %v6000_v17, 0  ;;  %v2372_v32 = vsub.s32 0, %v6000_v17  ;;  %v2950_v35 = vsel %vm2949_vm3, 1, %v6351_v11 }
 0x2d8   : > { %v2951_v9 = vadd.s32 %v2945_v46, %v2941_v41  ;;  %v2245_v48 = vadd.f32 -0.4999988, %v2244_v52  ;;  %v2252_v39 = vadd.f32 -0.16666654, %v2251_v34  ;;  %vm2259_vm9 = vcmp.lt.s32.totalorder %v5979_v47, 2 }
 0x2d9   : > { %v2925_v2 = vsel %vm2923_vm0, %v2913_v23, 2102212464  ;;  %v2963_v7 = vmul.u32 %v2961_v27, %v2937_v25  ;;  %vm2256_vm12 = vweird.f32 %v6433_v8  ;;  %v2373_v12 = vsel %vm2371_vm10, %v2372_v32, %v6000_v17 }
 0x2da   : > { %v2952_v20 = vadd.s32 %v2950_v35, %v2944_v0  ;;  %vm2953_vm2 = vc.u32 %v2951_v9, %v2947_v5  ;;  %v2965_v26 = vmul.u32 %v2961_v27, %v2938_v21  ;;  %v2246_v19 = vmul.f32 %v2245_v48, %v2241_v62 }
 0x2db   : > { %v2253_v60 = vmul.f32 %v2252_v39, %v2241_v62  ;;  %v2374_v15 = vclz %v2373_v12  ;;  %v2954_v53 = vsel %vm2953_vm2, 1, %v6351_v11  ;;  %v2924_v61 = vsel %vm2920_vm11, %v2904_v42, %v5923_v24  ;;  %v6451_v39 = vld [vmem:[#allocation11_spill] sm:$0xff] }
 0x2dc   : > { %v2926_v23 = vsel %vm2922_vm4, %v5925_v30, %v2925_v2  ;;  %v2946_v25 = vshrl.u32 %v5986_v22, 16  ;;  %v2967_v41 = vshll.u32 %v6005_v54, 16  ;;  %v2247_v55 = vadd.f32 1.0, %v2246_v19  ;;  %v1721_v19 = vpop.f32.mrf.mxu1 }
 0x2dd   : > { %v2254_v59 = vadd.f32 1.0, %v2253_v60  ;;  %v3282_v44 = vadd.s32 4294967294, %v2374_v15  ;;  %v2966_v46 = vmul.u32 %v2962_v45, %v2938_v21  ;;  %v2956_v62 = vadd.s32 %v2954_v53, %v2952_v20 }
 0x2de   : > { %v2969_v27 = vshll.u32 %v2965_v26, 16  ;;  %vm2971_vm0 = vc.u32 %v2963_v7, %v2967_v41  ;;  %v2973_v0 = vadd.s32 %v2967_v41, %v2963_v7  ;;  %v2264_v52 = vxor.u32 2147483648, %v2247_v55 }
 0x2df   : > { %v2255_v5 = vmul.f32 %v2254_v59, %v5969_v3  ;;  %vm3283_vm7 = vcmp.lt.s32.totalorder %v3282_v44, 0  ;;  %v6028_v24 = vsel %vm2921_vm1, %v2924_v61, %v2926_v23  ;;  %v2948_v22 = vshrl.u32 %v5983_v58, 16 }
 0x2e0   : > { %v2377_v30 = vsel %vm3283_vm7, 0, %v3282_v44  ;;  %v2968_v42 = vshrl.u32 %v6005_v54, 16  ;;  %v2972_v34 = vsel %vm2971_vm0, 1, %v6351_v11  ;;  %vm2270_vm14 = vcmp.lt.s32.totalorder %v3826_v14, 0 }
 0x2e1   : > { %v2261_v21 = vxor.u32 2147483648, %v2255_v5  ;;  %v2265_v45 = vsel %vm2263_vm15, %v2264_v52, %v2255_v5  ;;  %v2378_v32 = vsub.s32 32, %v2377_v30  ;;  %v2379_v3 = vshll.u32 %v6000_v17, %v2377_v30 }
 0x2e2   : > { %v2382_v35 = vsub.s32 4294967266, %v2377_v30  ;;  %v2957_v33 = vadd.s32 %v2956_v62, %v2946_v25  ;;  %v2974_v9 = vadd.s32 %v2972_v34, %v2966_v46  ;;  %vm2975_vm13 = vc.u32 %v2973_v0, %v2969_v27 }
 0x2e3   : > { %v2262_v58 = vsel %vm2260_vm6, %v2247_v55, %v2261_v21  ;;  %v2380_v54 = vshrl.u32 %v5994_v57, %v2378_v32  ;;  %v2976_v48 = vsel %vm2975_vm13, 1, %v6351_v11  ;;  %v1958_v2 = vand.u32 2147483647, %v6451_v39 }
 0x2e4   : > { %v2003_v17 = vsel %vm1993_vm5, %v1989_v51, 1326507024  ;;  %v2266_v7 = vsel %vm2259_vm9, %v2262_v58, %v2265_v45  ;;  %v2383_v12 = vadd.s32 127, %v2382_v35  ;;  %v2981_v20 = vmul.u32 %v5938_v37, %v6028_v24 }
 0x2e5   : > { %v2267_v57 = vsel %vm2256_vm12, nan, %v2266_v7  ;;  %v2381_v60 = vor.u32 %v2380_v54, %v2379_v3  ;;  %v2970_v15 = vshrl.u32 %v2965_v26, 16  ;;  %v2978_v53 = vadd.s32 %v2976_v48, %v2974_v9  ;;  %v6452_v26 = vld [vmem:[#allocation44_spill] sm:$0xff] }
 0x2e6   : > { %v3125_v13 = vmul.f32 %v3402_v63, %v2267_v57  ;;  %v2384_v6 = vshll.u32 %v2383_v12, 23  ;;  %v6055_v51 = vadd.s32 %v2957_v33, %v2948_v22  ;;  %v6057_v47 = vadd.s32 %v2973_v0, %v2969_v27 }
 0x2e7   : > { %v2388_v61 = vcvt.s32.f32 %v2381_v60  ;;  %v2392_v23 = vsub.s32 4, %v5981_v16  ;;  %v2979_v37 = vadd.s32 %v2978_v53, %v2968_v42  ;;  %v1965_v8 = vand.u32 8388607, %v1958_v2 }
 0x2e8   : > { %v3133_v25 = vmul.f32 %v3125_v13, %v1721_v19  ;;  %v2385_v41 = vor.u32 4788187, %v2384_v6  ;;  %v1975_v55 = vshll.u32 %v6359_v43, %v6452_v26  ;;  %v1976_v63 = vshrl.u32 %v6360_v40, %v4284_v36 }
 0x2e9   : > { %v2980_v59 = vadd.s32 %v2979_v37, %v2970_v15  ;;  %v1966_v44 = vor.u32 8388608, %v1965_v8  ;;  %v1978_v46 = vshll.u32 %v6360_v40, %v6452_v26  ;;  %v1979_v62 = vshrl.u32 %v6361_v29, %v4284_v36 }
 0x2ea   : > { %3141 = vst [vmem:[%s5498_s26 + $0x10] sm:$0xff] %v3133_v25  ;;  %v2386_v27 = vand.u32 2147483647, %v2385_v41  ;;  %vm2983_vm8 = vc.u32 %v6055_v51, %v6057_v47  ;;  %v1981_v0 = vshll.u32 %v6361_v29, %v6452_v26  ;;  %v1982_v5 = vshrl.u32 %v6347_v4, %v4284_v36 }
 0x2eb   : > { %v2393_v52 = vsel %vm2270_vm14, %v2392_v23, %v5981_v16  ;;  %v2984_v24 = vadd.s32 1, %v2980_v59  ;;  %v6080_v40 = vor.u32 %v1976_v63, %v1975_v55  ;;  %v6082_v30 = vor.u32 %v1979_v62, %v1978_v46 }
 0x2ec   : > { %v2389_v22 = vmul.f32 %v2388_v61, %v2386_v27  ;;  %v6084_v42 = vor.u32 %v1982_v5, %v1981_v0  ;;  %vm1990_vm11 = vcmp.lt.s32.totalorder %v6450_v56, 1  ;;  %vm1992_vm4 = vcmp.lt.s32.totalorder %v6450_v56, 3 }
 0x2ed   : > { %v2985_v29 = vsel %vm2983_vm8, %v2984_v24, %v2980_v59  ;;  %vm1991_vm1 = vcmp.lt.s32.totalorder %v6450_v56, 2  ;;  %v2004_v4 = vsel %vm1992_vm4, %v5949_v50, %v2003_v17  ;;  %v6092_v16 = vshll.u32 %v1966_v44, 8 }
 0x2ee   : > { %vm6096_vm15 = vcmp.le.f32.partialorder %v2268_v1, 0.7853982  ;;  %v2390_v21 = vxor.u32 2147483648, %v2389_v22  ;;  %v2986_v45 = vadd.s32 %v2985_v29, %v2981_v20  ;;  %v1998_v32 = vsel %vm1990_vm11, %v6080_v40, %v6082_v30 }
 0x2ef   : > { %v2000_v50 = vsel %vm1992_vm4, %v6084_v42, %v5991_v28  ;;  %v2002_v1 = vsel %vm1990_vm11, %v6082_v30, %v6084_v42  ;;  %v2007_v3 = vand.u32 65535, %v6092_v16  ;;  %v2395_v33 = vsel %vm6096_vm15, 0, %v2393_v52 }
 0x2f0   : > { %v2391_v35 = vsel %vm2270_vm14, %v2390_v21, %v2389_v22  ;;  %v2987_v9 = vadd.s32 536870912, %v2986_v45  ;;  %v2005_v58 = vsel %vm1991_vm1, %v2002_v1, %v2004_v4  ;;  %v2008_v54 = vshrl.u32 %v6092_v16, 16 }
 0x2f1   : > { %v2394_v28 = vsel %vm6096_vm15, %v3826_v14, %v2391_v35  ;;  %v2009_v48 = vand.u32 65535, %v2005_v58  ;;  %v2010_v17 = vshrl.u32 %v2005_v58, 16  ;;  %v2001_v20 = vsel %vm1991_vm1, %v1998_v32, %v2000_v50 }
 0x2f2   : > { %v2396_v7 = vmul.f32 %v2394_v28, %v2394_v28  ;;  %v6123_v12 = vshrl.u32 %v2987_v9, 30  ;;  %v2412_v19 = vadd.s32 3, %v2395_v33  ;;  %v2032_v37 = vshrl.u32 %v2001_v20, 16 }
 0x2f3   : > { %v2011_v57 = vmul.u32 %v2009_v48, %v2007_v3  ;;  %v6127_v60 = vmul.u32 %v2010_v17, %v2007_v3  ;;  %v6129_v15 = vmul.u32 %v2009_v48, %v2008_v54  ;;  %v2031_v26 = vand.u32 65535, %v2001_v20 }
 0x2f4   : > { %v2397_v53 = vmul.f32 -0.001358992, %v2396_v7  ;;  %v2404_v13 = vmul.f32 -0.00019511016, %v2396_v7  ;;  %v2989_v6 = vshll.u32 %v6123_v12, 30  ;;  %v2413_v55 = vand.u32 3, %v2412_v19 }
 0x2f5   : > { %v2015_v61 = vshll.u32 %v6127_v60, 16  ;;  %v2017_v23 = vshll.u32 %v6129_v15, 16  ;;  %v2014_v63 = vmul.u32 %v2010_v17, %v2008_v54  ;;  %v3403_v27 = vunpack.i.h.bf16 %v5975_v49 }
 0x2f6   : > { %v2398_v8 = vadd.f32 0.041655596, %v2397_v53  ;;  %v2405_v25 = vadd.f32 0.008332121, %v2404_v13  ;;  %v2990_v41 = vsub.s32 %v2986_v45, %v2989_v6  ;;  %v6136_v5 = vmul.u32 %v2032_v37, %v2007_v3 }
 0x2f7   : > { %vm2019_vm3 = vc.u32 %v2011_v57, %v2015_v61  ;;  %v2021_v59 = vadd.s32 %v2015_v61, %v2011_v57  ;;  %v2033_v29 = vmul.u32 %v2031_v26, %v2007_v3  ;;  %vm2411_vm9 = vweird.f32 %v3826_v14 }
 0x2f8   : > { %v2399_v44 = vmul.f32 %v2398_v8, %v2396_v7  ;;  %v2406_v46 = vmul.f32 %v2405_v25, %v2396_v7  ;;  %vm2991_vm6 = vcmp.lt.s32.totalorder %v2990_v41, 0  ;;  %v2992_v62 = vsub.s32 0, %v2990_v41 }
 0x2f9   : > { %v2020_v0 = vsel %vm2019_vm3, 1, %v6351_v11  ;;  %vm2023_vm10 = vc.u32 %v2021_v59, %v2017_v23  ;;  %vm2414_vm12 = vcmp.lt.s32.totalorder %v2413_v55, 2  ;;  %v2035_v21 = vmul.u32 %v2031_v26, %v2008_v54 }
 0x2fa   : > { %v2400_v52 = vadd.f32 -0.4999988, %v2399_v44  ;;  %v2407_v24 = vadd.f32 -0.16666654, %v2406_v46  ;;  %v2993_v22 = vsel %vm2991_vm6, %v2992_v62, %v2990_v41  ;;  %v2022_v34 = vadd.s32 %v2020_v0, %v2014_v63 }
 0x2fb   : > { %v2994_v4 = vclz %v2993_v22  ;;  %v2024_v50 = vsel %vm2023_vm10, 1, %v6351_v11  ;;  %v2037_v49 = vshll.u32 %v6136_v5, 16  ;;  %vm2415_vm2 = vcmp.eq.s32.totalorder %v2413_v55, 0 }
 0x2fc   : > { %v2401_v45 = vmul.f32 %v2400_v52, %v2396_v7  ;;  %v2408_v32 = vmul.f32 %v2407_v24, %v2396_v7  ;;  %vm2418_vm0 = vcmp.eq.s32.totalorder %v2413_v55, 2  ;;  %v2982_v1 = vadd.s32 %v6057_v47, %v6055_v51 }
 0x2fd   : > { %v3294_v35 = vadd.s32 4294967294, %v2994_v4  ;;  %v1974_v9 = vshrl.u32 %v6359_v43, %v4284_v36  ;;  %vm2041_vm7 = vc.u32 %v2033_v29, %v2037_v49  ;;  %v2016_v58 = vshrl.u32 %v6127_v60, 16 }
 0x2fe   : > { %v2402_v33 = vadd.f32 1.0, %v2401_v45  ;;  %v2409_v3 = vadd.f32 1.0, %v2408_v32  ;;  %v2026_v48 = vadd.s32 %v2024_v50, %v2022_v34  ;;  %v2036_v17 = vmul.u32 %v2032_v37, %v2008_v54 }
 0x2ff   : > { %vm3295_vm14 = vcmp.lt.s32.totalorder %v3294_v35, 0  ;;  %v2039_v57 = vshll.u32 %v2035_v21, 16  ;;  %v2042_v51 = vsel %vm2041_vm7, 1, %v6351_v11  ;;  %v1994_v43 = vsel %vm1990_vm11, %v1974_v9, %v6080_v40  ;;  %v1724_v40 = vpop.f32.mrf.mxu1 }
 0x300   : > { %v2410_v7 = vmul.f32 %v2409_v3, %v2394_v28  ;;  %v2419_v20 = vxor.u32 2147483648, %v2402_v33  ;;  %v2997_v19 = vsel %vm3295_vm14, 0, %v3294_v35  ;;  %v1995_v36 = vsel %vm1993_vm5, %v6084_v42, 2102212464 }
 0x301   : > { %v2998_v53 = vsub.s32 32, %v2997_v19  ;;  %v2999_v13 = vshll.u32 %v2990_v41, %v2997_v19  ;;  %v3002_v6 = vsub.s32 4294967266, %v2997_v19  ;;  %v2018_v60 = vshrl.u32 %v6129_v15, 16 }
 0x302   : > { %v2416_v47 = vxor.u32 2147483648, %v2410_v7  ;;  %v2420_v61 = vsel %vm2418_vm0, %v2419_v20, %v2410_v7  ;;  %v2043_v23 = vadd.s32 %v2037_v49, %v2033_v29  ;;  %v2027_v8 = vadd.s32 %v2026_v48, %v2016_v58 }
 0x303   : > { %v3000_v28 = vshrl.u32 %v2982_v1, %v2998_v53  ;;  %v3003_v54 = vadd.s32 127, %v3002_v6  ;;  %v2038_v25 = vshrl.u32 %v6136_v5, 16  ;;  %v2044_v41 = vadd.s32 %v2042_v51, %v2036_v17 }
 0x304   : > { %v2417_v37 = vsel %vm2415_vm2, %v2402_v33, %v2416_v47  ;;  %vm2045_vm13 = vc.u32 %v2043_v23, %v2039_v57  ;;  %v1996_v15 = vsel %vm1992_vm4, %v6082_v30, %v1995_v36  ;;  %v2040_v44 = vshrl.u32 %v2035_v21, 16 }
 0x305   : > { %v2421_v26 = vsel %vm2414_vm12, %v2417_v37, %v2420_v61  ;;  %v3001_v63 = vor.u32 %v3000_v28, %v2999_v13  ;;  %v3004_v59 = vshll.u32 %v3003_v54, 23  ;;  %v2046_v46 = vsel %vm2045_vm13, 1, %v6351_v11 }
 0x306   : > { %v2422_v42 = vsel %vm2411_vm9, nan, %v2421_v26  ;;  %v2048_v55 = vadd.s32 %v2046_v46, %v2044_v41  ;;  %v2028_v52 = vadd.s32 %v2027_v8, %v2018_v60  ;;  %v2047_v24 = vadd.s32 %v2043_v23, %v2039_v57  ;;  %v1736_v46 = vpop.f32.mrf.mxu3 }
 0x307   : > { %v3126_v62 = vmul.f32 %v3403_v27, %v2422_v42  ;;  %v3005_v0 = vor.u32 4788187, %v3004_v59  ;;  %v3008_v5 = vcvt.s32.f32 %v3001_v63  ;;  %v1997_v4 = vsel %vm1991_vm1, %v1994_v43, %v1996_v15 }
 0x308   : > { %v2049_v14 = vadd.s32 %v2048_v55, %v2038_v25  ;;  %vm2890_vm5 = vcmp.lt.s32.totalorder %v6446_v10, 0  ;;  %v3012_v30 = vsub.s32 4, %v6123_v12  ;;  %v2051_v11 = vmul.u32 %v6092_v16, %v1997_v4 }
 0x309   : > { %v3134_v22 = vmul.f32 %v3126_v62, %v1724_v40  ;;  %v3006_v29 = vand.u32 2147483647, %v3005_v0  ;;  %vm2053_vm8 = vc.u32 %v2028_v52, %v2047_v24  ;;  %vm6172_vm11 = vcmp.le.f32.partialorder %v2888_v31, 0.7853982 }
 0x30a   : > { %v2050_v45 = vadd.s32 %v2049_v14, %v2040_v44  ;;  %v3013_v49 = vsel %vm2890_vm5, %v3012_v30, %v6123_v12  ;;  %v2052_v41 = vadd.s32 %v2047_v24, %v2028_v52  ;;  %v3413_v26 = vunpack.i.h.bf16 %v5540_v38 }
 0x30b   : > { %3142 = vst [vmem:[%s5498_s26 + $0x18] sm:$0xff] %v3134_v22  ;;  %v3009_v34 = vmul.f32 %v3008_v5, %v3006_v29  ;;  %v3015_v3 = vsel %vm6172_vm11, 0, %v3013_v49  ;;  %vm3031_vm10 = vweird.f32 %v6446_v10  ;;  %vm1960_vm9 = vcmp.lt.s32.totalorder %v6451_v39, 0 }
 0x30c   : > { %v2054_v56 = vadd.s32 1, %v2050_v45  ;;  %v3032_v7 = vadd.s32 3, %v3015_v3  ;;  %vm1959_vm12 = vcmp.le.f32.partialorder %v1958_v2, 0.7853982  ;;  %vm2101_vm14 = vweird.f32 %v6451_v39 }
 0x30d   : > { %v3010_v21 = vxor.u32 2147483648, %v3009_v34 }
 0x30e   : > { %v2055_v50 = vsel %vm2053_vm8, %v2054_v56, %v2050_v45  ;;  %v3033_v6 = vand.u32 3, %v3032_v7 }
 0x30f   : > { %v3011_v32 = vsel %vm2890_vm5, %v3010_v21, %v3009_v34  ;;  %v2056_v35 = vadd.s32 %v2055_v50, %v2051_v11 }
 0x310   : > { %v3014_v1 = vsel %vm6172_vm11, %v6446_v10, %v3011_v32  ;;  %vm3038_vm1 = vcmp.eq.s32.totalorder %v3033_v6, 2  ;;  %vm3034_vm15 = vcmp.lt.s32.totalorder %v3033_v6, 2  ;;  %vm3035_vm3 = vcmp.eq.s32.totalorder %v3033_v6, 0 }
 0x311   : > { %v3016_v33 = vmul.f32 %v3014_v1, %v3014_v1  ;;  %v2057_v16 = vadd.s32 536870912, %v2056_v35 }
 0x313   : > { %v3017_v31 = vmul.f32 -0.001358992, %v3016_v33  ;;  %v3024_v9 = vmul.f32 -0.00019511016, %v3016_v33  ;;  %v2058_v58 = vshrl.u32 %v2057_v16, 30 }
 0x315   : > { %v3018_v48 = vadd.f32 0.041655596, %v3017_v31  ;;  %v3025_v17 = vadd.f32 0.008332121, %v3024_v9  ;;  %v2059_v20 = vshll.u32 %v2058_v58, 30  ;;  %v2082_v14 = vsub.s32 4, %v2058_v58 }
 0x317   : > { %v3019_v19 = vmul.f32 %v3018_v48, %v3016_v33  ;;  %v3026_v57 = vmul.f32 %v3025_v17, %v3016_v33  ;;  %v2060_v12 = vsub.s32 %v2056_v35, %v2059_v20  ;;  %v2083_v30 = vsel %vm1960_vm9, %v2082_v14, %v2058_v58 }
 0x318   : > { %v2085_v21 = vsel %vm1959_vm12, 0, %v2083_v30 }
 0x319   : > { %v3020_v53 = vadd.f32 -0.4999988, %v3019_v19  ;;  %v3027_v13 = vadd.f32 -0.16666654, %v3026_v57  ;;  %vm2061_vm4 = vcmp.lt.s32.totalorder %v2060_v12, 0  ;;  %v2062_v51 = vsub.s32 0, %v2060_v12 }
 0x31a   : > { %v3398_v57 = vunpack.i.h.bf16 %v5484_v18 }
 0x31b   : > { %v3021_v47 = vmul.f32 %v3020_v53, %v3016_v33  ;;  %v3028_v61 = vmul.f32 %v3027_v13, %v3016_v33  ;;  %v2063_v43 = vsel %vm2061_vm4, %v2062_v51, %v2060_v12  ;;  %v1718_v13 = vpop.f32.mrf.mxu0 }
 0x31c   : > { %v2064_v54 = vclz %v2063_v43 }
 0x31d   : > { %v3022_v36 = vadd.f32 1.0, %v3021_v47  ;;  %v3029_v28 = vadd.f32 1.0, %v3028_v61 }
 0x31e   : > { %v3276_v37 = vadd.s32 4294967294, %v2064_v54 }
 0x31f   : > { %v3030_v60 = vmul.f32 %v3029_v28, %v3014_v1  ;;  %v3039_v23 = vxor.u32 2147483648, %v3022_v36  ;;  %v2102_v1 = vadd.s32 3, %v2085_v21 }
 0x320   : > { %vm3277_vm6 = vcmp.lt.s32.totalorder %v3276_v37, 0 }
 0x321   : > { %v3036_v8 = vxor.u32 2147483648, %v3030_v60  ;;  %v3040_v25 = vsel %vm3038_vm1, %v3039_v23, %v3030_v60  ;;  %v2067_v63 = vsel %vm3277_vm6, 0, %v3276_v37  ;;  %v2103_v31 = vand.u32 3, %v2102_v1 }
 0x322   : > { %v2068_v40 = vsub.s32 32, %v2067_v63  ;;  %v2069_v42 = vshll.u32 %v2060_v12, %v2067_v63  ;;  %v2072_v15 = vsub.s32 4294967266, %v2067_v63 }
 0x323   : > { %v3037_v59 = vsel %vm3035_vm3, %v3022_v36, %v3036_v8  ;;  %vm2108_vm2 = vcmp.eq.s32.totalorder %v2103_v31, 2  ;;  %vm2105_vm0 = vcmp.eq.s32.totalorder %v2103_v31, 0  ;;  %vm2104_vm7 = vcmp.lt.s32.totalorder %v2103_v31, 2 }
 0x324   : > { %v3041_v44 = vsel %vm3034_vm15, %v3037_v59, %v3040_v25  ;;  %v2070_v0 = vshrl.u32 %v2052_v41, %v2068_v40  ;;  %v2073_v5 = vadd.s32 127, %v2072_v15 }
 0x325   : > { %v3042_v62 = vsel %vm3031_vm10, nan, %v3041_v44 }
 0x326   : > { %v3130_v55 = vmul.f32 %v3413_v26, %v3042_v62  ;;  %v2071_v22 = vor.u32 %v2070_v0, %v2069_v42  ;;  %v2074_v29 = vshll.u32 %v2073_v5, 23 }
 0x328   : > { %v3138_v52 = vmul.f32 %v3130_v55, %v1736_v46  ;;  %v2075_v24 = vor.u32 4788187, %v2074_v29  ;;  %v2078_v4 = vcvt.s32.f32 %v2071_v22 }
 0x32a   : > { %3146 = vst [vmem:[%s5498_s26 + $0x38] sm:$0xff] %v3138_v52  ;;  %v2076_v38 = vand.u32 2147483647, %v2075_v24 }
 0x32c   : > { %v2079_v10 = vmul.f32 %v2078_v4, %v2076_v38 }
 0x32e   : > { %v2080_v34 = vxor.u32 2147483648, %v2079_v10 }
 0x330   : > { %v2081_v45 = vsel %vm1960_vm9, %v2080_v34, %v2079_v10 }
 0x331   : > { %v2084_v11 = vsel %vm1959_vm12, %v6451_v39, %v2081_v45 }
 0x332   : > { %v2086_v27 = vmul.f32 %v2084_v11, %v2084_v11 }
 0x334   : > { %v2087_v56 = vmul.f32 -0.001358992, %v2086_v27  ;;  %v2094_v32 = vmul.f32 -0.00019511016, %v2086_v27 }
 0x336   : > { %v2088_v50 = vadd.f32 0.041655596, %v2087_v56  ;;  %v2095_v49 = vadd.f32 0.008332121, %v2094_v32 }
 0x338   : > { %v2089_v35 = vmul.f32 %v2088_v50, %v2086_v27  ;;  %v2096_v33 = vmul.f32 %v2095_v49, %v2086_v27 }
 0x33a   : > { %v2090_v16 = vadd.f32 -0.4999988, %v2089_v35  ;;  %v2097_v3 = vadd.f32 -0.16666654, %v2096_v33 }
 0x33c   : > { %v2091_v9 = vmul.f32 %v2090_v16, %v2086_v27  ;;  %v2098_v2 = vmul.f32 %v2097_v3, %v2086_v27 }
 0x33e   : > { %v2092_v48 = vadd.f32 1.0, %v2091_v9  ;;  %v2099_v58 = vadd.f32 1.0, %v2098_v2 }
 0x340   : > { %v2100_v17 = vmul.f32 %v2099_v58, %v2084_v11  ;;  %v2109_v7 = vxor.u32 2147483648, %v2092_v48 }
 0x342   : > { %v2106_v20 = vxor.u32 2147483648, %v2100_v17  ;;  %v2110_v19 = vsel %vm2108_vm2, %v2109_v7, %v2100_v17 }
 0x344   : > { %v2107_v12 = vsel %vm2105_vm0, %v2092_v48, %v2106_v20 }
 0x345   : > { %v2111_v53 = vsel %vm2104_vm7, %v2107_v12, %v2110_v19 }
 0x346   : > { %v2112_v6 = vsel %vm2101_vm14, nan, %v2111_v53 }
 0x347   : > { %v3124_v51 = vmul.f32 %v3398_v57, %v2112_v6 }
 0x349   : > { %v3132_v47 = vmul.f32 %v3124_v51, %v1718_v13 }
 0x34b   : > { %3140 = vst [vmem:[%s5498_s26 + $0x8] sm:$0xff] %v3132_v47 }
 0x34c   : > { %3446 = shalt.err (!%p3443_p3)
}
 0x34d   : > { %s3494_s19 = smov 128   ;;  %s3495_s26 = smov 8  }
 0x34e   : > { %3322 = dma.vmem_to_hbm [thread:$0]  (%p3569_p5), %s3161_s11, 1024, %s3163_s25, %s3148_s12, %s3494_s19, %s3494_s19, %s3495_s26  }
 0x34f PF: > { %p3328_p4 = scmp.ge.s32.totalorder %s3481_s24, 2  ;;  %s3177_s28 = sand.u32 1, %s3469_s21  }
 0x350   : > { %s3178_s29 = scalar_lea.sflag [#allocation3], %s3177_s28 }
 0x351   : > { %p3325_p7 = pnand %p3328_p4, %p3573_p6 }
 0x353   : > { %p3326_p8 = pneg %p3325_p7 }
 0x355   : > { %3464 = dma.done.wait (%p3326_p8), %s3178_s29, 1024  }
 0x356   : > { %3466 = vsyncadd (%p3326_p8), %s3178_s29, 4294966272  ;;  %p16_p9 = scmp.ge.s32.totalorder %s3556_s27, 4   ;;  %s6457_s21 = smov %s3473_s22 }
 0x357   : > { %s6458_s22 = smov %s3477_s23  ;;  %s6459_s23 = smov %s3567_s30 }
 0x358   : > { %s6460_s24 = smov %s3556_s27  ;;  %18 = sbr.rel (!%p16_p9) target bundleno = 3 (0x3), region = 79 }
 0x35d   :  { %3184 = vsyncpa [#allocation3], 1 }
 0x35e   :  { %3186 = vsyncpa [#allocation3 + $0x1], 1 }

</bundles_post_ra>
